<compile_context>
chip_gen: v7x
topology: tpu7x:2x2x1
jax: 0.10.0
libtpu: 0.0.40
codegen_flags: <defaults>
</compile_context>

<pallas_src>
import functools
import math

import jax
import jax.numpy as jnp
from jax.experimental import pallas as pl
from jax.experimental.pallas import tpu as pltpu


def _round_up(x, m):
    return ((x + m - 1) // m) * m


# ----------------------------- fused Pallas kernel --------------------------

def _gpt_forward_kernel(
        x_ids_ref, emb_ref, pe_ref, pool_ref, pool_t_ref,
        sa_wqkv_ref, sa_bqkv_ref, sa_wout_ref, sa_bout_ref,
        ca_wq_ref, ca_bq_ref, ca_wkv_ref, ca_bkv_ref, ca_wout_ref, ca_bout_ref,
        n1_g_ref, n1_b_ref, n2_g_ref, n2_b_ref, n3_g_ref, n3_b_ref,
        ff_w1_ref, ff_b1_ref, ff_w2_ref, ff_b2_ref,
        head_w_ref, head_b_ref,
        out_ref,
        flat_ref,
        *, B, S, E, H, V, num_layers, lane):
    """Entire GptTransformerModel forward, fully VMEM-resident."""
    f32 = jnp.float32
    d_head = E // H
    scale = 1.0 / math.sqrt(d_head)
    eps = 1e-5

    pool = pool_ref[...]        # (E, H) feature -> head selector (0/1)
    pool_t = pool_t_ref[...]    # (H, E) head -> feature expander (0/1)
    emb_tbl = emb_ref[...]      # (V, E)
    iota_v = jax.lax.broadcasted_iota(jnp.int32, (S, V), 1)

    def mm(a, b):
        return jnp.dot(a, b, preferred_element_type=f32)

    def add_layernorm(x, y, gamma, beta):
        z = x + y
        mu = jnp.mean(z, axis=-1, keepdims=True)
        c = z - mu
        var = jnp.mean(c * c, axis=-1, keepdims=True)
        return c * jax.lax.rsqrt(var + eps) * gamma + beta

    def attention(q_blk, k_blk, v_blk, w_out_t, b_out):
        # q/k/v_blk: B blocks of (S, E).  The softmax runs over the block
        # index (torch's seq axis with batch_first=False).  Scores/weights are
        # computed with VPU elementwise ops + tiny head-pool matmuls.
        outs = []
        for i in range(B):
            scores = [mm(q_blk[i] * k_blk[m], pool) for m in range(B)]  # (S,H)
            mx = scores[0]
            for m in range(1, B):
                mx = jnp.maximum(mx, scores[m])
            exps = [jnp.exp(s - mx) for s in scores]
            denom = exps[0]
            for m in range(1, B):
                denom = denom + exps[m]
            inv = pl.reciprocal(denom, approx=True)                     # EUP
            o = None
            for m in range(B):
                p_full = mm(exps[m] * inv, pool_t)                      # (S,E)
                contrib = p_full * v_blk[m]
                o = contrib if o is None else o + contrib
            outs.append(mm(o, w_out_t) + b_out)                         # out-proj
        return outs

    # -------- embedding (one-hot matmul) + positional encoding --------------
    src = []
    for i in range(B):
        ids = x_ids_ref[i * S:(i + 1) * S, :]                  # (S, 1) int32
        onehot = (ids == iota_v).astype(f32)                   # (S, V)
        e_blk = mm(onehot, emb_tbl)                            # (S, E)
        src.append(e_blk + pe_ref[i:i + 1, :])                 # PE broadcast over S
    x = list(src)

    # -------- decoder layers (post-norm, ReLU FFN, dropout = no-op) ---------
    for l in range(num_layers):
        # self-attention: fused QKV projection (128-lane-aligned packing)
        w_qkv = sa_wqkv_ref[l]
        b_qkv = sa_bqkv_ref[l]
        q_blk, k_blk, v_blk = [], [], []
        for i in range(B):
            qkv = mm(x[i], w_qkv) + b_qkv                      # (S, 3*lane)
            q_blk.append(qkv[:, 0:E] * scale)
            k_blk.append(qkv[:, lane:lane + E])
            v_blk.append(qkv[:, 2 * lane:2 * lane + E])
        sa = attention(q_blk, k_blk, v_blk, sa_wout_ref[l], sa_bout_ref[l])
        x = [add_layernorm(x[i], sa[i], n1_g_ref[l], n1_b_ref[l])
             for i in range(B)]

        # cross-attention: queries from x, keys/values from memory (= source)
        w_q, b_q = ca_wq_ref[l], ca_bq_ref[l]
        w_kv, b_kv = ca_wkv_ref[l], ca_bkv_ref[l]
        q_blk, k_blk, v_blk = [], [], []
        for i in range(B):
            q_blk.append((mm(x[i], w_q) + b_q) * scale)
            kv = mm(src[i], w_kv) + b_kv                       # (S, 2*lane)
            k_blk.append(kv[:, 0:E])
            v_blk.append(kv[:, lane:lane + E])
        ca = attention(q_blk, k_blk, v_blk, ca_wout_ref[l], ca_bout_ref[l])
        x = [add_layernorm(x[i], ca[i], n2_g_ref[l], n2_b_ref[l])
             for i in range(B)]

        # feed-forward (bias + ReLU fused)
        w1, b1 = ff_w1_ref[l], ff_b1_ref[l]
        w2, b2 = ff_w2_ref[l], ff_b2_ref[l]
        ff = [mm(jnp.maximum(mm(x[i], w1) + b1, 0.0), w2) + b2
              for i in range(B)]
        x = [add_layernorm(x[i], ff[i], n3_g_ref[l], n3_b_ref[l])
             for i in range(B)]

    # -------- lane-aligned flatten + output head -----------------------------
    flat_ref[...] = jnp.zeros((B, S * lane), f32)
    for i in range(B):
        blk = x[i]                                             # (S, E)
        for s in range(S):
            # each sequence position lands on its own 128-lane tile (aligned)
            flat_ref[i:i + 1, s * lane:s * lane + E] = blk[s:s + 1, :]
    out_ref[...] = mm(flat_ref[...], head_w_ref[...]) + head_b_ref[...]


# ----------------------------- forward wrapper ------------------------------

def gpt_transformer_forward(prep, X, config):
    assert X.ndim == 2
    B, S = X.shape
    assert S == config["sequence_size"]
    E = config["embedding_dim"]
    V = config["vocab_size"]
    H = config["attention_heads"]
    num_layers = config["transformer_layers"]
    lane = _round_up(E, 128)

    x_ids = X.reshape(B * S, 1).astype(jnp.int32)
    pe_b = prep["pe"][:B]                                      # (B, E)

    inputs = [
        x_ids, prep["embedding"], pe_b, prep["pool"], prep["pool_t"],
        prep["sa_wqkv"], prep["sa_bqkv"], prep["sa_wout"], prep["sa_bout"],
        prep["ca_wq"], prep["ca_bq"], prep["ca_wkv"], prep["ca_bkv"],
        prep["ca_wout"], prep["ca_bout"],
        prep["n1_g"], prep["n1_b"], prep["n2_g"], prep["n2_b"],
        prep["n3_g"], prep["n3_b"],
        prep["ff_w1t"], prep["ff_b1"], prep["ff_w2t"], prep["ff_b2"],
        prep["head_wt"], prep["head_b"],
    ]
    kernel = functools.partial(
        _gpt_forward_kernel, B=B, S=S, E=E, H=H, V=V,
        num_layers=num_layers, lane=lane)
    vmem = pl.BlockSpec(memory_space=pltpu.MemorySpace.VMEM)
    return pl.pallas_call(
        kernel,
        out_shape=jax.ShapeDtypeStruct((B, V), jnp.float32),
        in_specs=[vmem] * len(inputs),
        out_specs=vmem,
        scratch_shapes=[pltpu.VMEM((B, S * lane), jnp.float32)],
    )(*inputs)


# ------------------- one-time parameter preparation (hoisted) ----------------

def prepare_params(params, config):
    """All transposes / in_proj splits / lane-aligned packing done ONCE."""
    E = config["embedding_dim"]
    S = config["sequence_size"]
    V = config["vocab_size"]
    H = config["attention_heads"]
    lane = _round_up(E, 128)
    f32 = jnp.float32

    def pack(ws, bs):
        n = len(ws)
        w = jnp.zeros((E, n * lane), f32)
        b = jnp.zeros((1, n * lane), f32)
        for i, (wi, bi) in enumerate(zip(ws, bs)):
            w = w.at[:, i * lane:i * lane + E].set(wi.T)
            b = b.at[:, i * lane:i * lane + E].set(bi[None, :])
        return w, b

    sa_wqkv, sa_bqkv, sa_wout, sa_bout = [], [], [], []
    ca_wq, ca_bq, ca_wkv, ca_bkv, ca_wout, ca_bout = [], [], [], [], [], []
    n1g, n1b, n2g, n2b, n3g, n3b = [], [], [], [], [], []
    w1t, b1, w2t, b2 = [], [], [], []
    for lp in params["layers"]:
        sa, ca = lp["self_attn"], lp["cross_attn"]
        wq, wk, wv = jnp.split(sa["in_proj_weight"], 3, axis=0)
        bq, bk, bv = jnp.split(sa["in_proj_bias"], 3)
        w, b = pack([wq, wk, wv], [bq, bk, bv])
        sa_wqkv.append(w); sa_bqkv.append(b)
        sa_wout.append(sa["out_proj_weight"].T)
        sa_bout.append(sa["out_proj_bias"][None, :])

        wq, wk, wv = jnp.split(ca["in_proj_weight"], 3, axis=0)
        bq, bk, bv = jnp.split(ca["in_proj_bias"], 3)
        ca_wq.append(wq.T); ca_bq.append(bq[None, :])
        w, b = pack([wk, wv], [bk, bv])
        ca_wkv.append(w); ca_bkv.append(b)
        ca_wout.append(ca["out_proj_weight"].T)
        ca_bout.append(ca["out_proj_bias"][None, :])

        n1g.append(lp["norm1_weight"][None, :]); n1b.append(lp["norm1_bias"][None, :])
        n2g.append(lp["norm2_weight"][None, :]); n2b.append(lp["norm2_bias"][None, :])
        n3g.append(lp["norm3_weight"][None, :]); n3b.append(lp["norm3_bias"][None, :])
        w1t.append(lp["linear1_weight"].T); b1.append(lp["linear1_bias"][None, :])
        w2t.append(lp["linear2_weight"].T); b2.append(lp["linear2_bias"][None, :])

    # output head: (V, S*E) -> lane-padded (S*lane, V), transposed once.
    w_head_t = params["output_weight"].T.reshape(S, E, V)
    head_w = jnp.zeros((S, lane, V), f32).at[:, :E, :].set(w_head_t)
    head_w = head_w.reshape(S * lane, V)

    # head-pool selector matrices for per-head score reduce / prob expand.
    pool = jnp.repeat(jnp.eye(H, dtype=f32), E // H, axis=0)   # (E, H)

    stk = lambda xs: jnp.stack(xs, axis=0)
    return {
        "embedding": params["embedding"], "pe": params["pe"],
        "pool": pool, "pool_t": pool.T,
        "sa_wqkv": stk(sa_wqkv), "sa_bqkv": stk(sa_bqkv),
        "sa_wout": stk(sa_wout), "sa_bout": stk(sa_bout),
        "ca_wq": stk(ca_wq), "ca_bq": stk(ca_bq),
        "ca_wkv": stk(ca_wkv), "ca_bkv": stk(ca_bkv),
        "ca_wout": stk(ca_wout), "ca_bout": stk(ca_bout),
        "n1_g": stk(n1g), "n1_b": stk(n1b),
        "n2_g": stk(n2g), "n2_b": stk(n2b),
        "n3_g": stk(n3g), "n3_b": stk(n3b),
        "ff_w1t": stk(w1t), "ff_b1": stk(b1),
        "ff_w2t": stk(w2t), "ff_b2": stk(b2),
        "head_wt": head_w, "head_b": params["output_bias"][None, :],
    }


# ----------------------------- deterministic init ---------------------------

def init_params(key, config):
    V = config["vocab_size"]
    E = config["embedding_dim"]
    S = config["sequence_size"]
    F = config["feed_forward"]
    L = config["transformer_layers"]

    def nrm(k, shape, scale=0.02):
        return scale * jax.random.normal(k, shape, jnp.float32)

    keys = jax.random.split(key, 3 + L)
    params = {
        "embedding": nrm(keys[0], (V, E), 1.0),
        "output_weight": nrm(keys[1], (V, S * E)),
        "output_bias": jnp.zeros((V,), jnp.float32),
    }

    # Sinusoidal positional-encoding table.
    max_len = 512
    position = jnp.arange(max_len, dtype=jnp.float32)[:, None]
    div_term = jnp.exp(jnp.arange(0, E, 2, dtype=jnp.float32)
                       * (-math.log(10000.0) / E))
    pe = jnp.zeros((max_len, E), jnp.float32)
    pe = pe.at[:, 0::2].set(jnp.sin(position * div_term))
    pe = pe.at[:, 1::2].set(jnp.cos(position * div_term))
    params["pe"] = pe

    layers = []
    for i in range(L):
        lk = jax.random.split(keys[3 + i], 6)

        def attn_params(k1, k2):
            return {
                "in_proj_weight": nrm(k1, (3 * E, E)),
                "in_proj_bias": jnp.zeros((3 * E,), jnp.float32),
                "out_proj_weight": nrm(k2, (E, E)),
                "out_proj_bias": jnp.zeros((E,), jnp.float32),
            }

        layers.append({
            "self_attn": attn_params(lk[0], lk[1]),
            "cross_attn": attn_params(lk[2], lk[3]),
            "linear1_weight": nrm(lk[4], (F, E)),
            "linear1_bias": jnp.zeros((F,), jnp.float32),
            "linear2_weight": nrm(lk[5], (E, F)),
            "linear2_bias": jnp.zeros((E,), jnp.float32),
            "norm1_weight": jnp.ones((E,), jnp.float32),
            "norm1_bias": jnp.zeros((E,), jnp.float32),
            "norm2_weight": jnp.ones((E,), jnp.float32),
            "norm2_bias": jnp.zeros((E,), jnp.float32),
            "norm3_weight": jnp.ones((E,), jnp.float32),
            "norm3_bias": jnp.zeros((E,), jnp.float32),
        })
    params["layers"] = layers
    return params


# ----------------------------- pure-JAX reference ----------------------------

def _reference_forward(params, X, config):
    """Straightforward jnp mirror of the PyTorch math (for validation)."""
    E = config["embedding_dim"]
    H = config["attention_heads"]
    B, S = X.shape
    Dh = E // H
    hp = jax.lax.Precision.HIGHEST

    def lin(x, w, b):
        return jnp.dot(x, w.T, precision=hp) + b

    def ln(x, g, b, eps=1e-5):
        mu = x.mean(-1, keepdims=True)
        c = x - mu
        var = (c * c).mean(-1, keepdims=True)
        return c * jax.lax.rsqrt(var + eps) * g + b

    def mha(q_in, k_in, v_in, p):
        L, N, _ = q_in.shape
        Lk = k_in.shape[0]
        Wq, Wk, Wv = jnp.split(p["in_proj_weight"], 3, axis=0)
        bq, bk, bv = jnp.split(p["in_proj_bias"], 3)
        q = lin(q_in.reshape(L * N, E), Wq, bq).reshape(L, N * H, Dh).swapaxes(0, 1)
        k = lin(k_in.reshape(Lk * N, E), Wk, bk).reshape(Lk, N * H, Dh).swapaxes(0, 1)
        v = lin(v_in.reshape(Lk * N, E), Wv, bv).reshape(Lk, N * H, Dh).swapaxes(0, 1)
        s = jnp.einsum("bld,bmd->blm", q, k, precision=hp) / math.sqrt(Dh)
        a = jax.nn.softmax(s, axis=-1)
        o = jnp.einsum("blm,bmd->bld", a, v, precision=hp)
        o = o.swapaxes(0, 1).reshape(L * N, E)
        return lin(o, p["out_proj_weight"], p["out_proj_bias"]).reshape(L, N, E)

    emb = params["embedding"][X]
    src = emb + params["pe"][:B][:, None, :]
    x = src
    for lp in params["layers"]:
        sa = mha(x, x, x, lp["self_attn"])
        x = ln(x + sa, lp["norm1_weight"], lp["norm1_bias"])
        ca = mha(x, src, src, lp["cross_attn"])
        x = ln(x + ca, lp["norm2_weight"], lp["norm2_bias"])
        h = jnp.maximum(lin(x.reshape(B * S, E),
                            lp["linear1_weight"], lp["linear1_bias"]), 0.0)
        ff = lin(h, lp["linear2_weight"], lp["linear2_bias"]).reshape(B, S, E)
        x = ln(x + ff, lp["norm3_weight"], lp["norm3_bias"])
    flat = x.reshape(B, S * E)
    return lin(flat, params["output_weight"], params["output_bias"])


# ----------------------------- main ------------------------------------------

if __name__ == "__main__":
    config = dict(
        vocab_size=64,
        embedding_dim=32,
        sequence_size=8,
        transformer_layers=2,
        attention_heads=4,
        dropout=0,             # inference mode: dropout layers are no-ops
        feed_forward=64,
        padding_index=0,
    )
    key = jax.random.PRNGKey(0)
    pkey, xkey = jax.random.split(key)
    params = init_params(pkey, config)
    prep = prepare_params(params, config)          # hoisted: transposes/packing

    B = 2
    X = jax.random.randint(xkey, (B, config["sequence_size"]), 0,
                           config["vocab_size"], dtype=jnp.int32)

    fwd = jax.jit(functools.partial(gpt_transformer_forward, config=config))
    logits = fwd(prep, X)
    logits = jax.block_until_ready(logits)

    assert logits.shape == (B, config["vocab_size"])
    assert bool(jnp.all(jnp.isfinite(logits)))

    # validate against a pure-JAX reference (loose tol: approx-reciprocal
    # softmax + MXU accumulation differences).
    ref = _reference_forward(params, X, config)
    max_err = float(jnp.max(jnp.abs(logits - ref)))
    assert max_err < 5e-2, f"kernel/reference mismatch: max_err={max_err}"

    print("KERNEL_OK")
</pallas_src>

<mosaic_0001>
module attributes {stable_mosaic.version = 11 : i64} {
  func.func @_gpt_forward_kernel(%arg0: memref<16x1xi32, #tpu.memory_space<vmem>>, %arg1: memref<64x32xf32, #tpu.memory_space<vmem>>, %arg2: memref<2x32xf32, #tpu.memory_space<vmem>>, %arg3: memref<32x4xf32, #tpu.memory_space<vmem>>, %arg4: memref<4x32xf32, #tpu.memory_space<vmem>>, %arg5: memref<2x32x384xf32, #tpu.memory_space<vmem>>, %arg6: memref<2x1x384xf32, #tpu.memory_space<vmem>>, %arg7: memref<2x32x32xf32, #tpu.memory_space<vmem>>, %arg8: memref<2x1x32xf32, #tpu.memory_space<vmem>>, %arg9: memref<2x32x32xf32, #tpu.memory_space<vmem>>, %arg10: memref<2x1x32xf32, #tpu.memory_space<vmem>>, %arg11: memref<2x32x256xf32, #tpu.memory_space<vmem>>, %arg12: memref<2x1x256xf32, #tpu.memory_space<vmem>>, %arg13: memref<2x32x32xf32, #tpu.memory_space<vmem>>, %arg14: memref<2x1x32xf32, #tpu.memory_space<vmem>>, %arg15: memref<2x1x32xf32, #tpu.memory_space<vmem>>, %arg16: memref<2x1x32xf32, #tpu.memory_space<vmem>>, %arg17: memref<2x1x32xf32, #tpu.memory_space<vmem>>, %arg18: memref<2x1x32xf32, #tpu.memory_space<vmem>>, %arg19: memref<2x1x32xf32, #tpu.memory_space<vmem>>, %arg20: memref<2x1x32xf32, #tpu.memory_space<vmem>>, %arg21: memref<2x32x64xf32, #tpu.memory_space<vmem>>, %arg22: memref<2x1x64xf32, #tpu.memory_space<vmem>>, %arg23: memref<2x64x32xf32, #tpu.memory_space<vmem>>, %arg24: memref<2x1x32xf32, #tpu.memory_space<vmem>>, %arg25: memref<1024x64xf32, #tpu.memory_space<vmem>>, %arg26: memref<1x64xf32, #tpu.memory_space<vmem>>, %arg27: memref<2x64xf32, #tpu.memory_space<vmem>>, %arg28: memref<2x1024xf32, #tpu.memory_space<vmem>>) attributes {dimension_semantics = [], scalar_prefetch = 0 : i64, scratch_operands = 1 : i64, tpu.core_type = #tpu.core_type<tc>} {
    %c0 = arith.constant 0 : index
    %c0_0 = arith.constant 0 : index
    %0 = vector.load %arg3[%c0, %c0_0] : memref<32x4xf32, #tpu.memory_space<vmem>>, vector<32x4xf32>
    %c0_1 = arith.constant 0 : index
    %c0_2 = arith.constant 0 : index
    %1 = vector.load %arg4[%c0_1, %c0_2] : memref<4x32xf32, #tpu.memory_space<vmem>>, vector<4x32xf32>
    %c0_3 = arith.constant 0 : index
    %c0_4 = arith.constant 0 : index
    %2 = vector.load %arg1[%c0_3, %c0_4] : memref<64x32xf32, #tpu.memory_space<vmem>>, vector<64x32xf32>
    %3 = tpu.iota {dimensions = array<i32: 1>} : vector<8x64xi32>
    %c0_5 = arith.constant 0 : index
    %c0_6 = arith.constant 0 : index
    %4 = vector.load %arg0[%c0_5, %c0_6] : memref<16x1xi32, #tpu.memory_space<vmem>>, vector<8x1xi32>
    %5 = vector.broadcast %4 : vector<8x1xi32> to vector<8x64xi32>
    %6 = arith.cmpi eq, %5, %3 : vector<8x64xi32>
    %7 = arith.extui %6 : vector<8x64xi1> to vector<8x64xi32>
    %8 = arith.sitofp %7 : vector<8x64xi32> to vector<8x64xf32>
    %cst = arith.constant dense<0.000000e+00> : vector<8x32xf32>
    %9 = tpu.matmul %8, %2, %cst {dimension_numbers = #tpu.dot_dimension_numbers<[1], [0], [0], [1], [0, 0, 1, 1], [], []>} : vector<8x64xf32>, vector<64x32xf32>, vector<8x32xf32> -> vector<8x32xf32>
    %c0_7 = arith.constant 0 : index
    %c0_8 = arith.constant 0 : index
    %10 = vector.load %arg2[%c0_7, %c0_8] : memref<2x32xf32, #tpu.memory_space<vmem>>, vector<1x32xf32>
    %11 = vector.broadcast %10 : vector<1x32xf32> to vector<8x32xf32>
    %12 = arith.addf %9, %11 : vector<8x32xf32>
    %c8 = arith.constant 8 : index
    %c0_9 = arith.constant 0 : index
    %13 = vector.load %arg0[%c8, %c0_9] : memref<16x1xi32, #tpu.memory_space<vmem>>, vector<8x1xi32>
    %14 = vector.broadcast %13 : vector<8x1xi32> to vector<8x64xi32>
    %15 = arith.cmpi eq, %14, %3 : vector<8x64xi32>
    %16 = arith.extui %15 : vector<8x64xi1> to vector<8x64xi32>
    %17 = arith.sitofp %16 : vector<8x64xi32> to vector<8x64xf32>
    %cst_10 = arith.constant dense<0.000000e+00> : vector<8x32xf32>
    %18 = tpu.matmul %17, %2, %cst_10 {dimension_numbers = #tpu.dot_dimension_numbers<[1], [0], [0], [1], [0, 0, 1, 1], [], []>} : vector<8x64xf32>, vector<64x32xf32>, vector<8x32xf32> -> vector<8x32xf32>
    %c1 = arith.constant 1 : index
    %c0_11 = arith.constant 0 : index
    %19 = vector.load %arg2[%c1, %c0_11] : memref<2x32xf32, #tpu.memory_space<vmem>>, vector<1x32xf32>
    %20 = vector.broadcast %19 : vector<1x32xf32> to vector<8x32xf32>
    %21 = arith.addf %18, %20 : vector<8x32xf32>
    %c0_12 = arith.constant 0 : index
    %c0_13 = arith.constant 0 : index
    %c0_14 = arith.constant 0 : index
    %22 = vector.load %arg5[%c0_12, %c0_13, %c0_14] : memref<2x32x384xf32, #tpu.memory_space<vmem>>, vector<1x32x384xf32>
    %23 = vector.shape_cast %22 : vector<1x32x384xf32> to vector<32x384xf32>
    %c0_15 = arith.constant 0 : index
    %c0_16 = arith.constant 0 : index
    %c0_17 = arith.constant 0 : index
    %24 = vector.load %arg6[%c0_15, %c0_16, %c0_17] : memref<2x1x384xf32, #tpu.memory_space<vmem>>, vector<1x1x384xf32>
    %25 = vector.shape_cast %24 : vector<1x1x384xf32> to vector<1x384xf32>
    %cst_18 = arith.constant dense<0.000000e+00> : vector<8x384xf32>
    %26 = tpu.matmul %12, %23, %cst_18 {dimension_numbers = #tpu.dot_dimension_numbers<[1], [0], [0], [1], [0, 0, 1, 1], [], []>} : vector<8x32xf32>, vector<32x384xf32>, vector<8x384xf32> -> vector<8x384xf32>
    %27 = vector.broadcast %25 : vector<1x384xf32> to vector<8x384xf32>
    %28 = arith.addf %26, %27 : vector<8x384xf32>
    %29 = vector.extract_strided_slice %28 {offsets = [0, 0], sizes = [8, 32], strides = [1, 1]} : vector<8x384xf32> to vector<8x32xf32>
    %cst_19 = arith.constant 0.353553385 : f32
    %30 = vector.broadcast %cst_19 : f32 to vector<8x32xf32>
    %31 = arith.mulf %29, %30 : vector<8x32xf32>
    %32 = vector.extract_strided_slice %28 {offsets = [0, 128], sizes = [8, 32], strides = [1, 1]} : vector<8x384xf32> to vector<8x32xf32>
    %33 = vector.extract_strided_slice %28 {offsets = [0, 256], sizes = [8, 32], strides = [1, 1]} : vector<8x384xf32> to vector<8x32xf32>
    %cst_20 = arith.constant dense<0.000000e+00> : vector<8x384xf32>
    %34 = tpu.matmul %21, %23, %cst_20 {dimension_numbers = #tpu.dot_dimension_numbers<[1], [0], [0], [1], [0, 0, 1, 1], [], []>} : vector<8x32xf32>, vector<32x384xf32>, vector<8x384xf32> -> vector<8x384xf32>
    %35 = vector.broadcast %25 : vector<1x384xf32> to vector<8x384xf32>
    %36 = arith.addf %34, %35 : vector<8x384xf32>
    %37 = vector.extract_strided_slice %36 {offsets = [0, 0], sizes = [8, 32], strides = [1, 1]} : vector<8x384xf32> to vector<8x32xf32>
    %cst_21 = arith.constant 0.353553385 : f32
    %38 = vector.broadcast %cst_21 : f32 to vector<8x32xf32>
    %39 = arith.mulf %37, %38 : vector<8x32xf32>
    %40 = vector.extract_strided_slice %36 {offsets = [0, 128], sizes = [8, 32], strides = [1, 1]} : vector<8x384xf32> to vector<8x32xf32>
    %41 = vector.extract_strided_slice %36 {offsets = [0, 256], sizes = [8, 32], strides = [1, 1]} : vector<8x384xf32> to vector<8x32xf32>
    %c0_22 = arith.constant 0 : index
    %c0_23 = arith.constant 0 : index
    %c0_24 = arith.constant 0 : index
    %42 = vector.load %arg7[%c0_22, %c0_23, %c0_24] : memref<2x32x32xf32, #tpu.memory_space<vmem>>, vector<1x32x32xf32>
    %43 = vector.shape_cast %42 : vector<1x32x32xf32> to vector<32x32xf32>
    %c0_25 = arith.constant 0 : index
    %c0_26 = arith.constant 0 : index
    %c0_27 = arith.constant 0 : index
    %44 = vector.load %arg8[%c0_25, %c0_26, %c0_27] : memref<2x1x32xf32, #tpu.memory_space<vmem>>, vector<1x1x32xf32>
    %45 = vector.shape_cast %44 : vector<1x1x32xf32> to vector<1x32xf32>
    %46 = arith.mulf %31, %32 : vector<8x32xf32>
    %cst_28 = arith.constant dense<0.000000e+00> : vector<8x4xf32>
    %47 = tpu.matmul %46, %0, %cst_28 {dimension_numbers = #tpu.dot_dimension_numbers<[1], [0], [0], [1], [0, 0, 1, 1], [], []>} : vector<8x32xf32>, vector<32x4xf32>, vector<8x4xf32> -> vector<8x4xf32>
    %48 = arith.mulf %31, %40 : vector<8x32xf32>
    %cst_29 = arith.constant dense<0.000000e+00> : vector<8x4xf32>
    %49 = tpu.matmul %48, %0, %cst_29 {dimension_numbers = #tpu.dot_dimension_numbers<[1], [0], [0], [1], [0, 0, 1, 1], [], []>} : vector<8x32xf32>, vector<32x4xf32>, vector<8x4xf32> -> vector<8x4xf32>
    %50 = arith.maximumf %47, %49 : vector<8x4xf32>
    %51 = arith.subf %47, %50 : vector<8x4xf32>
    %52 = math.exp %51 : vector<8x4xf32>
    %53 = arith.subf %49, %50 : vector<8x4xf32>
    %54 = math.exp %53 : vector<8x4xf32>
    %55 = arith.addf %52, %54 : vector<8x4xf32>
    %56 = tpu.reciprocal %55 {approx = true} : vector<8x4xf32> -> vector<8x4xf32>
    %57 = arith.mulf %52, %56 : vector<8x4xf32>
    %cst_30 = arith.constant dense<0.000000e+00> : vector<8x32xf32>
    %58 = tpu.matmul %57, %1, %cst_30 {dimension_numbers = #tpu.dot_dimension_numbers<[1], [0], [0], [1], [0, 0, 1, 1], [], []>} : vector<8x4xf32>, vector<4x32xf32>, vector<8x32xf32> -> vector<8x32xf32>
    %59 = arith.mulf %58, %33 : vector<8x32xf32>
    %60 = arith.mulf %54, %56 : vector<8x4xf32>
    %cst_31 = arith.constant dense<0.000000e+00> : vector<8x32xf32>
    %61 = tpu.matmul %60, %1, %cst_31 {dimension_numbers = #tpu.dot_dimension_numbers<[1], [0], [0], [1], [0, 0, 1, 1], [], []>} : vector<8x4xf32>, vector<4x32xf32>, vector<8x32xf32> -> vector<8x32xf32>
    %62 = arith.mulf %61, %41 : vector<8x32xf32>
    %63 = arith.addf %59, %62 : vector<8x32xf32>
    %cst_32 = arith.constant dense<0.000000e+00> : vector<8x32xf32>
    %64 = tpu.matmul %63, %43, %cst_32 {dimension_numbers = #tpu.dot_dimension_numbers<[1], [0], [0], [1], [0, 0, 1, 1], [], []>} : vector<8x32xf32>, vector<32x32xf32>, vector<8x32xf32> -> vector<8x32xf32>
    %65 = vector.broadcast %45 : vector<1x32xf32> to vector<8x32xf32>
    %66 = arith.addf %64, %65 : vector<8x32xf32>
    %67 = arith.mulf %39, %32 : vector<8x32xf32>
    %cst_33 = arith.constant dense<0.000000e+00> : vector<8x4xf32>
    %68 = tpu.matmul %67, %0, %cst_33 {dimension_numbers = #tpu.dot_dimension_numbers<[1], [0], [0], [1], [0, 0, 1, 1], [], []>} : vector<8x32xf32>, vector<32x4xf32>, vector<8x4xf32> -> vector<8x4xf32>
    %69 = arith.mulf %39, %40 : vector<8x32xf32>
    %cst_34 = arith.constant dense<0.000000e+00> : vector<8x4xf32>
    %70 = tpu.matmul %69, %0, %cst_34 {dimension_numbers = #tpu.dot_dimension_numbers<[1], [0], [0], [1], [0, 0, 1, 1], [], []>} : vector<8x32xf32>, vector<32x4xf32>, vector<8x4xf32> -> vector<8x4xf32>
    %71 = arith.maximumf %68, %70 : vector<8x4xf32>
    %72 = arith.subf %68, %71 : vector<8x4xf32>
    %73 = math.exp %72 : vector<8x4xf32>
    %74 = arith.subf %70, %71 : vector<8x4xf32>
    %75 = math.exp %74 : vector<8x4xf32>
    %76 = arith.addf %73, %75 : vector<8x4xf32>
    %77 = tpu.reciprocal %76 {approx = true} : vector<8x4xf32> -> vector<8x4xf32>
    %78 = arith.mulf %73, %77 : vector<8x4xf32>
    %cst_35 = arith.constant dense<0.000000e+00> : vector<8x32xf32>
    %79 = tpu.matmul %78, %1, %cst_35 {dimension_numbers = #tpu.dot_dimension_numbers<[1], [0], [0], [1], [0, 0, 1, 1], [], []>} : vector<8x4xf32>, vector<4x32xf32>, vector<8x32xf32> -> vector<8x32xf32>
    %80 = arith.mulf %79, %33 : vector<8x32xf32>
    %81 = arith.mulf %75, %77 : vector<8x4xf32>
    %cst_36 = arith.constant dense<0.000000e+00> : vector<8x32xf32>
    %82 = tpu.matmul %81, %1, %cst_36 {dimension_numbers = #tpu.dot_dimension_numbers<[1], [0], [0], [1], [0, 0, 1, 1], [], []>} : vector<8x4xf32>, vector<4x32xf32>, vector<8x32xf32> -> vector<8x32xf32>
    %83 = arith.mulf %82, %41 : vector<8x32xf32>
    %84 = arith.addf %80, %83 : vector<8x32xf32>
    %cst_37 = arith.constant dense<0.000000e+00> : vector<8x32xf32>
    %85 = tpu.matmul %84, %43, %cst_37 {dimension_numbers = #tpu.dot_dimension_numbers<[1], [0], [0], [1], [0, 0, 1, 1], [], []>} : vector<8x32xf32>, vector<32x32xf32>, vector<8x32xf32> -> vector<8x32xf32>
    %86 = vector.broadcast %45 : vector<1x32xf32> to vector<8x32xf32>
    %87 = arith.addf %85, %86 : vector<8x32xf32>
    %c0_38 = arith.constant 0 : index
    %c0_39 = arith.constant 0 : index
    %c0_40 = arith.constant 0 : index
    %88 = vector.load %arg15[%c0_38, %c0_39, %c0_40] : memref<2x1x32xf32, #tpu.memory_space<vmem>>, vector<1x1x32xf32>
    %89 = vector.shape_cast %88 : vector<1x1x32xf32> to vector<1x32xf32>
    %c0_41 = arith.constant 0 : index
    %c0_42 = arith.constant 0 : index
    %c0_43 = arith.constant 0 : index
    %90 = vector.load %arg16[%c0_41, %c0_42, %c0_43] : memref<2x1x32xf32, #tpu.memory_space<vmem>>, vector<1x1x32xf32>
    %91 = vector.shape_cast %90 : vector<1x1x32xf32> to vector<1x32xf32>
    %92 = arith.addf %12, %66 : vector<8x32xf32>
    %cst_44 = arith.constant dense<0.000000e+00> : vector<8xf32>
    %93 = vector.multi_reduction <add>, %92, %cst_44 [1] : vector<8x32xf32> to vector<8xf32>
    %94 = vector.shape_cast %93 : vector<8xf32> to vector<8x1xf32>
    %cst_45 = arith.constant 3.200000e+01 : f32
    %95 = vector.broadcast %cst_45 : f32 to vector<8x1xf32>
    %96 = arith.divf %94, %95 : vector<8x1xf32>
    %97 = vector.broadcast %96 : vector<8x1xf32> to vector<8x32xf32>
    %98 = arith.subf %92, %97 : vector<8x32xf32>
    %99 = arith.mulf %98, %98 : vector<8x32xf32>
    %cst_46 = arith.constant dense<0.000000e+00> : vector<8xf32>
    %100 = vector.multi_reduction <add>, %99, %cst_46 [1] : vector<8x32xf32> to vector<8xf32>
    %101 = vector.shape_cast %100 : vector<8xf32> to vector<8x1xf32>
    %cst_47 = arith.constant 3.200000e+01 : f32
    %102 = vector.broadcast %cst_47 : f32 to vector<8x1xf32>
    %103 = arith.divf %101, %102 : vector<8x1xf32>
    %cst_48 = arith.constant 9.99999974E-6 : f32
    %104 = vector.broadcast %cst_48 : f32 to vector<8x1xf32>
    %105 = arith.addf %103, %104 : vector<8x1xf32>
    %106 = math.rsqrt %105 : vector<8x1xf32>
    %107 = vector.broadcast %106 : vector<8x1xf32> to vector<8x32xf32>
    %108 = arith.mulf %98, %107 : vector<8x32xf32>
    %109 = vector.broadcast %89 : vector<1x32xf32> to vector<8x32xf32>
    %110 = arith.mulf %108, %109 : vector<8x32xf32>
    %111 = vector.broadcast %91 : vector<1x32xf32> to vector<8x32xf32>
    %112 = arith.addf %110, %111 : vector<8x32xf32>
    %c0_49 = arith.constant 0 : index
    %c0_50 = arith.constant 0 : index
    %c0_51 = arith.constant 0 : index
    %113 = vector.load %arg15[%c0_49, %c0_50, %c0_51] : memref<2x1x32xf32, #tpu.memory_space<vmem>>, vector<1x1x32xf32>
    %114 = vector.shape_cast %113 : vector<1x1x32xf32> to vector<1x32xf32>
    %c0_52 = arith.constant 0 : index
    %c0_53 = arith.constant 0 : index
    %c0_54 = arith.constant 0 : index
    %115 = vector.load %arg16[%c0_52, %c0_53, %c0_54] : memref<2x1x32xf32, #tpu.memory_space<vmem>>, vector<1x1x32xf32>
    %116 = vector.shape_cast %115 : vector<1x1x32xf32> to vector<1x32xf32>
    %117 = arith.addf %21, %87 : vector<8x32xf32>
    %cst_55 = arith.constant dense<0.000000e+00> : vector<8xf32>
    %118 = vector.multi_reduction <add>, %117, %cst_55 [1] : vector<8x32xf32> to vector<8xf32>
    %119 = vector.shape_cast %118 : vector<8xf32> to vector<8x1xf32>
    %cst_56 = arith.constant 3.200000e+01 : f32
    %120 = vector.broadcast %cst_56 : f32 to vector<8x1xf32>
    %121 = arith.divf %119, %120 : vector<8x1xf32>
    %122 = vector.broadcast %121 : vector<8x1xf32> to vector<8x32xf32>
    %123 = arith.subf %117, %122 : vector<8x32xf32>
    %124 = arith.mulf %123, %123 : vector<8x32xf32>
    %cst_57 = arith.constant dense<0.000000e+00> : vector<8xf32>
    %125 = vector.multi_reduction <add>, %124, %cst_57 [1] : vector<8x32xf32> to vector<8xf32>
    %126 = vector.shape_cast %125 : vector<8xf32> to vector<8x1xf32>
    %cst_58 = arith.constant 3.200000e+01 : f32
    %127 = vector.broadcast %cst_58 : f32 to vector<8x1xf32>
    %128 = arith.divf %126, %127 : vector<8x1xf32>
    %cst_59 = arith.constant 9.99999974E-6 : f32
    %129 = vector.broadcast %cst_59 : f32 to vector<8x1xf32>
    %130 = arith.addf %128, %129 : vector<8x1xf32>
    %131 = math.rsqrt %130 : vector<8x1xf32>
    %132 = vector.broadcast %131 : vector<8x1xf32> to vector<8x32xf32>
    %133 = arith.mulf %123, %132 : vector<8x32xf32>
    %134 = vector.broadcast %114 : vector<1x32xf32> to vector<8x32xf32>
    %135 = arith.mulf %133, %134 : vector<8x32xf32>
    %136 = vector.broadcast %116 : vector<1x32xf32> to vector<8x32xf32>
    %137 = arith.addf %135, %136 : vector<8x32xf32>
    %c0_60 = arith.constant 0 : index
    %c0_61 = arith.constant 0 : index
    %c0_62 = arith.constant 0 : index
    %138 = vector.load %arg9[%c0_60, %c0_61, %c0_62] : memref<2x32x32xf32, #tpu.memory_space<vmem>>, vector<1x32x32xf32>
    %139 = vector.shape_cast %138 : vector<1x32x32xf32> to vector<32x32xf32>
    %c0_63 = arith.constant 0 : index
    %c0_64 = arith.constant 0 : index
    %c0_65 = arith.constant 0 : index
    %140 = vector.load %arg10[%c0_63, %c0_64, %c0_65] : memref<2x1x32xf32, #tpu.memory_space<vmem>>, vector<1x1x32xf32>
    %141 = vector.shape_cast %140 : vector<1x1x32xf32> to vector<1x32xf32>
    %c0_66 = arith.constant 0 : index
    %c0_67 = arith.constant 0 : index
    %c0_68 = arith.constant 0 : index
    %142 = vector.load %arg11[%c0_66, %c0_67, %c0_68] : memref<2x32x256xf32, #tpu.memory_space<vmem>>, vector<1x32x256xf32>
    %143 = vector.shape_cast %142 : vector<1x32x256xf32> to vector<32x256xf32>
    %c0_69 = arith.constant 0 : index
    %c0_70 = arith.constant 0 : index
    %c0_71 = arith.constant 0 : index
    %144 = vector.load %arg12[%c0_69, %c0_70, %c0_71] : memref<2x1x256xf32, #tpu.memory_space<vmem>>, vector<1x1x256xf32>
    %145 = vector.shape_cast %144 : vector<1x1x256xf32> to vector<1x256xf32>
    %cst_72 = arith.constant dense<0.000000e+00> : vector<8x32xf32>
    %146 = tpu.matmul %112, %139, %cst_72 {dimension_numbers = #tpu.dot_dimension_numbers<[1], [0], [0], [1], [0, 0, 1, 1], [], []>} : vector<8x32xf32>, vector<32x32xf32>, vector<8x32xf32> -> vector<8x32xf32>
    %147 = vector.broadcast %141 : vector<1x32xf32> to vector<8x32xf32>
    %148 = arith.addf %146, %147 : vector<8x32xf32>
    %cst_73 = arith.constant 0.353553385 : f32
    %149 = vector.broadcast %cst_73 : f32 to vector<8x32xf32>
    %150 = arith.mulf %148, %149 : vector<8x32xf32>
    %cst_74 = arith.constant dense<0.000000e+00> : vector<8x256xf32>
    %151 = tpu.matmul %12, %143, %cst_74 {dimension_numbers = #tpu.dot_dimension_numbers<[1], [0], [0], [1], [0, 0, 1, 1], [], []>} : vector<8x32xf32>, vector<32x256xf32>, vector<8x256xf32> -> vector<8x256xf32>
    %152 = vector.broadcast %145 : vector<1x256xf32> to vector<8x256xf32>
    %153 = arith.addf %151, %152 : vector<8x256xf32>
    %154 = vector.extract_strided_slice %153 {offsets = [0, 0], sizes = [8, 32], strides = [1, 1]} : vector<8x256xf32> to vector<8x32xf32>
    %155 = vector.extract_strided_slice %153 {offsets = [0, 128], sizes = [8, 32], strides = [1, 1]} : vector<8x256xf32> to vector<8x32xf32>
    %cst_75 = arith.constant dense<0.000000e+00> : vector<8x32xf32>
    %156 = tpu.matmul %137, %139, %cst_75 {dimension_numbers = #tpu.dot_dimension_numbers<[1], [0], [0], [1], [0, 0, 1, 1], [], []>} : vector<8x32xf32>, vector<32x32xf32>, vector<8x32xf32> -> vector<8x32xf32>
    %157 = vector.broadcast %141 : vector<1x32xf32> to vector<8x32xf32>
    %158 = arith.addf %156, %157 : vector<8x32xf32>
    %cst_76 = arith.constant 0.353553385 : f32
    %159 = vector.broadcast %cst_76 : f32 to vector<8x32xf32>
    %160 = arith.mulf %158, %159 : vector<8x32xf32>
    %cst_77 = arith.constant dense<0.000000e+00> : vector<8x256xf32>
    %161 = tpu.matmul %21, %143, %cst_77 {dimension_numbers = #tpu.dot_dimension_numbers<[1], [0], [0], [1], [0, 0, 1, 1], [], []>} : vector<8x32xf32>, vector<32x256xf32>, vector<8x256xf32> -> vector<8x256xf32>
    %162 = vector.broadcast %145 : vector<1x256xf32> to vector<8x256xf32>
    %163 = arith.addf %161, %162 : vector<8x256xf32>
    %164 = vector.extract_strided_slice %163 {offsets = [0, 0], sizes = [8, 32], strides = [1, 1]} : vector<8x256xf32> to vector<8x32xf32>
    %165 = vector.extract_strided_slice %163 {offsets = [0, 128], sizes = [8, 32], strides = [1, 1]} : vector<8x256xf32> to vector<8x32xf32>
    %c0_78 = arith.constant 0 : index
    %c0_79 = arith.constant 0 : index
    %c0_80 = arith.constant 0 : index
    %166 = vector.load %arg13[%c0_78, %c0_79, %c0_80] : memref<2x32x32xf32, #tpu.memory_space<vmem>>, vector<1x32x32xf32>
    %167 = vector.shape_cast %166 : vector<1x32x32xf32> to vector<32x32xf32>
    %c0_81 = arith.constant 0 : index
    %c0_82 = arith.constant 0 : index
    %c0_83 = arith.constant 0 : index
    %168 = vector.load %arg14[%c0_81, %c0_82, %c0_83] : memref<2x1x32xf32, #tpu.memory_space<vmem>>, vector<1x1x32xf32>
    %169 = vector.shape_cast %168 : vector<1x1x32xf32> to vector<1x32xf32>
    %170 = arith.mulf %150, %154 : vector<8x32xf32>
    %cst_84 = arith.constant dense<0.000000e+00> : vector<8x4xf32>
    %171 = tpu.matmul %170, %0, %cst_84 {dimension_numbers = #tpu.dot_dimension_numbers<[1], [0], [0], [1], [0, 0, 1, 1], [], []>} : vector<8x32xf32>, vector<32x4xf32>, vector<8x4xf32> -> vector<8x4xf32>
    %172 = arith.mulf %150, %164 : vector<8x32xf32>
    %cst_85 = arith.constant dense<0.000000e+00> : vector<8x4xf32>
    %173 = tpu.matmul %172, %0, %cst_85 {dimension_numbers = #tpu.dot_dimension_numbers<[1], [0], [0], [1], [0, 0, 1, 1], [], []>} : vector<8x32xf32>, vector<32x4xf32>, vector<8x4xf32> -> vector<8x4xf32>
    %174 = arith.maximumf %171, %173 : vector<8x4xf32>
    %175 = arith.subf %171, %174 : vector<8x4xf32>
    %176 = math.exp %175 : vector<8x4xf32>
    %177 = arith.subf %173, %174 : vector<8x4xf32>
    %178 = math.exp %177 : vector<8x4xf32>
    %179 = arith.addf %176, %178 : vector<8x4xf32>
    %180 = tpu.reciprocal %179 {approx = true} : vector<8x4xf32> -> vector<8x4xf32>
    %181 = arith.mulf %176, %180 : vector<8x4xf32>
    %cst_86 = arith.constant dense<0.000000e+00> : vector<8x32xf32>
    %182 = tpu.matmul %181, %1, %cst_86 {dimension_numbers = #tpu.dot_dimension_numbers<[1], [0], [0], [1], [0, 0, 1, 1], [], []>} : vector<8x4xf32>, vector<4x32xf32>, vector<8x32xf32> -> vector<8x32xf32>
    %183 = arith.mulf %182, %155 : vector<8x32xf32>
    %184 = arith.mulf %178, %180 : vector<8x4xf32>
    %cst_87 = arith.constant dense<0.000000e+00> : vector<8x32xf32>
    %185 = tpu.matmul %184, %1, %cst_87 {dimension_numbers = #tpu.dot_dimension_numbers<[1], [0], [0], [1], [0, 0, 1, 1], [], []>} : vector<8x4xf32>, vector<4x32xf32>, vector<8x32xf32> -> vector<8x32xf32>
    %186 = arith.mulf %185, %165 : vector<8x32xf32>
    %187 = arith.addf %183, %186 : vector<8x32xf32>
    %cst_88 = arith.constant dense<0.000000e+00> : vector<8x32xf32>
    %188 = tpu.matmul %187, %167, %cst_88 {dimension_numbers = #tpu.dot_dimension_numbers<[1], [0], [0], [1], [0, 0, 1, 1], [], []>} : vector<8x32xf32>, vector<32x32xf32>, vector<8x32xf32> -> vector<8x32xf32>
    %189 = vector.broadcast %169 : vector<1x32xf32> to vector<8x32xf32>
    %190 = arith.addf %188, %189 : vector<8x32xf32>
    %191 = arith.mulf %160, %154 : vector<8x32xf32>
    %cst_89 = arith.constant dense<0.000000e+00> : vector<8x4xf32>
    %192 = tpu.matmul %191, %0, %cst_89 {dimension_numbers = #tpu.dot_dimension_numbers<[1], [0], [0], [1], [0, 0, 1, 1], [], []>} : vector<8x32xf32>, vector<32x4xf32>, vector<8x4xf32> -> vector<8x4xf32>
    %193 = arith.mulf %160, %164 : vector<8x32xf32>
    %cst_90 = arith.constant dense<0.000000e+00> : vector<8x4xf32>
    %194 = tpu.matmul %193, %0, %cst_90 {dimension_numbers = #tpu.dot_dimension_numbers<[1], [0], [0], [1], [0, 0, 1, 1], [], []>} : vector<8x32xf32>, vector<32x4xf32>, vector<8x4xf32> -> vector<8x4xf32>
    %195 = arith.maximumf %192, %194 : vector<8x4xf32>
    %196 = arith.subf %192, %195 : vector<8x4xf32>
    %197 = math.exp %196 : vector<8x4xf32>
    %198 = arith.subf %194, %195 : vector<8x4xf32>
    %199 = math.exp %198 : vector<8x4xf32>
    %200 = arith.addf %197, %199 : vector<8x4xf32>
    %201 = tpu.reciprocal %200 {approx = true} : vector<8x4xf32> -> vector<8x4xf32>
    %202 = arith.mulf %197, %201 : vector<8x4xf32>
    %cst_91 = arith.constant dense<0.000000e+00> : vector<8x32xf32>
    %203 = tpu.matmul %202, %1, %cst_91 {dimension_numbers = #tpu.dot_dimension_numbers<[1], [0], [0], [1], [0, 0, 1, 1], [], []>} : vector<8x4xf32>, vector<4x32xf32>, vector<8x32xf32> -> vector<8x32xf32>
    %204 = arith.mulf %203, %155 : vector<8x32xf32>
    %205 = arith.mulf %199, %201 : vector<8x4xf32>
    %cst_92 = arith.constant dense<0.000000e+00> : vector<8x32xf32>
    %206 = tpu.matmul %205, %1, %cst_92 {dimension_numbers = #tpu.dot_dimension_numbers<[1], [0], [0], [1], [0, 0, 1, 1], [], []>} : vector<8x4xf32>, vector<4x32xf32>, vector<8x32xf32> -> vector<8x32xf32>
    %207 = arith.mulf %206, %165 : vector<8x32xf32>
    %208 = arith.addf %204, %207 : vector<8x32xf32>
    %cst_93 = arith.constant dense<0.000000e+00> : vector<8x32xf32>
    %209 = tpu.matmul %208, %167, %cst_93 {dimension_numbers = #tpu.dot_dimension_numbers<[1], [0], [0], [1], [0, 0, 1, 1], [], []>} : vector<8x32xf32>, vector<32x32xf32>, vector<8x32xf32> -> vector<8x32xf32>
    %210 = vector.broadcast %169 : vector<1x32xf32> to vector<8x32xf32>
    %211 = arith.addf %209, %210 : vector<8x32xf32>
    %c0_94 = arith.constant 0 : index
    %c0_95 = arith.constant 0 : index
    %c0_96 = arith.constant 0 : index
    %212 = vector.load %arg17[%c0_94, %c0_95, %c0_96] : memref<2x1x32xf32, #tpu.memory_space<vmem>>, vector<1x1x32xf32>
    %213 = vector.shape_cast %212 : vector<1x1x32xf32> to vector<1x32xf32>
    %c0_97 = arith.constant 0 : index
    %c0_98 = arith.constant 0 : index
    %c0_99 = arith.constant 0 : index
    %214 = vector.load %arg18[%c0_97, %c0_98, %c0_99] : memref<2x1x32xf32, #tpu.memory_space<vmem>>, vector<1x1x32xf32>
    %215 = vector.shape_cast %214 : vector<1x1x32xf32> to vector<1x32xf32>
    %216 = arith.addf %112, %190 : vector<8x32xf32>
    %cst_100 = arith.constant dense<0.000000e+00> : vector<8xf32>
    %217 = vector.multi_reduction <add>, %216, %cst_100 [1] : vector<8x32xf32> to vector<8xf32>
    %218 = vector.shape_cast %217 : vector<8xf32> to vector<8x1xf32>
    %cst_101 = arith.constant 3.200000e+01 : f32
    %219 = vector.broadcast %cst_101 : f32 to vector<8x1xf32>
    %220 = arith.divf %218, %219 : vector<8x1xf32>
    %221 = vector.broadcast %220 : vector<8x1xf32> to vector<8x32xf32>
    %222 = arith.subf %216, %221 : vector<8x32xf32>
    %223 = arith.mulf %222, %222 : vector<8x32xf32>
    %cst_102 = arith.constant dense<0.000000e+00> : vector<8xf32>
    %224 = vector.multi_reduction <add>, %223, %cst_102 [1] : vector<8x32xf32> to vector<8xf32>
    %225 = vector.shape_cast %224 : vector<8xf32> to vector<8x1xf32>
    %cst_103 = arith.constant 3.200000e+01 : f32
    %226 = vector.broadcast %cst_103 : f32 to vector<8x1xf32>
    %227 = arith.divf %225, %226 : vector<8x1xf32>
    %cst_104 = arith.constant 9.99999974E-6 : f32
    %228 = vector.broadcast %cst_104 : f32 to vector<8x1xf32>
    %229 = arith.addf %227, %228 : vector<8x1xf32>
    %230 = math.rsqrt %229 : vector<8x1xf32>
    %231 = vector.broadcast %230 : vector<8x1xf32> to vector<8x32xf32>
    %232 = arith.mulf %222, %231 : vector<8x32xf32>
    %233 = vector.broadcast %213 : vector<1x32xf32> to vector<8x32xf32>
    %234 = arith.mulf %232, %233 : vector<8x32xf32>
    %235 = vector.broadcast %215 : vector<1x32xf32> to vector<8x32xf32>
    %236 = arith.addf %234, %235 : vector<8x32xf32>
    %c0_105 = arith.constant 0 : index
    %c0_106 = arith.constant 0 : index
    %c0_107 = arith.constant 0 : index
    %237 = vector.load %arg17[%c0_105, %c0_106, %c0_107] : memref<2x1x32xf32, #tpu.memory_space<vmem>>, vector<1x1x32xf32>
    %238 = vector.shape_cast %237 : vector<1x1x32xf32> to vector<1x32xf32>
    %c0_108 = arith.constant 0 : index
    %c0_109 = arith.constant 0 : index
    %c0_110 = arith.constant 0 : index
    %239 = vector.load %arg18[%c0_108, %c0_109, %c0_110] : memref<2x1x32xf32, #tpu.memory_space<vmem>>, vector<1x1x32xf32>
    %240 = vector.shape_cast %239 : vector<1x1x32xf32> to vector<1x32xf32>
    %241 = arith.addf %137, %211 : vector<8x32xf32>
    %cst_111 = arith.constant dense<0.000000e+00> : vector<8xf32>
    %242 = vector.multi_reduction <add>, %241, %cst_111 [1] : vector<8x32xf32> to vector<8xf32>
    %243 = vector.shape_cast %242 : vector<8xf32> to vector<8x1xf32>
    %cst_112 = arith.constant 3.200000e+01 : f32
    %244 = vector.broadcast %cst_112 : f32 to vector<8x1xf32>
    %245 = arith.divf %243, %244 : vector<8x1xf32>
    %246 = vector.broadcast %245 : vector<8x1xf32> to vector<8x32xf32>
    %247 = arith.subf %241, %246 : vector<8x32xf32>
    %248 = arith.mulf %247, %247 : vector<8x32xf32>
    %cst_113 = arith.constant dense<0.000000e+00> : vector<8xf32>
    %249 = vector.multi_reduction <add>, %248, %cst_113 [1] : vector<8x32xf32> to vector<8xf32>
    %250 = vector.shape_cast %249 : vector<8xf32> to vector<8x1xf32>
    %cst_114 = arith.constant 3.200000e+01 : f32
    %251 = vector.broadcast %cst_114 : f32 to vector<8x1xf32>
    %252 = arith.divf %250, %251 : vector<8x1xf32>
    %cst_115 = arith.constant 9.99999974E-6 : f32
    %253 = vector.broadcast %cst_115 : f32 to vector<8x1xf32>
    %254 = arith.addf %252, %253 : vector<8x1xf32>
    %255 = math.rsqrt %254 : vector<8x1xf32>
    %256 = vector.broadcast %255 : vector<8x1xf32> to vector<8x32xf32>
    %257 = arith.mulf %247, %256 : vector<8x32xf32>
    %258 = vector.broadcast %238 : vector<1x32xf32> to vector<8x32xf32>
    %259 = arith.mulf %257, %258 : vector<8x32xf32>
    %260 = vector.broadcast %240 : vector<1x32xf32> to vector<8x32xf32>
    %261 = arith.addf %259, %260 : vector<8x32xf32>
    %c0_116 = arith.constant 0 : index
    %c0_117 = arith.constant 0 : index
    %c0_118 = arith.constant 0 : index
    %262 = vector.load %arg21[%c0_116, %c0_117, %c0_118] : memref<2x32x64xf32, #tpu.memory_space<vmem>>, vector<1x32x64xf32>
    %263 = vector.shape_cast %262 : vector<1x32x64xf32> to vector<32x64xf32>
    %c0_119 = arith.constant 0 : index
    %c0_120 = arith.constant 0 : index
    %c0_121 = arith.constant 0 : index
    %264 = vector.load %arg22[%c0_119, %c0_120, %c0_121] : memref<2x1x64xf32, #tpu.memory_space<vmem>>, vector<1x1x64xf32>
    %265 = vector.shape_cast %264 : vector<1x1x64xf32> to vector<1x64xf32>
    %c0_122 = arith.constant 0 : index
    %c0_123 = arith.constant 0 : index
    %c0_124 = arith.constant 0 : index
    %266 = vector.load %arg23[%c0_122, %c0_123, %c0_124] : memref<2x64x32xf32, #tpu.memory_space<vmem>>, vector<1x64x32xf32>
    %267 = vector.shape_cast %266 : vector<1x64x32xf32> to vector<64x32xf32>
    %c0_125 = arith.constant 0 : index
    %c0_126 = arith.constant 0 : index
    %c0_127 = arith.constant 0 : index
    %268 = vector.load %arg24[%c0_125, %c0_126, %c0_127] : memref<2x1x32xf32, #tpu.memory_space<vmem>>, vector<1x1x32xf32>
    %269 = vector.shape_cast %268 : vector<1x1x32xf32> to vector<1x32xf32>
    %cst_128 = arith.constant dense<0.000000e+00> : vector<8x64xf32>
    %270 = tpu.matmul %236, %263, %cst_128 {dimension_numbers = #tpu.dot_dimension_numbers<[1], [0], [0], [1], [0, 0, 1, 1], [], []>} : vector<8x32xf32>, vector<32x64xf32>, vector<8x64xf32> -> vector<8x64xf32>
    %271 = vector.broadcast %265 : vector<1x64xf32> to vector<8x64xf32>
    %272 = arith.addf %270, %271 : vector<8x64xf32>
    %cst_129 = arith.constant 0.000000e+00 : f32
    %273 = vector.broadcast %cst_129 : f32 to vector<8x64xf32>
    %274 = arith.maximumf %272, %273 : vector<8x64xf32>
    %cst_130 = arith.constant dense<0.000000e+00> : vector<8x32xf32>
    %275 = tpu.matmul %274, %267, %cst_130 {dimension_numbers = #tpu.dot_dimension_numbers<[1], [0], [0], [1], [0, 0, 1, 1], [], []>} : vector<8x64xf32>, vector<64x32xf32>, vector<8x32xf32> -> vector<8x32xf32>
    %276 = vector.broadcast %269 : vector<1x32xf32> to vector<8x32xf32>
    %277 = arith.addf %275, %276 : vector<8x32xf32>
    %cst_131 = arith.constant dense<0.000000e+00> : vector<8x64xf32>
    %278 = tpu.matmul %261, %263, %cst_131 {dimension_numbers = #tpu.dot_dimension_numbers<[1], [0], [0], [1], [0, 0, 1, 1], [], []>} : vector<8x32xf32>, vector<32x64xf32>, vector<8x64xf32> -> vector<8x64xf32>
    %279 = vector.broadcast %265 : vector<1x64xf32> to vector<8x64xf32>
    %280 = arith.addf %278, %279 : vector<8x64xf32>
    %cst_132 = arith.constant 0.000000e+00 : f32
    %281 = vector.broadcast %cst_132 : f32 to vector<8x64xf32>
    %282 = arith.maximumf %280, %281 : vector<8x64xf32>
    %cst_133 = arith.constant dense<0.000000e+00> : vector<8x32xf32>
    %283 = tpu.matmul %282, %267, %cst_133 {dimension_numbers = #tpu.dot_dimension_numbers<[1], [0], [0], [1], [0, 0, 1, 1], [], []>} : vector<8x64xf32>, vector<64x32xf32>, vector<8x32xf32> -> vector<8x32xf32>
    %284 = vector.broadcast %269 : vector<1x32xf32> to vector<8x32xf32>
    %285 = arith.addf %283, %284 : vector<8x32xf32>
    %c0_134 = arith.constant 0 : index
    %c0_135 = arith.constant 0 : index
    %c0_136 = arith.constant 0 : index
    %286 = vector.load %arg19[%c0_134, %c0_135, %c0_136] : memref<2x1x32xf32, #tpu.memory_space<vmem>>, vector<1x1x32xf32>
    %287 = vector.shape_cast %286 : vector<1x1x32xf32> to vector<1x32xf32>
    %c0_137 = arith.constant 0 : index
    %c0_138 = arith.constant 0 : index
    %c0_139 = arith.constant 0 : index
    %288 = vector.load %arg20[%c0_137, %c0_138, %c0_139] : memref<2x1x32xf32, #tpu.memory_space<vmem>>, vector<1x1x32xf32>
    %289 = vector.shape_cast %288 : vector<1x1x32xf32> to vector<1x32xf32>
    %290 = arith.addf %236, %277 : vector<8x32xf32>
    %cst_140 = arith.constant dense<0.000000e+00> : vector<8xf32>
    %291 = vector.multi_reduction <add>, %290, %cst_140 [1] : vector<8x32xf32> to vector<8xf32>
    %292 = vector.shape_cast %291 : vector<8xf32> to vector<8x1xf32>
    %cst_141 = arith.constant 3.200000e+01 : f32
    %293 = vector.broadcast %cst_141 : f32 to vector<8x1xf32>
    %294 = arith.divf %292, %293 : vector<8x1xf32>
    %295 = vector.broadcast %294 : vector<8x1xf32> to vector<8x32xf32>
    %296 = arith.subf %290, %295 : vector<8x32xf32>
    %297 = arith.mulf %296, %296 : vector<8x32xf32>
    %cst_142 = arith.constant dense<0.000000e+00> : vector<8xf32>
    %298 = vector.multi_reduction <add>, %297, %cst_142 [1] : vector<8x32xf32> to vector<8xf32>
    %299 = vector.shape_cast %298 : vector<8xf32> to vector<8x1xf32>
    %cst_143 = arith.constant 3.200000e+01 : f32
    %300 = vector.broadcast %cst_143 : f32 to vector<8x1xf32>
    %301 = arith.divf %299, %300 : vector<8x1xf32>
    %cst_144 = arith.constant 9.99999974E-6 : f32
    %302 = vector.broadcast %cst_144 : f32 to vector<8x1xf32>
    %303 = arith.addf %301, %302 : vector<8x1xf32>
    %304 = math.rsqrt %303 : vector<8x1xf32>
    %305 = vector.broadcast %304 : vector<8x1xf32> to vector<8x32xf32>
    %306 = arith.mulf %296, %305 : vector<8x32xf32>
    %307 = vector.broadcast %287 : vector<1x32xf32> to vector<8x32xf32>
    %308 = arith.mulf %306, %307 : vector<8x32xf32>
    %309 = vector.broadcast %289 : vector<1x32xf32> to vector<8x32xf32>
    %310 = arith.addf %308, %309 : vector<8x32xf32>
    %c0_145 = arith.constant 0 : index
    %c0_146 = arith.constant 0 : index
    %c0_147 = arith.constant 0 : index
    %311 = vector.load %arg19[%c0_145, %c0_146, %c0_147] : memref<2x1x32xf32, #tpu.memory_space<vmem>>, vector<1x1x32xf32>
    %312 = vector.shape_cast %311 : vector<1x1x32xf32> to vector<1x32xf32>
    %c0_148 = arith.constant 0 : index
    %c0_149 = arith.constant 0 : index
    %c0_150 = arith.constant 0 : index
    %313 = vector.load %arg20[%c0_148, %c0_149, %c0_150] : memref<2x1x32xf32, #tpu.memory_space<vmem>>, vector<1x1x32xf32>
    %314 = vector.shape_cast %313 : vector<1x1x32xf32> to vector<1x32xf32>
    %315 = arith.addf %261, %285 : vector<8x32xf32>
    %cst_151 = arith.constant dense<0.000000e+00> : vector<8xf32>
    %316 = vector.multi_reduction <add>, %315, %cst_151 [1] : vector<8x32xf32> to vector<8xf32>
    %317 = vector.shape_cast %316 : vector<8xf32> to vector<8x1xf32>
    %cst_152 = arith.constant 3.200000e+01 : f32
    %318 = vector.broadcast %cst_152 : f32 to vector<8x1xf32>
    %319 = arith.divf %317, %318 : vector<8x1xf32>
    %320 = vector.broadcast %319 : vector<8x1xf32> to vector<8x32xf32>
    %321 = arith.subf %315, %320 : vector<8x32xf32>
    %322 = arith.mulf %321, %321 : vector<8x32xf32>
    %cst_153 = arith.constant dense<0.000000e+00> : vector<8xf32>
    %323 = vector.multi_reduction <add>, %322, %cst_153 [1] : vector<8x32xf32> to vector<8xf32>
    %324 = vector.shape_cast %323 : vector<8xf32> to vector<8x1xf32>
    %cst_154 = arith.constant 3.200000e+01 : f32
    %325 = vector.broadcast %cst_154 : f32 to vector<8x1xf32>
    %326 = arith.divf %324, %325 : vector<8x1xf32>
    %cst_155 = arith.constant 9.99999974E-6 : f32
    %327 = vector.broadcast %cst_155 : f32 to vector<8x1xf32>
    %328 = arith.addf %326, %327 : vector<8x1xf32>
    %329 = math.rsqrt %328 : vector<8x1xf32>
    %330 = vector.broadcast %329 : vector<8x1xf32> to vector<8x32xf32>
    %331 = arith.mulf %321, %330 : vector<8x32xf32>
    %332 = vector.broadcast %312 : vector<1x32xf32> to vector<8x32xf32>
    %333 = arith.mulf %331, %332 : vector<8x32xf32>
    %334 = vector.broadcast %314 : vector<1x32xf32> to vector<8x32xf32>
    %335 = arith.addf %333, %334 : vector<8x32xf32>
    %c1_156 = arith.constant 1 : index
    %c0_157 = arith.constant 0 : index
    %c0_158 = arith.constant 0 : index
    %336 = vector.load %arg5[%c1_156, %c0_157, %c0_158] : memref<2x32x384xf32, #tpu.memory_space<vmem>>, vector<1x32x384xf32>
    %337 = vector.shape_cast %336 : vector<1x32x384xf32> to vector<32x384xf32>
    %c1_159 = arith.constant 1 : index
    %c0_160 = arith.constant 0 : index
    %c0_161 = arith.constant 0 : index
    %338 = vector.load %arg6[%c1_159, %c0_160, %c0_161] : memref<2x1x384xf32, #tpu.memory_space<vmem>>, vector<1x1x384xf32>
    %339 = vector.shape_cast %338 : vector<1x1x384xf32> to vector<1x384xf32>
    %cst_162 = arith.constant dense<0.000000e+00> : vector<8x384xf32>
    %340 = tpu.matmul %310, %337, %cst_162 {dimension_numbers = #tpu.dot_dimension_numbers<[1], [0], [0], [1], [0, 0, 1, 1], [], []>} : vector<8x32xf32>, vector<32x384xf32>, vector<8x384xf32> -> vector<8x384xf32>
    %341 = vector.broadcast %339 : vector<1x384xf32> to vector<8x384xf32>
    %342 = arith.addf %340, %341 : vector<8x384xf32>
    %343 = vector.extract_strided_slice %342 {offsets = [0, 0], sizes = [8, 32], strides = [1, 1]} : vector<8x384xf32> to vector<8x32xf32>
    %cst_163 = arith.constant 0.353553385 : f32
    %344 = vector.broadcast %cst_163 : f32 to vector<8x32xf32>
    %345 = arith.mulf %343, %344 : vector<8x32xf32>
    %346 = vector.extract_strided_slice %342 {offsets = [0, 128], sizes = [8, 32], strides = [1, 1]} : vector<8x384xf32> to vector<8x32xf32>
    %347 = vector.extract_strided_slice %342 {offsets = [0, 256], sizes = [8, 32], strides = [1, 1]} : vector<8x384xf32> to vector<8x32xf32>
    %cst_164 = arith.constant dense<0.000000e+00> : vector<8x384xf32>
    %348 = tpu.matmul %335, %337, %cst_164 {dimension_numbers = #tpu.dot_dimension_numbers<[1], [0], [0], [1], [0, 0, 1, 1], [], []>} : vector<8x32xf32>, vector<32x384xf32>, vector<8x384xf32> -> vector<8x384xf32>
    %349 = vector.broadcast %339 : vector<1x384xf32> to vector<8x384xf32>
    %350 = arith.addf %348, %349 : vector<8x384xf32>
    %351 = vector.extract_strided_slice %350 {offsets = [0, 0], sizes = [8, 32], strides = [1, 1]} : vector<8x384xf32> to vector<8x32xf32>
    %cst_165 = arith.constant 0.353553385 : f32
    %352 = vector.broadcast %cst_165 : f32 to vector<8x32xf32>
    %353 = arith.mulf %351, %352 : vector<8x32xf32>
    %354 = vector.extract_strided_slice %350 {offsets = [0, 128], sizes = [8, 32], strides = [1, 1]} : vector<8x384xf32> to vector<8x32xf32>
    %355 = vector.extract_strided_slice %350 {offsets = [0, 256], sizes = [8, 32], strides = [1, 1]} : vector<8x384xf32> to vector<8x32xf32>
    %c1_166 = arith.constant 1 : index
    %c0_167 = arith.constant 0 : index
    %c0_168 = arith.constant 0 : index
    %356 = vector.load %arg7[%c1_166, %c0_167, %c0_168] : memref<2x32x32xf32, #tpu.memory_space<vmem>>, vector<1x32x32xf32>
    %357 = vector.shape_cast %356 : vector<1x32x32xf32> to vector<32x32xf32>
    %c1_169 = arith.constant 1 : index
    %c0_170 = arith.constant 0 : index
    %c0_171 = arith.constant 0 : index
    %358 = vector.load %arg8[%c1_169, %c0_170, %c0_171] : memref<2x1x32xf32, #tpu.memory_space<vmem>>, vector<1x1x32xf32>
    %359 = vector.shape_cast %358 : vector<1x1x32xf32> to vector<1x32xf32>
    %360 = arith.mulf %345, %346 : vector<8x32xf32>
    %cst_172 = arith.constant dense<0.000000e+00> : vector<8x4xf32>
    %361 = tpu.matmul %360, %0, %cst_172 {dimension_numbers = #tpu.dot_dimension_numbers<[1], [0], [0], [1], [0, 0, 1, 1], [], []>} : vector<8x32xf32>, vector<32x4xf32>, vector<8x4xf32> -> vector<8x4xf32>
    %362 = arith.mulf %345, %354 : vector<8x32xf32>
    %cst_173 = arith.constant dense<0.000000e+00> : vector<8x4xf32>
    %363 = tpu.matmul %362, %0, %cst_173 {dimension_numbers = #tpu.dot_dimension_numbers<[1], [0], [0], [1], [0, 0, 1, 1], [], []>} : vector<8x32xf32>, vector<32x4xf32>, vector<8x4xf32> -> vector<8x4xf32>
    %364 = arith.maximumf %361, %363 : vector<8x4xf32>
    %365 = arith.subf %361, %364 : vector<8x4xf32>
    %366 = math.exp %365 : vector<8x4xf32>
    %367 = arith.subf %363, %364 : vector<8x4xf32>
    %368 = math.exp %367 : vector<8x4xf32>
    %369 = arith.addf %366, %368 : vector<8x4xf32>
    %370 = tpu.reciprocal %369 {approx = true} : vector<8x4xf32> -> vector<8x4xf32>
    %371 = arith.mulf %366, %370 : vector<8x4xf32>
    %cst_174 = arith.constant dense<0.000000e+00> : vector<8x32xf32>
    %372 = tpu.matmul %371, %1, %cst_174 {dimension_numbers = #tpu.dot_dimension_numbers<[1], [0], [0], [1], [0, 0, 1, 1], [], []>} : vector<8x4xf32>, vector<4x32xf32>, vector<8x32xf32> -> vector<8x32xf32>
    %373 = arith.mulf %372, %347 : vector<8x32xf32>
    %374 = arith.mulf %368, %370 : vector<8x4xf32>
    %cst_175 = arith.constant dense<0.000000e+00> : vector<8x32xf32>
    %375 = tpu.matmul %374, %1, %cst_175 {dimension_numbers = #tpu.dot_dimension_numbers<[1], [0], [0], [1], [0, 0, 1, 1], [], []>} : vector<8x4xf32>, vector<4x32xf32>, vector<8x32xf32> -> vector<8x32xf32>
    %376 = arith.mulf %375, %355 : vector<8x32xf32>
    %377 = arith.addf %373, %376 : vector<8x32xf32>
    %cst_176 = arith.constant dense<0.000000e+00> : vector<8x32xf32>
    %378 = tpu.matmul %377, %357, %cst_176 {dimension_numbers = #tpu.dot_dimension_numbers<[1], [0], [0], [1], [0, 0, 1, 1], [], []>} : vector<8x32xf32>, vector<32x32xf32>, vector<8x32xf32> -> vector<8x32xf32>
    %379 = vector.broadcast %359 : vector<1x32xf32> to vector<8x32xf32>
    %380 = arith.addf %378, %379 : vector<8x32xf32>
    %381 = arith.mulf %353, %346 : vector<8x32xf32>
    %cst_177 = arith.constant dense<0.000000e+00> : vector<8x4xf32>
    %382 = tpu.matmul %381, %0, %cst_177 {dimension_numbers = #tpu.dot_dimension_numbers<[1], [0], [0], [1], [0, 0, 1, 1], [], []>} : vector<8x32xf32>, vector<32x4xf32>, vector<8x4xf32> -> vector<8x4xf32>
    %383 = arith.mulf %353, %354 : vector<8x32xf32>
    %cst_178 = arith.constant dense<0.000000e+00> : vector<8x4xf32>
    %384 = tpu.matmul %383, %0, %cst_178 {dimension_numbers = #tpu.dot_dimension_numbers<[1], [0], [0], [1], [0, 0, 1, 1], [], []>} : vector<8x32xf32>, vector<32x4xf32>, vector<8x4xf32> -> vector<8x4xf32>
    %385 = arith.maximumf %382, %384 : vector<8x4xf32>
    %386 = arith.subf %382, %385 : vector<8x4xf32>
    %387 = math.exp %386 : vector<8x4xf32>
    %388 = arith.subf %384, %385 : vector<8x4xf32>
    %389 = math.exp %388 : vector<8x4xf32>
    %390 = arith.addf %387, %389 : vector<8x4xf32>
    %391 = tpu.reciprocal %390 {approx = true} : vector<8x4xf32> -> vector<8x4xf32>
    %392 = arith.mulf %387, %391 : vector<8x4xf32>
    %cst_179 = arith.constant dense<0.000000e+00> : vector<8x32xf32>
    %393 = tpu.matmul %392, %1, %cst_179 {dimension_numbers = #tpu.dot_dimension_numbers<[1], [0], [0], [1], [0, 0, 1, 1], [], []>} : vector<8x4xf32>, vector<4x32xf32>, vector<8x32xf32> -> vector<8x32xf32>
    %394 = arith.mulf %393, %347 : vector<8x32xf32>
    %395 = arith.mulf %389, %391 : vector<8x4xf32>
    %cst_180 = arith.constant dense<0.000000e+00> : vector<8x32xf32>
    %396 = tpu.matmul %395, %1, %cst_180 {dimension_numbers = #tpu.dot_dimension_numbers<[1], [0], [0], [1], [0, 0, 1, 1], [], []>} : vector<8x4xf32>, vector<4x32xf32>, vector<8x32xf32> -> vector<8x32xf32>
    %397 = arith.mulf %396, %355 : vector<8x32xf32>
    %398 = arith.addf %394, %397 : vector<8x32xf32>
    %cst_181 = arith.constant dense<0.000000e+00> : vector<8x32xf32>
    %399 = tpu.matmul %398, %357, %cst_181 {dimension_numbers = #tpu.dot_dimension_numbers<[1], [0], [0], [1], [0, 0, 1, 1], [], []>} : vector<8x32xf32>, vector<32x32xf32>, vector<8x32xf32> -> vector<8x32xf32>
    %400 = vector.broadcast %359 : vector<1x32xf32> to vector<8x32xf32>
    %401 = arith.addf %399, %400 : vector<8x32xf32>
    %c1_182 = arith.constant 1 : index
    %c0_183 = arith.constant 0 : index
    %c0_184 = arith.constant 0 : index
    %402 = vector.load %arg15[%c1_182, %c0_183, %c0_184] : memref<2x1x32xf32, #tpu.memory_space<vmem>>, vector<1x1x32xf32>
    %403 = vector.shape_cast %402 : vector<1x1x32xf32> to vector<1x32xf32>
    %c1_185 = arith.constant 1 : index
    %c0_186 = arith.constant 0 : index
    %c0_187 = arith.constant 0 : index
    %404 = vector.load %arg16[%c1_185, %c0_186, %c0_187] : memref<2x1x32xf32, #tpu.memory_space<vmem>>, vector<1x1x32xf32>
    %405 = vector.shape_cast %404 : vector<1x1x32xf32> to vector<1x32xf32>
    %406 = arith.addf %310, %380 : vector<8x32xf32>
    %cst_188 = arith.constant dense<0.000000e+00> : vector<8xf32>
    %407 = vector.multi_reduction <add>, %406, %cst_188 [1] : vector<8x32xf32> to vector<8xf32>
    %408 = vector.shape_cast %407 : vector<8xf32> to vector<8x1xf32>
    %cst_189 = arith.constant 3.200000e+01 : f32
    %409 = vector.broadcast %cst_189 : f32 to vector<8x1xf32>
    %410 = arith.divf %408, %409 : vector<8x1xf32>
    %411 = vector.broadcast %410 : vector<8x1xf32> to vector<8x32xf32>
    %412 = arith.subf %406, %411 : vector<8x32xf32>
    %413 = arith.mulf %412, %412 : vector<8x32xf32>
    %cst_190 = arith.constant dense<0.000000e+00> : vector<8xf32>
    %414 = vector.multi_reduction <add>, %413, %cst_190 [1] : vector<8x32xf32> to vector<8xf32>
    %415 = vector.shape_cast %414 : vector<8xf32> to vector<8x1xf32>
    %cst_191 = arith.constant 3.200000e+01 : f32
    %416 = vector.broadcast %cst_191 : f32 to vector<8x1xf32>
    %417 = arith.divf %415, %416 : vector<8x1xf32>
    %cst_192 = arith.constant 9.99999974E-6 : f32
    %418 = vector.broadcast %cst_192 : f32 to vector<8x1xf32>
    %419 = arith.addf %417, %418 : vector<8x1xf32>
    %420 = math.rsqrt %419 : vector<8x1xf32>
    %421 = vector.broadcast %420 : vector<8x1xf32> to vector<8x32xf32>
    %422 = arith.mulf %412, %421 : vector<8x32xf32>
    %423 = vector.broadcast %403 : vector<1x32xf32> to vector<8x32xf32>
    %424 = arith.mulf %422, %423 : vector<8x32xf32>
    %425 = vector.broadcast %405 : vector<1x32xf32> to vector<8x32xf32>
    %426 = arith.addf %424, %425 : vector<8x32xf32>
    %c1_193 = arith.constant 1 : index
    %c0_194 = arith.constant 0 : index
    %c0_195 = arith.constant 0 : index
    %427 = vector.load %arg15[%c1_193, %c0_194, %c0_195] : memref<2x1x32xf32, #tpu.memory_space<vmem>>, vector<1x1x32xf32>
    %428 = vector.shape_cast %427 : vector<1x1x32xf32> to vector<1x32xf32>
    %c1_196 = arith.constant 1 : index
    %c0_197 = arith.constant 0 : index
    %c0_198 = arith.constant 0 : index
    %429 = vector.load %arg16[%c1_196, %c0_197, %c0_198] : memref<2x1x32xf32, #tpu.memory_space<vmem>>, vector<1x1x32xf32>
    %430 = vector.shape_cast %429 : vector<1x1x32xf32> to vector<1x32xf32>
    %431 = arith.addf %335, %401 : vector<8x32xf32>
    %cst_199 = arith.constant dense<0.000000e+00> : vector<8xf32>
    %432 = vector.multi_reduction <add>, %431, %cst_199 [1] : vector<8x32xf32> to vector<8xf32>
    %433 = vector.shape_cast %432 : vector<8xf32> to vector<8x1xf32>
    %cst_200 = arith.constant 3.200000e+01 : f32
    %434 = vector.broadcast %cst_200 : f32 to vector<8x1xf32>
    %435 = arith.divf %433, %434 : vector<8x1xf32>
    %436 = vector.broadcast %435 : vector<8x1xf32> to vector<8x32xf32>
    %437 = arith.subf %431, %436 : vector<8x32xf32>
    %438 = arith.mulf %437, %437 : vector<8x32xf32>
    %cst_201 = arith.constant dense<0.000000e+00> : vector<8xf32>
    %439 = vector.multi_reduction <add>, %438, %cst_201 [1] : vector<8x32xf32> to vector<8xf32>
    %440 = vector.shape_cast %439 : vector<8xf32> to vector<8x1xf32>
    %cst_202 = arith.constant 3.200000e+01 : f32
    %441 = vector.broadcast %cst_202 : f32 to vector<8x1xf32>
    %442 = arith.divf %440, %441 : vector<8x1xf32>
    %cst_203 = arith.constant 9.99999974E-6 : f32
    %443 = vector.broadcast %cst_203 : f32 to vector<8x1xf32>
    %444 = arith.addf %442, %443 : vector<8x1xf32>
    %445 = math.rsqrt %444 : vector<8x1xf32>
    %446 = vector.broadcast %445 : vector<8x1xf32> to vector<8x32xf32>
    %447 = arith.mulf %437, %446 : vector<8x32xf32>
    %448 = vector.broadcast %428 : vector<1x32xf32> to vector<8x32xf32>
    %449 = arith.mulf %447, %448 : vector<8x32xf32>
    %450 = vector.broadcast %430 : vector<1x32xf32> to vector<8x32xf32>
    %451 = arith.addf %449, %450 : vector<8x32xf32>
    %c1_204 = arith.constant 1 : index
    %c0_205 = arith.constant 0 : index
    %c0_206 = arith.constant 0 : index
    %452 = vector.load %arg9[%c1_204, %c0_205, %c0_206] : memref<2x32x32xf32, #tpu.memory_space<vmem>>, vector<1x32x32xf32>
    %453 = vector.shape_cast %452 : vector<1x32x32xf32> to vector<32x32xf32>
    %c1_207 = arith.constant 1 : index
    %c0_208 = arith.constant 0 : index
    %c0_209 = arith.constant 0 : index
    %454 = vector.load %arg10[%c1_207, %c0_208, %c0_209] : memref<2x1x32xf32, #tpu.memory_space<vmem>>, vector<1x1x32xf32>
    %455 = vector.shape_cast %454 : vector<1x1x32xf32> to vector<1x32xf32>
    %c1_210 = arith.constant 1 : index
    %c0_211 = arith.constant 0 : index
    %c0_212 = arith.constant 0 : index
    %456 = vector.load %arg11[%c1_210, %c0_211, %c0_212] : memref<2x32x256xf32, #tpu.memory_space<vmem>>, vector<1x32x256xf32>
    %457 = vector.shape_cast %456 : vector<1x32x256xf32> to vector<32x256xf32>
    %c1_213 = arith.constant 1 : index
    %c0_214 = arith.constant 0 : index
    %c0_215 = arith.constant 0 : index
    %458 = vector.load %arg12[%c1_213, %c0_214, %c0_215] : memref<2x1x256xf32, #tpu.memory_space<vmem>>, vector<1x1x256xf32>
    %459 = vector.shape_cast %458 : vector<1x1x256xf32> to vector<1x256xf32>
    %cst_216 = arith.constant dense<0.000000e+00> : vector<8x32xf32>
    %460 = tpu.matmul %426, %453, %cst_216 {dimension_numbers = #tpu.dot_dimension_numbers<[1], [0], [0], [1], [0, 0, 1, 1], [], []>} : vector<8x32xf32>, vector<32x32xf32>, vector<8x32xf32> -> vector<8x32xf32>
    %461 = vector.broadcast %455 : vector<1x32xf32> to vector<8x32xf32>
    %462 = arith.addf %460, %461 : vector<8x32xf32>
    %cst_217 = arith.constant 0.353553385 : f32
    %463 = vector.broadcast %cst_217 : f32 to vector<8x32xf32>
    %464 = arith.mulf %462, %463 : vector<8x32xf32>
    %cst_218 = arith.constant dense<0.000000e+00> : vector<8x256xf32>
    %465 = tpu.matmul %12, %457, %cst_218 {dimension_numbers = #tpu.dot_dimension_numbers<[1], [0], [0], [1], [0, 0, 1, 1], [], []>} : vector<8x32xf32>, vector<32x256xf32>, vector<8x256xf32> -> vector<8x256xf32>
    %466 = vector.broadcast %459 : vector<1x256xf32> to vector<8x256xf32>
    %467 = arith.addf %465, %466 : vector<8x256xf32>
    %468 = vector.extract_strided_slice %467 {offsets = [0, 0], sizes = [8, 32], strides = [1, 1]} : vector<8x256xf32> to vector<8x32xf32>
    %469 = vector.extract_strided_slice %467 {offsets = [0, 128], sizes = [8, 32], strides = [1, 1]} : vector<8x256xf32> to vector<8x32xf32>
    %cst_219 = arith.constant dense<0.000000e+00> : vector<8x32xf32>
    %470 = tpu.matmul %451, %453, %cst_219 {dimension_numbers = #tpu.dot_dimension_numbers<[1], [0], [0], [1], [0, 0, 1, 1], [], []>} : vector<8x32xf32>, vector<32x32xf32>, vector<8x32xf32> -> vector<8x32xf32>
    %471 = vector.broadcast %455 : vector<1x32xf32> to vector<8x32xf32>
    %472 = arith.addf %470, %471 : vector<8x32xf32>
    %cst_220 = arith.constant 0.353553385 : f32
    %473 = vector.broadcast %cst_220 : f32 to vector<8x32xf32>
    %474 = arith.mulf %472, %473 : vector<8x32xf32>
    %cst_221 = arith.constant dense<0.000000e+00> : vector<8x256xf32>
    %475 = tpu.matmul %21, %457, %cst_221 {dimension_numbers = #tpu.dot_dimension_numbers<[1], [0], [0], [1], [0, 0, 1, 1], [], []>} : vector<8x32xf32>, vector<32x256xf32>, vector<8x256xf32> -> vector<8x256xf32>
    %476 = vector.broadcast %459 : vector<1x256xf32> to vector<8x256xf32>
    %477 = arith.addf %475, %476 : vector<8x256xf32>
    %478 = vector.extract_strided_slice %477 {offsets = [0, 0], sizes = [8, 32], strides = [1, 1]} : vector<8x256xf32> to vector<8x32xf32>
    %479 = vector.extract_strided_slice %477 {offsets = [0, 128], sizes = [8, 32], strides = [1, 1]} : vector<8x256xf32> to vector<8x32xf32>
    %c1_222 = arith.constant 1 : index
    %c0_223 = arith.constant 0 : index
    %c0_224 = arith.constant 0 : index
    %480 = vector.load %arg13[%c1_222, %c0_223, %c0_224] : memref<2x32x32xf32, #tpu.memory_space<vmem>>, vector<1x32x32xf32>
    %481 = vector.shape_cast %480 : vector<1x32x32xf32> to vector<32x32xf32>
    %c1_225 = arith.constant 1 : index
    %c0_226 = arith.constant 0 : index
    %c0_227 = arith.constant 0 : index
    %482 = vector.load %arg14[%c1_225, %c0_226, %c0_227] : memref<2x1x32xf32, #tpu.memory_space<vmem>>, vector<1x1x32xf32>
    %483 = vector.shape_cast %482 : vector<1x1x32xf32> to vector<1x32xf32>
    %484 = arith.mulf %464, %468 : vector<8x32xf32>
    %cst_228 = arith.constant dense<0.000000e+00> : vector<8x4xf32>
    %485 = tpu.matmul %484, %0, %cst_228 {dimension_numbers = #tpu.dot_dimension_numbers<[1], [0], [0], [1], [0, 0, 1, 1], [], []>} : vector<8x32xf32>, vector<32x4xf32>, vector<8x4xf32> -> vector<8x4xf32>
    %486 = arith.mulf %464, %478 : vector<8x32xf32>
    %cst_229 = arith.constant dense<0.000000e+00> : vector<8x4xf32>
    %487 = tpu.matmul %486, %0, %cst_229 {dimension_numbers = #tpu.dot_dimension_numbers<[1], [0], [0], [1], [0, 0, 1, 1], [], []>} : vector<8x32xf32>, vector<32x4xf32>, vector<8x4xf32> -> vector<8x4xf32>
    %488 = arith.maximumf %485, %487 : vector<8x4xf32>
    %489 = arith.subf %485, %488 : vector<8x4xf32>
    %490 = math.exp %489 : vector<8x4xf32>
    %491 = arith.subf %487, %488 : vector<8x4xf32>
    %492 = math.exp %491 : vector<8x4xf32>
    %493 = arith.addf %490, %492 : vector<8x4xf32>
    %494 = tpu.reciprocal %493 {approx = true} : vector<8x4xf32> -> vector<8x4xf32>
    %495 = arith.mulf %490, %494 : vector<8x4xf32>
    %cst_230 = arith.constant dense<0.000000e+00> : vector<8x32xf32>
    %496 = tpu.matmul %495, %1, %cst_230 {dimension_numbers = #tpu.dot_dimension_numbers<[1], [0], [0], [1], [0, 0, 1, 1], [], []>} : vector<8x4xf32>, vector<4x32xf32>, vector<8x32xf32> -> vector<8x32xf32>
    %497 = arith.mulf %496, %469 : vector<8x32xf32>
    %498 = arith.mulf %492, %494 : vector<8x4xf32>
    %cst_231 = arith.constant dense<0.000000e+00> : vector<8x32xf32>
    %499 = tpu.matmul %498, %1, %cst_231 {dimension_numbers = #tpu.dot_dimension_numbers<[1], [0], [0], [1], [0, 0, 1, 1], [], []>} : vector<8x4xf32>, vector<4x32xf32>, vector<8x32xf32> -> vector<8x32xf32>
    %500 = arith.mulf %499, %479 : vector<8x32xf32>
    %501 = arith.addf %497, %500 : vector<8x32xf32>
    %cst_232 = arith.constant dense<0.000000e+00> : vector<8x32xf32>
    %502 = tpu.matmul %501, %481, %cst_232 {dimension_numbers = #tpu.dot_dimension_numbers<[1], [0], [0], [1], [0, 0, 1, 1], [], []>} : vector<8x32xf32>, vector<32x32xf32>, vector<8x32xf32> -> vector<8x32xf32>
    %503 = vector.broadcast %483 : vector<1x32xf32> to vector<8x32xf32>
    %504 = arith.addf %502, %503 : vector<8x32xf32>
    %505 = arith.mulf %474, %468 : vector<8x32xf32>
    %cst_233 = arith.constant dense<0.000000e+00> : vector<8x4xf32>
    %506 = tpu.matmul %505, %0, %cst_233 {dimension_numbers = #tpu.dot_dimension_numbers<[1], [0], [0], [1], [0, 0, 1, 1], [], []>} : vector<8x32xf32>, vector<32x4xf32>, vector<8x4xf32> -> vector<8x4xf32>
    %507 = arith.mulf %474, %478 : vector<8x32xf32>
    %cst_234 = arith.constant dense<0.000000e+00> : vector<8x4xf32>
    %508 = tpu.matmul %507, %0, %cst_234 {dimension_numbers = #tpu.dot_dimension_numbers<[1], [0], [0], [1], [0, 0, 1, 1], [], []>} : vector<8x32xf32>, vector<32x4xf32>, vector<8x4xf32> -> vector<8x4xf32>
    %509 = arith.maximumf %506, %508 : vector<8x4xf32>
    %510 = arith.subf %506, %509 : vector<8x4xf32>
    %511 = math.exp %510 : vector<8x4xf32>
    %512 = arith.subf %508, %509 : vector<8x4xf32>
    %513 = math.exp %512 : vector<8x4xf32>
    %514 = arith.addf %511, %513 : vector<8x4xf32>
    %515 = tpu.reciprocal %514 {approx = true} : vector<8x4xf32> -> vector<8x4xf32>
    %516 = arith.mulf %511, %515 : vector<8x4xf32>
    %cst_235 = arith.constant dense<0.000000e+00> : vector<8x32xf32>
    %517 = tpu.matmul %516, %1, %cst_235 {dimension_numbers = #tpu.dot_dimension_numbers<[1], [0], [0], [1], [0, 0, 1, 1], [], []>} : vector<8x4xf32>, vector<4x32xf32>, vector<8x32xf32> -> vector<8x32xf32>
    %518 = arith.mulf %517, %469 : vector<8x32xf32>
    %519 = arith.mulf %513, %515 : vector<8x4xf32>
    %cst_236 = arith.constant dense<0.000000e+00> : vector<8x32xf32>
    %520 = tpu.matmul %519, %1, %cst_236 {dimension_numbers = #tpu.dot_dimension_numbers<[1], [0], [0], [1], [0, 0, 1, 1], [], []>} : vector<8x4xf32>, vector<4x32xf32>, vector<8x32xf32> -> vector<8x32xf32>
    %521 = arith.mulf %520, %479 : vector<8x32xf32>
    %522 = arith.addf %518, %521 : vector<8x32xf32>
    %cst_237 = arith.constant dense<0.000000e+00> : vector<8x32xf32>
    %523 = tpu.matmul %522, %481, %cst_237 {dimension_numbers = #tpu.dot_dimension_numbers<[1], [0], [0], [1], [0, 0, 1, 1], [], []>} : vector<8x32xf32>, vector<32x32xf32>, vector<8x32xf32> -> vector<8x32xf32>
    %524 = vector.broadcast %483 : vector<1x32xf32> to vector<8x32xf32>
    %525 = arith.addf %523, %524 : vector<8x32xf32>
    %c1_238 = arith.constant 1 : index
    %c0_239 = arith.constant 0 : index
    %c0_240 = arith.constant 0 : index
    %526 = vector.load %arg17[%c1_238, %c0_239, %c0_240] : memref<2x1x32xf32, #tpu.memory_space<vmem>>, vector<1x1x32xf32>
    %527 = vector.shape_cast %526 : vector<1x1x32xf32> to vector<1x32xf32>
    %c1_241 = arith.constant 1 : index
    %c0_242 = arith.constant 0 : index
    %c0_243 = arith.constant 0 : index
    %528 = vector.load %arg18[%c1_241, %c0_242, %c0_243] : memref<2x1x32xf32, #tpu.memory_space<vmem>>, vector<1x1x32xf32>
    %529 = vector.shape_cast %528 : vector<1x1x32xf32> to vector<1x32xf32>
    %530 = arith.addf %426, %504 : vector<8x32xf32>
    %cst_244 = arith.constant dense<0.000000e+00> : vector<8xf32>
    %531 = vector.multi_reduction <add>, %530, %cst_244 [1] : vector<8x32xf32> to vector<8xf32>
    %532 = vector.shape_cast %531 : vector<8xf32> to vector<8x1xf32>
    %cst_245 = arith.constant 3.200000e+01 : f32
    %533 = vector.broadcast %cst_245 : f32 to vector<8x1xf32>
    %534 = arith.divf %532, %533 : vector<8x1xf32>
    %535 = vector.broadcast %534 : vector<8x1xf32> to vector<8x32xf32>
    %536 = arith.subf %530, %535 : vector<8x32xf32>
    %537 = arith.mulf %536, %536 : vector<8x32xf32>
    %cst_246 = arith.constant dense<0.000000e+00> : vector<8xf32>
    %538 = vector.multi_reduction <add>, %537, %cst_246 [1] : vector<8x32xf32> to vector<8xf32>
    %539 = vector.shape_cast %538 : vector<8xf32> to vector<8x1xf32>
    %cst_247 = arith.constant 3.200000e+01 : f32
    %540 = vector.broadcast %cst_247 : f32 to vector<8x1xf32>
    %541 = arith.divf %539, %540 : vector<8x1xf32>
    %cst_248 = arith.constant 9.99999974E-6 : f32
    %542 = vector.broadcast %cst_248 : f32 to vector<8x1xf32>
    %543 = arith.addf %541, %542 : vector<8x1xf32>
    %544 = math.rsqrt %543 : vector<8x1xf32>
    %545 = vector.broadcast %544 : vector<8x1xf32> to vector<8x32xf32>
    %546 = arith.mulf %536, %545 : vector<8x32xf32>
    %547 = vector.broadcast %527 : vector<1x32xf32> to vector<8x32xf32>
    %548 = arith.mulf %546, %547 : vector<8x32xf32>
    %549 = vector.broadcast %529 : vector<1x32xf32> to vector<8x32xf32>
    %550 = arith.addf %548, %549 : vector<8x32xf32>
    %c1_249 = arith.constant 1 : index
    %c0_250 = arith.constant 0 : index
    %c0_251 = arith.constant 0 : index
    %551 = vector.load %arg17[%c1_249, %c0_250, %c0_251] : memref<2x1x32xf32, #tpu.memory_space<vmem>>, vector<1x1x32xf32>
    %552 = vector.shape_cast %551 : vector<1x1x32xf32> to vector<1x32xf32>
    %c1_252 = arith.constant 1 : index
    %c0_253 = arith.constant 0 : index
    %c0_254 = arith.constant 0 : index
    %553 = vector.load %arg18[%c1_252, %c0_253, %c0_254] : memref<2x1x32xf32, #tpu.memory_space<vmem>>, vector<1x1x32xf32>
    %554 = vector.shape_cast %553 : vector<1x1x32xf32> to vector<1x32xf32>
    %555 = arith.addf %451, %525 : vector<8x32xf32>
    %cst_255 = arith.constant dense<0.000000e+00> : vector<8xf32>
    %556 = vector.multi_reduction <add>, %555, %cst_255 [1] : vector<8x32xf32> to vector<8xf32>
    %557 = vector.shape_cast %556 : vector<8xf32> to vector<8x1xf32>
    %cst_256 = arith.constant 3.200000e+01 : f32
    %558 = vector.broadcast %cst_256 : f32 to vector<8x1xf32>
    %559 = arith.divf %557, %558 : vector<8x1xf32>
    %560 = vector.broadcast %559 : vector<8x1xf32> to vector<8x32xf32>
    %561 = arith.subf %555, %560 : vector<8x32xf32>
    %562 = arith.mulf %561, %561 : vector<8x32xf32>
    %cst_257 = arith.constant dense<0.000000e+00> : vector<8xf32>
    %563 = vector.multi_reduction <add>, %562, %cst_257 [1] : vector<8x32xf32> to vector<8xf32>
    %564 = vector.shape_cast %563 : vector<8xf32> to vector<8x1xf32>
    %cst_258 = arith.constant 3.200000e+01 : f32
    %565 = vector.broadcast %cst_258 : f32 to vector<8x1xf32>
    %566 = arith.divf %564, %565 : vector<8x1xf32>
    %cst_259 = arith.constant 9.99999974E-6 : f32
    %567 = vector.broadcast %cst_259 : f32 to vector<8x1xf32>
    %568 = arith.addf %566, %567 : vector<8x1xf32>
    %569 = math.rsqrt %568 : vector<8x1xf32>
    %570 = vector.broadcast %569 : vector<8x1xf32> to vector<8x32xf32>
    %571 = arith.mulf %561, %570 : vector<8x32xf32>
    %572 = vector.broadcast %552 : vector<1x32xf32> to vector<8x32xf32>
    %573 = arith.mulf %571, %572 : vector<8x32xf32>
    %574 = vector.broadcast %554 : vector<1x32xf32> to vector<8x32xf32>
    %575 = arith.addf %573, %574 : vector<8x32xf32>
    %c1_260 = arith.constant 1 : index
    %c0_261 = arith.constant 0 : index
    %c0_262 = arith.constant 0 : index
    %576 = vector.load %arg21[%c1_260, %c0_261, %c0_262] : memref<2x32x64xf32, #tpu.memory_space<vmem>>, vector<1x32x64xf32>
    %577 = vector.shape_cast %576 : vector<1x32x64xf32> to vector<32x64xf32>
    %c1_263 = arith.constant 1 : index
    %c0_264 = arith.constant 0 : index
    %c0_265 = arith.constant 0 : index
    %578 = vector.load %arg22[%c1_263, %c0_264, %c0_265] : memref<2x1x64xf32, #tpu.memory_space<vmem>>, vector<1x1x64xf32>
    %579 = vector.shape_cast %578 : vector<1x1x64xf32> to vector<1x64xf32>
    %c1_266 = arith.constant 1 : index
    %c0_267 = arith.constant 0 : index
    %c0_268 = arith.constant 0 : index
    %580 = vector.load %arg23[%c1_266, %c0_267, %c0_268] : memref<2x64x32xf32, #tpu.memory_space<vmem>>, vector<1x64x32xf32>
    %581 = vector.shape_cast %580 : vector<1x64x32xf32> to vector<64x32xf32>
    %c1_269 = arith.constant 1 : index
    %c0_270 = arith.constant 0 : index
    %c0_271 = arith.constant 0 : index
    %582 = vector.load %arg24[%c1_269, %c0_270, %c0_271] : memref<2x1x32xf32, #tpu.memory_space<vmem>>, vector<1x1x32xf32>
    %583 = vector.shape_cast %582 : vector<1x1x32xf32> to vector<1x32xf32>
    %cst_272 = arith.constant dense<0.000000e+00> : vector<8x64xf32>
    %584 = tpu.matmul %550, %577, %cst_272 {dimension_numbers = #tpu.dot_dimension_numbers<[1], [0], [0], [1], [0, 0, 1, 1], [], []>} : vector<8x32xf32>, vector<32x64xf32>, vector<8x64xf32> -> vector<8x64xf32>
    %585 = vector.broadcast %579 : vector<1x64xf32> to vector<8x64xf32>
    %586 = arith.addf %584, %585 : vector<8x64xf32>
    %cst_273 = arith.constant 0.000000e+00 : f32
    %587 = vector.broadcast %cst_273 : f32 to vector<8x64xf32>
    %588 = arith.maximumf %586, %587 : vector<8x64xf32>
    %cst_274 = arith.constant dense<0.000000e+00> : vector<8x32xf32>
    %589 = tpu.matmul %588, %581, %cst_274 {dimension_numbers = #tpu.dot_dimension_numbers<[1], [0], [0], [1], [0, 0, 1, 1], [], []>} : vector<8x64xf32>, vector<64x32xf32>, vector<8x32xf32> -> vector<8x32xf32>
    %590 = vector.broadcast %583 : vector<1x32xf32> to vector<8x32xf32>
    %591 = arith.addf %589, %590 : vector<8x32xf32>
    %cst_275 = arith.constant dense<0.000000e+00> : vector<8x64xf32>
    %592 = tpu.matmul %575, %577, %cst_275 {dimension_numbers = #tpu.dot_dimension_numbers<[1], [0], [0], [1], [0, 0, 1, 1], [], []>} : vector<8x32xf32>, vector<32x64xf32>, vector<8x64xf32> -> vector<8x64xf32>
    %593 = vector.broadcast %579 : vector<1x64xf32> to vector<8x64xf32>
    %594 = arith.addf %592, %593 : vector<8x64xf32>
    %cst_276 = arith.constant 0.000000e+00 : f32
    %595 = vector.broadcast %cst_276 : f32 to vector<8x64xf32>
    %596 = arith.maximumf %594, %595 : vector<8x64xf32>
    %cst_277 = arith.constant dense<0.000000e+00> : vector<8x32xf32>
    %597 = tpu.matmul %596, %581, %cst_277 {dimension_numbers = #tpu.dot_dimension_numbers<[1], [0], [0], [1], [0, 0, 1, 1], [], []>} : vector<8x64xf32>, vector<64x32xf32>, vector<8x32xf32> -> vector<8x32xf32>
    %598 = vector.broadcast %583 : vector<1x32xf32> to vector<8x32xf32>
    %599 = arith.addf %597, %598 : vector<8x32xf32>
    %c1_278 = arith.constant 1 : index
    %c0_279 = arith.constant 0 : index
    %c0_280 = arith.constant 0 : index
    %600 = vector.load %arg19[%c1_278, %c0_279, %c0_280] : memref<2x1x32xf32, #tpu.memory_space<vmem>>, vector<1x1x32xf32>
    %601 = vector.shape_cast %600 : vector<1x1x32xf32> to vector<1x32xf32>
    %c1_281 = arith.constant 1 : index
    %c0_282 = arith.constant 0 : index
    %c0_283 = arith.constant 0 : index
    %602 = vector.load %arg20[%c1_281, %c0_282, %c0_283] : memref<2x1x32xf32, #tpu.memory_space<vmem>>, vector<1x1x32xf32>
    %603 = vector.shape_cast %602 : vector<1x1x32xf32> to vector<1x32xf32>
    %604 = arith.addf %550, %591 : vector<8x32xf32>
    %cst_284 = arith.constant dense<0.000000e+00> : vector<8xf32>
    %605 = vector.multi_reduction <add>, %604, %cst_284 [1] : vector<8x32xf32> to vector<8xf32>
    %606 = vector.shape_cast %605 : vector<8xf32> to vector<8x1xf32>
    %cst_285 = arith.constant 3.200000e+01 : f32
    %607 = vector.broadcast %cst_285 : f32 to vector<8x1xf32>
    %608 = arith.divf %606, %607 : vector<8x1xf32>
    %609 = vector.broadcast %608 : vector<8x1xf32> to vector<8x32xf32>
    %610 = arith.subf %604, %609 : vector<8x32xf32>
    %611 = arith.mulf %610, %610 : vector<8x32xf32>
    %cst_286 = arith.constant dense<0.000000e+00> : vector<8xf32>
    %612 = vector.multi_reduction <add>, %611, %cst_286 [1] : vector<8x32xf32> to vector<8xf32>
    %613 = vector.shape_cast %612 : vector<8xf32> to vector<8x1xf32>
    %cst_287 = arith.constant 3.200000e+01 : f32
    %614 = vector.broadcast %cst_287 : f32 to vector<8x1xf32>
    %615 = arith.divf %613, %614 : vector<8x1xf32>
    %cst_288 = arith.constant 9.99999974E-6 : f32
    %616 = vector.broadcast %cst_288 : f32 to vector<8x1xf32>
    %617 = arith.addf %615, %616 : vector<8x1xf32>
    %618 = math.rsqrt %617 : vector<8x1xf32>
    %619 = vector.broadcast %618 : vector<8x1xf32> to vector<8x32xf32>
    %620 = arith.mulf %610, %619 : vector<8x32xf32>
    %621 = vector.broadcast %601 : vector<1x32xf32> to vector<8x32xf32>
    %622 = arith.mulf %620, %621 : vector<8x32xf32>
    %623 = vector.broadcast %603 : vector<1x32xf32> to vector<8x32xf32>
    %624 = arith.addf %622, %623 : vector<8x32xf32>
    %c1_289 = arith.constant 1 : index
    %c0_290 = arith.constant 0 : index
    %c0_291 = arith.constant 0 : index
    %625 = vector.load %arg19[%c1_289, %c0_290, %c0_291] : memref<2x1x32xf32, #tpu.memory_space<vmem>>, vector<1x1x32xf32>
    %626 = vector.shape_cast %625 : vector<1x1x32xf32> to vector<1x32xf32>
    %c1_292 = arith.constant 1 : index
    %c0_293 = arith.constant 0 : index
    %c0_294 = arith.constant 0 : index
    %627 = vector.load %arg20[%c1_292, %c0_293, %c0_294] : memref<2x1x32xf32, #tpu.memory_space<vmem>>, vector<1x1x32xf32>
    %628 = vector.shape_cast %627 : vector<1x1x32xf32> to vector<1x32xf32>
    %629 = arith.addf %575, %599 : vector<8x32xf32>
    %cst_295 = arith.constant dense<0.000000e+00> : vector<8xf32>
    %630 = vector.multi_reduction <add>, %629, %cst_295 [1] : vector<8x32xf32> to vector<8xf32>
    %631 = vector.shape_cast %630 : vector<8xf32> to vector<8x1xf32>
    %cst_296 = arith.constant 3.200000e+01 : f32
    %632 = vector.broadcast %cst_296 : f32 to vector<8x1xf32>
    %633 = arith.divf %631, %632 : vector<8x1xf32>
    %634 = vector.broadcast %633 : vector<8x1xf32> to vector<8x32xf32>
    %635 = arith.subf %629, %634 : vector<8x32xf32>
    %636 = arith.mulf %635, %635 : vector<8x32xf32>
    %cst_297 = arith.constant dense<0.000000e+00> : vector<8xf32>
    %637 = vector.multi_reduction <add>, %636, %cst_297 [1] : vector<8x32xf32> to vector<8xf32>
    %638 = vector.shape_cast %637 : vector<8xf32> to vector<8x1xf32>
    %cst_298 = arith.constant 3.200000e+01 : f32
    %639 = vector.broadcast %cst_298 : f32 to vector<8x1xf32>
    %640 = arith.divf %638, %639 : vector<8x1xf32>
    %cst_299 = arith.constant 9.99999974E-6 : f32
    %641 = vector.broadcast %cst_299 : f32 to vector<8x1xf32>
    %642 = arith.addf %640, %641 : vector<8x1xf32>
    %643 = math.rsqrt %642 : vector<8x1xf32>
    %644 = vector.broadcast %643 : vector<8x1xf32> to vector<8x32xf32>
    %645 = arith.mulf %635, %644 : vector<8x32xf32>
    %646 = vector.broadcast %626 : vector<1x32xf32> to vector<8x32xf32>
    %647 = arith.mulf %645, %646 : vector<8x32xf32>
    %648 = vector.broadcast %628 : vector<1x32xf32> to vector<8x32xf32>
    %649 = arith.addf %647, %648 : vector<8x32xf32>
    %cst_300 = arith.constant 0.000000e+00 : f32
    %650 = vector.broadcast %cst_300 : f32 to vector<2x1024xf32>
    %c0_301 = arith.constant 0 : index
    %c0_302 = arith.constant 0 : index
    %651 = vector.load %arg28[%c0_301, %c0_302] : memref<2x1024xf32, #tpu.memory_space<vmem>>, vector<2x1024xf32>
    tpu.vector_store %arg28[%c0_301, %c0_302], %650 {strides = array<i32>} : memref<2x1024xf32, #tpu.memory_space<vmem>>, vector<2x1024xf32>,
    %652 = vector.extract_strided_slice %624 {offsets = [0, 0], sizes = [1, 32], strides = [1, 1]} : vector<8x32xf32> to vector<1x32xf32>
    %c0_303 = arith.constant 0 : index
    %c0_304 = arith.constant 0 : index
    %653 = vector.load %arg28[%c0_303, %c0_304] : memref<2x1024xf32, #tpu.memory_space<vmem>>, vector<1x32xf32>
    tpu.vector_store %arg28[%c0_303, %c0_304], %652 {strides = array<i32>} : memref<2x1024xf32, #tpu.memory_space<vmem>>, vector<1x32xf32>,
    %654 = vector.extract_strided_slice %624 {offsets = [1, 0], sizes = [1, 32], strides = [1, 1]} : vector<8x32xf32> to vector<1x32xf32>
    %c0_305 = arith.constant 0 : index
    %c128 = arith.constant 128 : index
    %655 = vector.load %arg28[%c0_305, %c128] : memref<2x1024xf32, #tpu.memory_space<vmem>>, vector<1x32xf32>
    tpu.vector_store %arg28[%c0_305, %c128], %654 {strides = array<i32>} : memref<2x1024xf32, #tpu.memory_space<vmem>>, vector<1x32xf32>,
    %656 = vector.extract_strided_slice %624 {offsets = [2, 0], sizes = [1, 32], strides = [1, 1]} : vector<8x32xf32> to vector<1x32xf32>
    %c0_306 = arith.constant 0 : index
    %c256 = arith.constant 256 : index
    %657 = vector.load %arg28[%c0_306, %c256] : memref<2x1024xf32, #tpu.memory_space<vmem>>, vector<1x32xf32>
    tpu.vector_store %arg28[%c0_306, %c256], %656 {strides = array<i32>} : memref<2x1024xf32, #tpu.memory_space<vmem>>, vector<1x32xf32>,
    %658 = vector.extract_strided_slice %624 {offsets = [3, 0], sizes = [1, 32], strides = [1, 1]} : vector<8x32xf32> to vector<1x32xf32>
    %c0_307 = arith.constant 0 : index
    %c384 = arith.constant 384 : index
    %659 = vector.load %arg28[%c0_307, %c384] : memref<2x1024xf32, #tpu.memory_space<vmem>>, vector<1x32xf32>
    tpu.vector_store %arg28[%c0_307, %c384], %658 {strides = array<i32>} : memref<2x1024xf32, #tpu.memory_space<vmem>>, vector<1x32xf32>,
    %660 = vector.extract_strided_slice %624 {offsets = [4, 0], sizes = [1, 32], strides = [1, 1]} : vector<8x32xf32> to vector<1x32xf32>
    %c0_308 = arith.constant 0 : index
    %c512 = arith.constant 512 : index
    %661 = vector.load %arg28[%c0_308, %c512] : memref<2x1024xf32, #tpu.memory_space<vmem>>, vector<1x32xf32>
    tpu.vector_store %arg28[%c0_308, %c512], %660 {strides = array<i32>} : memref<2x1024xf32, #tpu.memory_space<vmem>>, vector<1x32xf32>,
    %662 = vector.extract_strided_slice %624 {offsets = [5, 0], sizes = [1, 32], strides = [1, 1]} : vector<8x32xf32> to vector<1x32xf32>
    %c0_309 = arith.constant 0 : index
    %c640 = arith.constant 640 : index
    %663 = vector.load %arg28[%c0_309, %c640] : memref<2x1024xf32, #tpu.memory_space<vmem>>, vector<1x32xf32>
    tpu.vector_store %arg28[%c0_309, %c640], %662 {strides = array<i32>} : memref<2x1024xf32, #tpu.memory_space<vmem>>, vector<1x32xf32>,
    %664 = vector.extract_strided_slice %624 {offsets = [6, 0], sizes = [1, 32], strides = [1, 1]} : vector<8x32xf32> to vector<1x32xf32>
    %c0_310 = arith.constant 0 : index
    %c768 = arith.constant 768 : index
    %665 = vector.load %arg28[%c0_310, %c768] : memref<2x1024xf32, #tpu.memory_space<vmem>>, vector<1x32xf32>
    tpu.vector_store %arg28[%c0_310, %c768], %664 {strides = array<i32>} : memref<2x1024xf32, #tpu.memory_space<vmem>>, vector<1x32xf32>,
    %666 = vector.extract_strided_slice %624 {offsets = [7, 0], sizes = [1, 32], strides = [1, 1]} : vector<8x32xf32> to vector<1x32xf32>
    %c0_311 = arith.constant 0 : index
    %c896 = arith.constant 896 : index
    %667 = vector.load %arg28[%c0_311, %c896] : memref<2x1024xf32, #tpu.memory_space<vmem>>, vector<1x32xf32>
    tpu.vector_store %arg28[%c0_311, %c896], %666 {strides = array<i32>} : memref<2x1024xf32, #tpu.memory_space<vmem>>, vector<1x32xf32>,
    %668 = vector.extract_strided_slice %649 {offsets = [0, 0], sizes = [1, 32], strides = [1, 1]} : vector<8x32xf32> to vector<1x32xf32>
    %c1_312 = arith.constant 1 : index
    %c0_313 = arith.constant 0 : index
    %669 = vector.load %arg28[%c1_312, %c0_313] : memref<2x1024xf32, #tpu.memory_space<vmem>>, vector<1x32xf32>
    tpu.vector_store %arg28[%c1_312, %c0_313], %668 {strides = array<i32>} : memref<2x1024xf32, #tpu.memory_space<vmem>>, vector<1x32xf32>,
    %670 = vector.extract_strided_slice %649 {offsets = [1, 0], sizes = [1, 32], strides = [1, 1]} : vector<8x32xf32> to vector<1x32xf32>
    %c1_314 = arith.constant 1 : index
    %c128_315 = arith.constant 128 : index
    %671 = vector.load %arg28[%c1_314, %c128_315] : memref<2x1024xf32, #tpu.memory_space<vmem>>, vector<1x32xf32>
    tpu.vector_store %arg28[%c1_314, %c128_315], %670 {strides = array<i32>} : memref<2x1024xf32, #tpu.memory_space<vmem>>, vector<1x32xf32>,
    %672 = vector.extract_strided_slice %649 {offsets = [2, 0], sizes = [1, 32], strides = [1, 1]} : vector<8x32xf32> to vector<1x32xf32>
    %c1_316 = arith.constant 1 : index
    %c256_317 = arith.constant 256 : index
    %673 = vector.load %arg28[%c1_316, %c256_317] : memref<2x1024xf32, #tpu.memory_space<vmem>>, vector<1x32xf32>
    tpu.vector_store %arg28[%c1_316, %c256_317], %672 {strides = array<i32>} : memref<2x1024xf32, #tpu.memory_space<vmem>>, vector<1x32xf32>,
    %674 = vector.extract_strided_slice %649 {offsets = [3, 0], sizes = [1, 32], strides = [1, 1]} : vector<8x32xf32> to vector<1x32xf32>
    %c1_318 = arith.constant 1 : index
    %c384_319 = arith.constant 384 : index
    %675 = vector.load %arg28[%c1_318, %c384_319] : memref<2x1024xf32, #tpu.memory_space<vmem>>, vector<1x32xf32>
    tpu.vector_store %arg28[%c1_318, %c384_319], %674 {strides = array<i32>} : memref<2x1024xf32, #tpu.memory_space<vmem>>, vector<1x32xf32>,
    %676 = vector.extract_strided_slice %649 {offsets = [4, 0], sizes = [1, 32], strides = [1, 1]} : vector<8x32xf32> to vector<1x32xf32>
    %c1_320 = arith.constant 1 : index
    %c512_321 = arith.constant 512 : index
    %677 = vector.load %arg28[%c1_320, %c512_321] : memref<2x1024xf32, #tpu.memory_space<vmem>>, vector<1x32xf32>
    tpu.vector_store %arg28[%c1_320, %c512_321], %676 {strides = array<i32>} : memref<2x1024xf32, #tpu.memory_space<vmem>>, vector<1x32xf32>,
    %678 = vector.extract_strided_slice %649 {offsets = [5, 0], sizes = [1, 32], strides = [1, 1]} : vector<8x32xf32> to vector<1x32xf32>
    %c1_322 = arith.constant 1 : index
    %c640_323 = arith.constant 640 : index
    %679 = vector.load %arg28[%c1_322, %c640_323] : memref<2x1024xf32, #tpu.memory_space<vmem>>, vector<1x32xf32>
    tpu.vector_store %arg28[%c1_322, %c640_323], %678 {strides = array<i32>} : memref<2x1024xf32, #tpu.memory_space<vmem>>, vector<1x32xf32>,
    %680 = vector.extract_strided_slice %649 {offsets = [6, 0], sizes = [1, 32], strides = [1, 1]} : vector<8x32xf32> to vector<1x32xf32>
    %c1_324 = arith.constant 1 : index
    %c768_325 = arith.constant 768 : index
    %681 = vector.load %arg28[%c1_324, %c768_325] : memref<2x1024xf32, #tpu.memory_space<vmem>>, vector<1x32xf32>
    tpu.vector_store %arg28[%c1_324, %c768_325], %680 {strides = array<i32>} : memref<2x1024xf32, #tpu.memory_space<vmem>>, vector<1x32xf32>,
    %682 = vector.extract_strided_slice %649 {offsets = [7, 0], sizes = [1, 32], strides = [1, 1]} : vector<8x32xf32> to vector<1x32xf32>
    %c1_326 = arith.constant 1 : index
    %c896_327 = arith.constant 896 : index
    %683 = vector.load %arg28[%c1_326, %c896_327] : memref<2x1024xf32, #tpu.memory_space<vmem>>, vector<1x32xf32>
    tpu.vector_store %arg28[%c1_326, %c896_327], %682 {strides = array<i32>} : memref<2x1024xf32, #tpu.memory_space<vmem>>, vector<1x32xf32>,
    %c0_328 = arith.constant 0 : index
    %c0_329 = arith.constant 0 : index
    %684 = vector.load %arg28[%c0_328, %c0_329] : memref<2x1024xf32, #tpu.memory_space<vmem>>, vector<2x1024xf32>
    %c0_330 = arith.constant 0 : index
    %c0_331 = arith.constant 0 : index
    %685 = vector.load %arg25[%c0_330, %c0_331] : memref<1024x64xf32, #tpu.memory_space<vmem>>, vector<1024x64xf32>
    %cst_332 = arith.constant dense<0.000000e+00> : vector<2x64xf32>
    %686 = tpu.matmul %684, %685, %cst_332 {dimension_numbers = #tpu.dot_dimension_numbers<[1], [0], [0], [1], [0, 0, 1, 1], [], []>} : vector<2x1024xf32>, vector<1024x64xf32>, vector<2x64xf32> -> vector<2x64xf32>
    %c0_333 = arith.constant 0 : index
    %c0_334 = arith.constant 0 : index
    %687 = vector.load %arg26[%c0_333, %c0_334] : memref<1x64xf32, #tpu.memory_space<vmem>>, vector<1x64xf32>
    %688 = vector.broadcast %687 : vector<1x64xf32> to vector<2x64xf32>
    %689 = arith.addf %686, %688 : vector<2x64xf32>
    %c0_335 = arith.constant 0 : index
    %c0_336 = arith.constant 0 : index
    %690 = vector.load %arg27[%c0_335, %c0_336] : memref<2x64xf32, #tpu.memory_space<vmem>>, vector<2x64xf32>
    tpu.vector_store %arg27[%c0_335, %c0_336], %689 {strides = array<i32>} : memref<2x64xf32, #tpu.memory_space<vmem>>, vector<2x64xf32>,
    return
  }
}

</mosaic_0001>

<bundles_post_ra>
// kernel: gpt_transformer_forward.1
= control target key start
LH: loop header
LB: loop body
LE: loop exit
PB: predicated region body
PF: predicated region fallthrough
CT: control target
= control target key end

     0   :  { %s9454_s0 = inlined_call_operand.vmem [shape: s32[16,1], index: 0, kind: input, shape index: {}]   ;;  %s9455_s1 = inlined_call_operand.vmem [shape: f32[64,32], index: 1, kind: input, shape index: {}]   ;;  %s9456_s2 = inlined_call_operand.vmem [shape: f32[2,32], index: 2, kind: input, shape index: {}]   ;;  %s9457_s3 = inlined_call_operand.vmem [shape: f32[32,4], index: 3, kind: input, shape index: {}]   ;;  %s9458_s4 = inlined_call_operand.vmem [shape: f32[4,32], index: 4, kind: input, shape index: {}]   ;;  %s9459_s5 = inlined_call_operand.vmem [shape: f32[2,32,384], index: 5, kind: input, shape index: {}]   ;;  %s9460_s6 = inlined_call_operand.vmem [shape: f32[2,1,384], index: 6, kind: input, shape index: {}]   ;;  %s9461_s7 = inlined_call_operand.vmem [shape: f32[2,32,32], index: 7, kind: input, shape index: {}]   ;;  %s9462_s8 = inlined_call_operand.vmem [shape: f32[2,1,32], index: 8, kind: input, shape index: {}]   ;;  %s9463_s9 = inlined_call_operand.vmem [shape: f32[2,32,32], index: 9, kind: input, shape index: {}]   ;;  %s9464_s10 = inlined_call_operand.vmem [shape: f32[2,1,32], index: 10, kind: input, shape index: {}]   ;;  %s9465_s11 = inlined_call_operand.vmem [shape: f32[2,32,256], index: 11, kind: input, shape index: {}]   ;;  %s9466_s12 = inlined_call_operand.vmem [shape: f32[2,1,256], index: 12, kind: input, shape index: {}]   ;;  %s9467_s13 = inlined_call_operand.vmem [shape: f32[2,32,32], index: 13, kind: input, shape index: {}]   ;;  %s9468_s14 = inlined_call_operand.vmem [shape: f32[2,1,32], index: 14, kind: input, shape index: {}]   ;;  %s9469_s15 = inlined_call_operand.vmem [shape: f32[2,1,32], index: 15, kind: input, shape index: {}]   ;;  %s9470_s16 = inlined_call_operand.vmem [shape: f32[2,1,32], index: 16, kind: input, shape index: {}]   ;;  %s9471_s17 = inlined_call_operand.vmem [shape: f32[2,1,32], index: 17, kind: input, shape index: {}]   ;;  %s9472_s18 = inlined_call_operand.vmem [shape: f32[2,1,32], index: 18, kind: input, shape index: {}]   ;;  %s9473_s19 = inlined_call_operand.vmem [shape: f32[2,1,32], index: 19, kind: input, shape index: {}]   ;;  %s9474_s20 = inlined_call_operand.vmem [shape: f32[2,1,32], index: 20, kind: input, shape index: {}]   ;;  %s9475_s21 = inlined_call_operand.vmem [shape: f32[2,32,64], index: 21, kind: input, shape index: {}]   ;;  %s9476_s22 = inlined_call_operand.vmem [shape: f32[2,1,64], index: 22, kind: input, shape index: {}]   ;;  %s9477_s23 = inlined_call_operand.vmem [shape: f32[2,64,32], index: 23, kind: input, shape index: {}]   ;;  %s9478_s24 = inlined_call_operand.vmem [shape: f32[2,1,32], index: 24, kind: input, shape index: {}]   ;;  %s9479_s25 = inlined_call_operand.vmem [shape: f32[1024,64], index: 25, kind: input, shape index: {}]   ;;  %s9480_s26 = inlined_call_operand.vmem [shape: f32[1,64], index: 26, kind: input, shape index: {}]   ;;  %s9481_s27 = inlined_call_operand.hbm [shape: f32[2,64], index: 27, kind: output, shape index: {}]  }
   0x1   :  { %9497 = sst [smem:[#allocation6_spill]] %s9454_s0 }
   0x2   :  { %9498 = sst [smem:[#allocation7_spill]] %s9455_s1 }
   0x3   :  { %9499 = sst [smem:[#allocation8_spill]] %s9456_s2 }
   0x4   :  { %9500 = sst [smem:[#allocation9_spill]] %s9457_s3 }
   0x5   :  { %9501 = sst [smem:[#allocation10_spill]] %s9458_s4 }
   0x6   :  { %9502 = sst [smem:[#allocation11_spill]] %s9459_s5 }
   0x7   :  { %9503 = sst [smem:[#allocation12_spill]] %s9460_s6 }
   0x8   :  { %9504 = sst [smem:[#allocation13_spill]] %s9461_s7 }
   0x9   :  { %9505 = sst [smem:[#allocation14_spill]] %s9462_s8 }
   0xa   :  { %9506 = sst [smem:[#allocation15_spill]] %s9463_s9 }
   0xb   :  { %9507 = sst [smem:[#allocation16_spill]] %s9464_s10 }
   0xc   :  { %9508 = sst [smem:[#allocation17_spill]] %s9465_s11 }
   0xd   :  { %9509 = sst [smem:[#allocation18_spill]] %s9474_s20 }
   0xe   :  { %9510 = sst [smem:[#allocation19_spill]] %s9479_s25 }
   0xf   :  { %9511 = sst [smem:[#allocation20_spill]] %s9480_s26 }
  0x10   :  { %9512 = sst [smem:[#allocation21_spill]] %s9481_s27 }
  0x11   :  { %s9513_s8 = sld [smem:[#allocation6_spill]]  ;;  %s9514_s20 = sld [smem:[#allocation7_spill]]  ;;  %v7908_v2 = vmov 0   ;;  %v7909_v3 = vmov 0.0|0.0   ;;  %v7910_v7 = vmov 0.0  }
  0x12   :  { %7806 = vset.pattern.permute.xlu0 %v7908_v2  ;;  %7320 = vmatprep.subr.bf16.mxu0 %v7909_v3  ;;  %5588 = vst [vmem:[#allocation2] sm:$0xff] %v7910_v7  ;;  %5589 = vst [vmem:[#allocation2 + $0x8] sm:$0xff] %v7910_v7 }
  0x13   :  { %7332 = vmatprep.subr.bf16.mxu1 %v7909_v3 }
  0x17   :  { %v102_v0 = vld [vmem:[%s9513_s8] sm:$0xff]  ;;  %v93_v4 = vld [vmem:[%s9514_s20 + $0x8] sm:$0xff]  ;;  %v94_v5 = vld [vmem:[%s9514_s20 + $0x10] sm:$0xff] }
  0x18   :  { %v92_v1 = vld [vmem:[%s9514_s20] sm:$0xff]  ;;  %v95_v6 = vld [vmem:[%s9514_s20 + $0x18] sm:$0xff]  ;;  %104 = vperm.xlu0 %7806, %v102_v0   ;;  %v188_v9 = vld [vmem:[%s9513_s8 + $0x8] sm:$0xff] }
  0x19   :  { %v7321_v8 = vpack.c.bf16 %v93_v4, %v92_v1 }
  0x1a   :  { %32 = vsyncpa [#allocation4], 0  ;;  %v7324_v10 = vpack.c.bf16 %v95_v6, %v94_v5  ;;  %v96_v11 = vld [vmem:[%s9514_s20 + $0x20] sm:$0xff]  ;;  %v97_v12 = vld [vmem:[%s9514_s20 + $0x28] sm:$0xff]  ;;  %vm7911_vm0 = vmmov 0   ;;  %s9515_s10 = sld [smem:[#allocation11_spill]]  ;;  %v100_v20 = vlaneseq }
  0x1b   :  { %7322 = vmatpush3.bf16.msra.mxu0 %v7321_v8  ;;  %7334 = vmatpush3.bf16.msra.mxu1 %v7321_v8  ;;  %v7327_v13 = vpack.c.bf16 %v97_v12, %v96_v11  ;;  %v98_v14 = vld [vmem:[%s9514_s20 + $0x30] sm:$0xff]  ;;  %v99_v15 = vld [vmem:[%s9514_s20 + $0x38] sm:$0xff]  ;;  %vm114_vm1 = vcmask 523264   ;;  %s9516_s8 = sld [smem:[#allocation8_spill]]  ;;  %vm302_vm4 = vcmask 261120   ;;  %s9517_s0 = sld [smem:[#allocation9_spill]] }
  0x1c   :  { %7323 = vmatprep.subr.bf16.mxu0 %v7909_v3  ;;  %7335 = vmatprep.subr.bf16.mxu1 %v7909_v3  ;;  %v7330_v18 = vpack.c.bf16 %v99_v15, %v98_v14  ;;  %v101_v21 = vand.u32 127, %v100_v20  ;;  %v8198_v55 = vshrl.u32 %v100_v20, 7  ;;  %s9518_s4 = sld [smem:[#allocation12_spill]]  ;;  %s9519_s9 = sld [smem:[#allocation10_spill]]  ;;  %vm760_vm5 = vcmask 1043456  }
  0x1d   :  { %190 = vperm.xlu0 %7806, %v188_v9   ;;  %6746 = vmatprep.mubr.msk.f32.mxu0 %vm7911_vm0, %v7910_v7  ;;  %vm756_vm6 = vcmask 31744   ;;  %s9522_s28 = sld [smem:[#allocation17_spill]]  ;;  %s9523_s11 = sld [smem:[#allocation15_spill]]  ;;  %vm5590_vm7 = vcmask 253952   ;;  %vm6134_vm8 = vcmask 517120  }
  0x1e   :  { %6765 = vmatprep.mubr.msk.f32.mxu1 %vm7911_vm0, %v7910_v7  ;;  %v8201_v56 = vsub.s32 0, %v8198_v55  ;;  %v8209_v58 = vsub.s32 1, %v8198_v55  ;;  %s9524_s6 = sld [smem:[#allocation16_spill]]  ;;  %s9525_s29 = sld [smem:[#allocation18_spill]] }
  0x1f   :  { %7325 = vmatpush3.bf16.msra.mxu0 %v7324_v10  ;;  %7337 = vmatpush3.bf16.msra.mxu1 %v7324_v10  ;;  %s9526_s30 = sld [smem:[#allocation19_spill]] }
  0x20   :  { %7326 = vmatprep.subr.bf16.mxu0 %v7909_v3  ;;  %7338 = vmatprep.subr.bf16.mxu1 %v7909_v3  ;;  %v274_v16 = vld [vmem:[%s9515_s10 + $0x8] sm:$0xff]  ;;  %v277_v17 = vld [vmem:[%s9515_s10 + $0x20] sm:$0xff]  ;;  %v276_v23 = vld [vmem:[%s9515_s10 + $0x18] sm:$0xff] }
  0x21   :  { %v7344_v19 = vpack.c.bf16 %v277_v17, %v274_v16  ;;  %v273_v22 = vld [vmem:[%s9515_s10] sm:$0xff]  ;;  %v280_v24 = vld [vmem:[%s9515_s10 + $0x38] sm:$0xff]  ;;  %v283_v25 = vld [vmem:[%s9515_s10 + $0x50] sm:$0xff] }
  0x22   :  { %v7346_v27 = vpack.c.bf16 %v276_v23, %v273_v22  ;;  %v275_v28 = vld [vmem:[%s9515_s10 + $0x10] sm:$0xff]  ;;  %v278_v29 = vld [vmem:[%s9515_s10 + $0x28] sm:$0xff]  ;;  %v7348_v30 = vpack.c.bf16 %v283_v25, %v280_v24  ;;  %v281_v37 = vld [vmem:[%s9515_s10 + $0x40] sm:$0xff] }
  0x23   :  { %7328 = vmatpush3.bf16.msra.mxu0 %v7327_v13  ;;  %7340 = vmatpush3.bf16.msra.mxu1 %v7327_v13  ;;  %v279_v31 = vld [vmem:[%s9515_s10 + $0x30] sm:$0xff]  ;;  %v282_v32 = vld [vmem:[%s9515_s10 + $0x48] sm:$0xff]  ;;  %v7353_v35 = vpack.c.bf16 %v278_v29, %v275_v28  ;;  %v284_v38 = vld [vmem:[%s9515_s10 + $0x58] sm:$0xff] }
  0x24   :  { %7329 = vmatprep.subr.bf16.mxu0 %v7909_v3  ;;  %7341 = vmatprep.subr.bf16.mxu1 %v7909_v3  ;;  %v7350_v36 = vpack.c.bf16 %v282_v32, %v279_v31  ;;  %v7356_v40 = vpack.c.bf16 %v284_v38, %v281_v37  ;;  %v6151_v41 = vld [vmem:[%s9516_s8] ss:$0 sm:$0xff]  ;;  %v6154_v47 = vld [vmem:[%s9516_s8 + $0x1] ss:$0 sm:$0xff]  ;;  %v88_v50 = vld [vmem:[%s9517_s0 + $0x8] sm:$0xff]  ;;  %s9521_s8 = sld [smem:[#allocation14_spill]] }
  0x25   :  { %v87_v49 = vld [vmem:[%s9517_s0] sm:$0xff]  ;;  %v89_v52 = vld [vmem:[%s9517_s0 + $0x10] sm:$0xff]  ;;  %v90_v53 = vld [vmem:[%s9517_s0 + $0x18] sm:$0xff]  ;;  %s9520_s0 = sld [smem:[#allocation13_spill]] }
  0x26   :  { %v8179_v51 = vpack.c.bf16 %v88_v50, %v87_v49  ;;  %v8191_v54 = vpack.c.bf16 %v90_v53, %v89_v52  ;;  %v8206_v57 = vld [vmem:[%s9518_s4] sm:$0x7] }
  0x27   :  { %7331 = vmatpush3.bf16.msra.mxu0 %v7330_v18  ;;  %7343 = vmatpush3.bf16.msra.mxu1 %v7330_v18  ;;  %v290_v59 = vrot.slane %v8206_v57, %v8201_v56  ;;  %v294_v60 = vrot.slane %v8206_v57, %v8209_v58  ;;  %v8237_v17 = vld [vmem:[%s9519_s9] sm:$0xf] }
  0x28   :  { %7345 = vmatprep.subr.bf16.mxu0 %v7344_v19  ;;  %7352 = vmatprep.subr.bf16.mxu1 %v7909_v3 }
  0x2b   :  { %v595_v38 = vld [vmem:[%s9520_s0 + $0x10] sm:$0xff] }
  0x97   :  { %v105_v26 = vpop.permute.xlu0 %104 }
  0x98   :  { %vm106_vm2 = vcmp.eq.s32.totalorder %v105_v26, %v101_v21 }
  0x99   :  { %v6150_v33 = vsel %vm106_vm2, 1.0, %v7910_v7 }
  0x9a   :  { %6747 = vmatmul.mubr.msk.f32.vlgmr.msra.gmra.mrb[0].mxu0 %vm114_vm1, %v6150_v33 }
  0x9b   :  { %7347 = vmatpush1.bf16.msra.mxu0 %v7346_v27  ;;  %370 = vmatprep.mubr.f32.mxu0 %v7910_v7 }
  0x9c   :  { %v191_v34 = vpop.permute.xlu0 %190  ;;  %7349 = vmatprep.subr.bf16.mxu0 %v7348_v30 }
  0x9d   :  { %vm192_vm3 = vcmp.eq.s32.totalorder %v191_v34, %v101_v21 }
  0x9e   :  { %v6153_v39 = vsel %vm192_vm3, 1.0, %v7910_v7 }
  0x9f   :  { %6766 = vmatmul.mubr.msk.f32.vlgmr.msra.gmra.mrb[0].mxu1 %vm114_vm1, %v6153_v39  ;;  %7351 = vmatpush1.bf16.msra.mxu0 %v7350_v36  ;;  %v596_v39 = vld [vmem:[%s9520_s0 + $0x18] sm:$0xff] }
  0xa0   :  { %7354 = vmatpush3.bf16.msra.mxu1 %v7353_v35  ;;  %6776 = vmatprep.mubr.msk.f32.mxu1 %vm7911_vm0, %v7910_v7 }
  0xa1   :  { %7355 = vmatprep.subr.bf16.mxu1 %v7909_v3  ;;  %7359 = vmatprep.subr.bf16.mxu0 %v7344_v19 }
  0xa4   :  { %7357 = vmatpush3.bf16.msra.mxu1 %v7356_v40 }
  0xa5   :  { %7366 = vmatprep.subr.bf16.mxu1 %v7909_v3 }
 0x16d   :  { %v184_v42 = vpop.f32.mrb[0].mxu0 }
 0x16e   :  { %v8148_v43 = vadd.f32 %v6151_v41, %v184_v42  ;;  %v6748_v44 = vpop.f32.mrb[1].mxu0  ;;  %v297_v41 = vsub.s32 2, %v8198_v55 }
 0x170   :  { %6156 = vmatmul.mubr.msk.f32.vlgmr.msra.gmra.mrb[2].mxu0 %vm302_vm4, %v8148_v43  ;;  %6777 = vmatmul.mubr.msk.f32.vlgmr.msra.gmra.mrb[2].mxu1 %vm302_vm4, %v8148_v43  ;;  %v298_v42 = vrot.slane %v8206_v57, %v297_v41  ;;  %v8295_v57 = vld [vmem:[%s9521_s8] ss:$0 sm:$0xff] }
 0x171   :  { %7361 = vmatpush1.bf16.msra.mxu0 %v7346_v27  ;;  %7368 = vmatpush3.bf16.msra.mxu1 %v7353_v35  ;;  %v593_v35 = vld [vmem:[%s9520_s0] sm:$0xff] }
 0x172   :  { %v269_v45 = vpop.f32.mrb[0].mxu1  ;;  %7363 = vmatprep.subr.bf16.mxu0 %v7348_v30  ;;  %7369 = vmatprep.subr.bf16.mxu1 %v7909_v3 }
 0x173   :  { %v6767_v46 = vpop.f32.mrb[1].mxu1  ;;  %515 = vmatprep.mubr.f32.mxu0 %v7910_v7  ;;  %6787 = vmatprep.mubr.msk.f32.mxu1 %vm7911_vm0, %v7910_v7  ;;  %v8161_v48 = vadd.f32 %v6154_v47, %v269_v45 }
 0x175   :  { %7365 = vmatpush1.bf16.msra.mxu0 %v7350_v36  ;;  %7371 = vmatpush3.bf16.msra.mxu1 %v7356_v40  ;;  %v594_v36 = vld [vmem:[%s9520_s0 + $0x8] sm:$0xff]  ;;  %v7388_v40 = vpack.c.bf16 %v596_v39, %v595_v38 }
 0x176   :  { %7372 = vmatprep.subr.bf16.mxu0 %v7909_v3  ;;  %7378 = vmatprep.subr.bf16.mxu1 %v7909_v3  ;;  %v7385_v37 = vpack.c.bf16 %v594_v36, %v593_v35  ;;  %v1428_v36 = vld [vmem:[%s9522_s28 + $0x28] sm:$0xff] }
 0x178   :  { %6158 = vmatmul.mubr.msk.f32.vlgmr.msra.gmra.mrb[4].mxu0 %vm302_vm4, %v8161_v48  ;;  %6788 = vmatmul.mubr.msk.f32.vlgmr.msra.gmra.mrb[4].mxu1 %vm302_vm4, %v8161_v48 }
 0x179   :  { %6798 = vmatprep.mubr.msk.f32.mxu0 %vm7911_vm0, %v7910_v7  ;;  %6809 = vmatprep.mubr.msk.f32.mxu1 %vm7911_vm0, %v7910_v7 }
 0x17a   :  { %7374 = vmatpush3.bf16.msra.mxu0 %v8179_v51  ;;  %7380 = vmatpush3.bf16.msra.mxu1 %v8179_v51 }
 0x17b   :  { %7375 = vmatprep.subr.bf16.mxu0 %v7909_v3  ;;  %7381 = vmatprep.subr.bf16.mxu1 %v7909_v3 }
 0x17e   :  { %7377 = vmatpush3.bf16.msra.mxu0 %v8191_v54  ;;  %7383 = vmatpush3.bf16.msra.mxu1 %v8191_v54 }
 0x17f   :  { %7390 = vmatprep.subr.bf16.mxu1 %v7909_v3  ;;  %6812 = vmatprep.subr.mxu0 %v7910_v7 }
 0x243   :  { %v372_v61 = vpop.f32.mrb[2].mxu0  ;;  %v8215_v62 = vpop.f32.mrb[2].mxu1 }
 0x244   :  { %v373_v63 = vadd.f32 %v372_v61, %v290_v59  ;;  %v374_v0 = vpop.f32.mrb[3].mxu0  ;;  %v6778_v1 = vpop.f32.mrb[3].mxu1  ;;  %v8273_v46 = vadd.f32 %v8215_v62, %v298_v42 }
 0x245   :  { %v375_v2 = vadd.f32 %v374_v0, %v294_v60 }
 0x246   :  { %v447_v4 = vmul.f32 0.35355338, %v373_v63 }
 0x248   :  { %v598_v5 = vmul.f32 %v447_v4, %v375_v2 }
 0x24a   :  { %6799 = vmatmul.mubr.msk.f32.vlgmr.msra.gmra.mrb[6].mxu0 %vm302_vm4, %v598_v5 }
 0x24b   :  { %v517_v6 = vpop.f32.mrb[4].mxu0  ;;  %v8218_v8 = vpop.f32.mrb[4].mxu1  ;;  %6814 = vmatprep.mubr.msk.f32.mxu0 %vm7911_vm0, %v7910_v7  ;;  %6813 = vmatpush3.msk.msra.mxu0 %vm760_vm5, %v8237_v17 }
 0x24c   :  { %v518_v9 = vadd.f32 %v517_v6, %v290_v59  ;;  %v519_v10 = vpop.f32.mrb[5].mxu0  ;;  %v6789_v11 = vpop.f32.mrb[5].mxu1  ;;  %6817 = vmatprep.subr.mxu0 %v7910_v7  ;;  %v8276_v47 = vadd.f32 %v8218_v8, %v298_v42 }
 0x24d   :  { %v520_v12 = vadd.f32 %v519_v10, %v294_v60 }
 0x24e   :  { %v592_v13 = vmul.f32 0.35355338, %v518_v9 }
 0x24f   :  { %v672_v14 = vmul.f32 %v520_v12, %v447_v4 }
 0x250   :  { %v990_v15 = vmul.f32 %v592_v13, %v375_v2  ;;  %v8222_v16 = vmul.f32 %v592_v13, %v520_v12 }
 0x251   :  { %6810 = vmatmul.mubr.msk.f32.vlgmr.msra.gmra.mrb[6].mxu1 %vm302_vm4, %v672_v14 }
 0x252   :  { %7392 = vmatpush3.bf16.msra.mxu1 %v8179_v51  ;;  %6841 = vmatprep.mubr.msk.f32.mxu1 %vm7911_vm0, %v7910_v7 }
 0x253   :  { %7393 = vmatprep.subr.bf16.mxu1 %v7909_v3 }
 0x256   :  { %7395 = vmatpush3.bf16.msra.mxu1 %v8191_v54 }
 0x257   :  { %6855 = vmatprep.subr.mxu1 %v7910_v7 }
 0x259   :  { %6842 = vmatmul.mubr.msk.f32.vlgmr.msra.gmra.mrb[8].mxu1 %vm302_vm4, %v990_v15 }
 0x25a   :  { %6857 = vmatprep.mubr.msk.f32.mxu1 %vm7911_vm0, %v7910_v7  ;;  %6856 = vmatpush3.msk.msra.mxu1 %vm760_vm5, %v8237_v17 }
 0x25b   :  { %6860 = vmatprep.subr.mxu1 %v7910_v7 }
 0x31d   :  { %v668_v18 = vpop.f32.mrb[6].mxu0 }
 0x31e   :  { %v6800_v19 = vpop.f32.mrb[7].mxu0 }
 0x324   :  { %v742_v20 = vpop.f32.mrb[6].mxu1 }
 0x325   :  { %v746_v21 = vmax.f32 %v668_v18, %v742_v20  ;;  %v6811_v22 = vpop.f32.mrb[7].mxu1 }
 0x327   :  { %v747_v23 = vsub.f32 %v668_v18, %v746_v21  ;;  %v750_v24 = vsub.f32 %v742_v20, %v746_v21  ;;  %v1426_v18 = vld [vmem:[%s9522_s28 + $0x18] sm:$0xff] }
 0x329   :  { %v748_v25 = vmul.f32 1.442695, %v747_v23  ;;  %v751_v26 = vmul.f32 1.442695, %v750_v24 }
 0x32b   :  { %7809 = vpow2.f32 %v748_v25  ;;  %v1418_v25 = vld [vmem:[%s9523_s11] sm:$0xff] }
 0x32c   :  { %7811 = vpow2.f32 %v751_v26  ;;  %v1060_v27 = vpop.f32.mrb[8].mxu1  ;;  %v1419_v26 = vld [vmem:[%s9523_s11 + $0x8] sm:$0xff] }
 0x32d   :  { %v6843_v28 = vpop.f32.mrb[9].mxu1 }
 0x32e   :  { %v1420_v28 = vld [vmem:[%s9523_s11 + $0x10] sm:$0xff] }
 0x335   :  { %v7810_v29 = vpop.eup %7809 }
 0x336   :  { %v7812_v30 = vpop.eup %7811 }
 0x337   :  { %v753_v31 = vadd.f32 %v7812_v30, %v7810_v29 }
 0x339   :  { %7813 = vrcp.f32 %v753_v31 }
 0x343   :  { %v7814_v32 = vpop.eup %7813 }
 0x344   :  { %v755_v33 = vmul.f32 %v7814_v32, %v7810_v29  ;;  %v835_v34 = vmul.f32 %v7814_v32, %v7812_v30  ;;  %v1421_v29 = vld [vmem:[%s9523_s11 + $0x18] sm:$0xff] }
 0x345   :  { %v7412_v30 = vpack.c.bf16 %v1421_v29, %v1420_v28 }
 0x346   :  { %6815 = vmatmul.mubr.msk.f32.vlgmr.msra.gmra.mrb[8].mxu0 %vm756_vm6, %v755_v33  ;;  %v1423_v33 = vld [vmem:[%s9522_s28] sm:$0xff] }
 0x347   :  { %6818 = vmatpush3.msk.msra.mxu0 %vm760_vm5, %v8237_v17  ;;  %6819 = vmatprep.mubr.msk.f32.mxu0 %vm7911_vm0, %v7910_v7 }
 0x348   :  { %7384 = vmatprep.subr.bf16.mxu0 %v7909_v3 }
 0x34a   :  { %6820 = vmatmul.mubr.msk.f32.vlgmr.msra.gmra.mrb[10].mxu0 %vm756_vm6, %v835_v34  ;;  %v1425_v34 = vld [vmem:[%s9522_s28 + $0x10] sm:$0xff] }
 0x34b   :  { %6830 = vmatprep.mubr.msk.f32.mxu0 %vm7911_vm0, %v7910_v7  ;;  %7386 = vmatpush3.bf16.msra.mxu0 %v7385_v37  ;;  %v7416_v42 = vpack.c.bf16 %v1425_v34, %v1423_v33 }
 0x34c   :  { %7387 = vmatprep.subr.bf16.mxu0 %v7909_v3 }
 0x34f   :  { %7389 = vmatpush3.bf16.msra.mxu0 %v7388_v40 }
 0x350   :  { %7396 = vmatprep.subr.bf16.mxu0 %v7909_v3 }
 0x419   :  { %v830_v44 = vpop.f32.mrb[8].mxu0 }
 0x41a   :  { %v6816_v45 = vpop.f32.mrb[9].mxu0  ;;  %v834_v50 = vmul.f32 %v830_v44, %v8273_v46 }
 0x41d   :  { %v905_v49 = vpop.f32.mrb[10].mxu0 }
 0x41e   :  { %v909_v52 = vmul.f32 %v905_v49, %v8276_v47  ;;  %v6821_v53 = vpop.f32.mrb[11].mxu0  ;;  %v1427_v49 = vld [vmem:[%s9522_s28 + $0x20] sm:$0xff] }
 0x420   :  { %v910_v59 = vadd.f32 %v909_v52, %v834_v50  ;;  %v1429_v50 = vld [vmem:[%s9522_s28 + $0x30] sm:$0xff] }
 0x421   :  { %v7420_v52 = vpack.c.bf16 %v1429_v50, %v1427_v49 }
 0x422   :  { %6831 = vmatmul.mubr.msk.f32.vlgmr.msra.gmra.mrb[12].mxu0 %vm302_vm4, %v910_v59 }
 0x423   :  { %7398 = vmatpush3.bf16.msra.mxu0 %v8179_v51  ;;  %6852 = vmatprep.mubr.msk.f32.mxu0 %vm7911_vm0, %v7910_v7 }
 0x424   :  { %7399 = vmatprep.subr.bf16.mxu0 %v7909_v3 }
 0x427   :  { %7401 = vmatpush3.bf16.msra.mxu0 %v8191_v54 }
 0x428   :  { %7402 = vmatprep.subr.bf16.mxu0 %v7909_v3 }
 0x42a   :  { %6853 = vmatmul.mubr.msk.f32.vlgmr.msra.gmra.mrb[14].mxu0 %vm302_vm4, %v8222_v16  ;;  %v1424_v16 = vld [vmem:[%s9522_s28 + $0x8] sm:$0xff] }
 0x42b   :  { %7404 = vmatpush3.bf16.msra.mxu0 %v7385_v37  ;;  %6873 = vmatprep.mubr.msk.f32.mxu0 %vm7911_vm0, %v7910_v7  ;;  %v7414_v19 = vpack.c.bf16 %v1426_v18, %v1424_v16  ;;  %v1430_v37 = vld [vmem:[%s9522_s28 + $0x38] sm:$0xff]  ;;  %v6177_v18 = vld [vmem:[%s9524_s6] ss:$0 sm:$0xff] }
 0x42c   :  { %7405 = vmatprep.subr.bf16.mxu0 %v7909_v3  ;;  %v7418_v45 = vpack.c.bf16 %v1430_v37, %v1428_v36 }
 0x42f   :  { %7407 = vmatpush3.bf16.msra.mxu0 %v7388_v40 }
 0x430   :  { %7415 = vmatprep.subr.bf16.mxu0 %v7414_v19 }
 0x4f5   :  { %v986_v60 = vpop.f32.mrb[12].mxu0 }
 0x4f6   :  { %v987_v61 = vadd.f32 %v8295_v57, %v986_v60  ;;  %v6832_v62 = vpop.f32.mrb[13].mxu0  ;;  %v6175_v60 = vld [vmem:[%s9469_s15] ss:$0 sm:$0xff] }
 0x4f7   :  { %v6176_v62 = vld [vmem:[%s9470_s16] ss:$0 sm:$0xff] }
 0x4f8   :  { %v1373_v63 = vadd.f32 %v987_v61, %v8148_v43 }
 0x4fa   :  { %v1374_v0 = vsel %vm302_vm4, %v1373_v63, 0.0 }
 0x4fb   :  { %1375 = vadd.xlane.f32.xlu1 %v1374_v0 }
 0x4fd   :  { %v1134_v1 = vpop.f32.mrb[14].mxu0 }
 0x4fe   :  { %v1138_v2 = vmax.f32 %v1060_v27, %v1134_v1  ;;  %v6854_v4 = vpop.f32.mrb[15].mxu0 }
 0x500   :  { %v1139_v5 = vsub.f32 %v1060_v27, %v1138_v2  ;;  %v1142_v6 = vsub.f32 %v1134_v1, %v1138_v2  ;;  %v7409_v27 = vpack.c.bf16 %v1419_v26, %v1418_v25 }
 0x502   :  { %v1140_v8 = vmul.f32 1.442695, %v1139_v5  ;;  %v1143_v9 = vmul.f32 1.442695, %v1142_v6  ;;  %v1431_v5 = vld [vmem:[%s9466_s12] sm:$0x3] }
 0x504   :  { %7815 = vpow2.f32 %v1140_v8 }
 0x505   :  { %7817 = vpow2.f32 %v1143_v9  ;;  %v1516_v9 = vrot.slane %v1431_v5, %v8201_v56 }
 0x50e   :  { %v7816_v10 = vpop.eup %7815 }
 0x50f   :  { %v7818_v11 = vpop.eup %7817 }
 0x510   :  { %v1145_v12 = vadd.f32 %v7818_v11, %v7816_v10 }
 0x512   :  { %7819 = vrcp.f32 %v1145_v12 }
 0x51c   :  { %v7820_v13 = vpop.eup %7819 }
 0x51d   :  { %v1147_v14 = vmul.f32 %v7820_v13, %v7816_v10  ;;  %v1222_v15 = vmul.f32 %v7820_v13, %v7818_v11  ;;  %v1520_v10 = vrot.slane %v1431_v5, %v8209_v58  ;;  %v1739_v5 = vld [vmem:[%s9467_s13] sm:$0xff] }
 0x51f   :  { %6858 = vmatmul.mubr.msk.f32.vlgmr.msra.gmra.mrb[10].mxu1 %vm756_vm6, %v1147_v14 }
 0x520   :  { %6861 = vmatpush3.msk.msra.mxu1 %vm760_vm5, %v8237_v17  ;;  %6862 = vmatprep.mubr.msk.f32.mxu1 %vm7911_vm0, %v7910_v7 }
 0x521   :  { %7408 = vmatprep.subr.bf16.mxu1 %v7909_v3 }
 0x523   :  { %6863 = vmatmul.mubr.msk.f32.vlgmr.msra.gmra.mrb[12].mxu1 %vm756_vm6, %v1222_v15 }
 0x524   :  { %6884 = vmatprep.mubr.msk.f32.mxu1 %vm7911_vm0, %v7910_v7  ;;  %7410 = vmatpush3.bf16.msra.mxu1 %v7409_v27 }
 0x525   :  { %7411 = vmatprep.subr.bf16.mxu1 %v7909_v3 }
 0x528   :  { %7413 = vmatpush3.bf16.msra.mxu1 %v7412_v30 }
 0x529   :  { %7422 = vmatprep.subr.bf16.mxu1 %v7909_v3 }
 0x588   :  { %v1376_v20 = vpop.xlane.xlu1 %1375 }
 0x589   :  { %v1378_v21 = vmul.f32 0.03125, %v1376_v20 }
 0x58b   :  { %v1379_v22 = vsub.f32 %v1373_v63, %v1378_v21 }
 0x58d   :  { %v1380_v23 = vmul.f32 %v1379_v22, %v1379_v22 }
 0x58f   :  { %v1381_v24 = vsel %vm302_vm4, %v1380_v23, 0.0 }
 0x590   :  { %1382 = vadd.xlane.f32.xlu1 %v1381_v24 }
 0x5f2   :  { %v1217_v31 = vpop.f32.mrb[10].mxu1 }
 0x5f3   :  { %v6859_v32 = vpop.f32.mrb[11].mxu1  ;;  %v1221_v38 = vmul.f32 %v1217_v31, %v8273_v46 }
 0x5f6   :  { %v1292_v35 = vpop.f32.mrb[12].mxu1 }
 0x5f7   :  { %v1296_v39 = vmul.f32 %v1292_v35, %v8276_v47  ;;  %v6864_v40 = vpop.f32.mrb[13].mxu1 }
 0x5f9   :  { %v1297_v44 = vadd.f32 %v1296_v39, %v1221_v38 }
 0x5fb   :  { %6874 = vmatmul.mubr.msk.f32.vlgmr.msra.gmra.mrb[16].mxu0 %vm302_vm4, %v1297_v44 }
 0x5fc   :  { %7417 = vmatpush1.bf16.msra.mxu0 %v7416_v42  ;;  %1587 = vmatprep.mubr.f32.mxu0 %v7910_v7 }
 0x5fd   :  { %7419 = vmatprep.subr.bf16.mxu0 %v7418_v45 }
 0x600   :  { %7421 = vmatpush1.bf16.msra.mxu0 %v7420_v52 }
 0x601   :  { %7429 = vmatprep.subr.bf16.mxu0 %v7414_v19 }
 0x603   :  { %6179 = vmatmul.mubr.msk.f32.vlgmr.msra.gmra.mrb[18].mxu0 %vm302_vm4, %v8148_v43 }
 0x604   :  { %7431 = vmatpush1.bf16.msra.mxu0 %v7416_v42  ;;  %1732 = vmatprep.mubr.f32.mxu0 %v7910_v7 }
 0x605   :  { %7433 = vmatprep.subr.bf16.mxu0 %v7418_v45 }
 0x608   :  { %7435 = vmatpush1.bf16.msra.mxu0 %v7420_v52 }
 0x609   :  { %7442 = vmatprep.subr.bf16.mxu0 %v7909_v3 }
 0x60b   :  { %6181 = vmatmul.mubr.msk.f32.vlgmr.msra.gmra.mrb[20].mxu0 %vm302_vm4, %v8161_v48 }
 0x60c   :  { %7444 = vmatpush3.bf16.msra.mxu0 %v8179_v51  ;;  %6917 = vmatprep.mubr.msk.f32.mxu0 %vm7911_vm0, %v7910_v7 }
 0x60d   :  { %7445 = vmatprep.subr.bf16.mxu0 %v7909_v3 }
 0x610   :  { %7447 = vmatpush3.bf16.msra.mxu0 %v8191_v54 }
 0x611   :  { %7448 = vmatprep.subr.bf16.mxu0 %v7909_v3 }
 0x61d   :  { %v1383_v46 = vpop.xlane.xlu1 %1382 }
 0x61e   :  { %v1384_v47 = vmul.f32 0.03125, %v1383_v46 }
 0x620   :  { %v1385_v53 = vadd.f32 1e-05, %v1384_v47 }
 0x622   :  { %7821 = vrsqrt.f32 %v1385_v53 }
 0x62c   :  { %v7822_v59 = vpop.eup %7821 }
 0x62d   :  { %v1387_v61 = vmul.f32 %v7822_v59, %v1379_v22 }
 0x62f   :  { %v1394_v63 = vmul.f32 %v6175_v60, %v1387_v61 }
 0x631   :  { %v8370_v0 = vadd.f32 %v6176_v62, %v1394_v63 }
 0x633   :  { %6885 = vmatmul.mubr.msk.f32.vlgmr.msra.gmra.mrb[14].mxu1 %vm302_vm4, %v8370_v0 }
 0x634   :  { %7424 = vmatpush3.bf16.msra.mxu1 %v7409_v27  ;;  %6895 = vmatprep.mubr.msk.f32.mxu1 %vm7911_vm0, %v7910_v7 }
 0x635   :  { %7425 = vmatprep.subr.bf16.mxu1 %v7909_v3 }
 0x638   :  { %7427 = vmatpush3.bf16.msra.mxu1 %v7412_v30 }
 0x639   :  { %7436 = vmatprep.subr.bf16.mxu1 %v7909_v3 }
 0x6ce   :  { %v1367_v1 = vpop.f32.mrb[16].mxu0 }
 0x6cf   :  { %v1368_v2 = vadd.f32 %v8295_v57, %v1367_v1  ;;  %v6875_v4 = vpop.f32.mrb[17].mxu0 }
 0x6d1   :  { %v1402_v6 = vadd.f32 %v1368_v2, %v8161_v48 }
 0x6d3   :  { %v1403_v8 = vsel %vm302_vm4, %v1402_v6, 0.0 }
 0x6d4   :  { %1404 = vadd.xlane.f32.xlu0 %v1403_v8 }
 0x6d6   :  { %v1589_v11 = vpop.f32.mrb[18].mxu0 }
 0x6d7   :  { %v8386_v12 = vadd.f32 %v1589_v11, %v1516_v9  ;;  %v1591_v13 = vpop.f32.mrb[19].mxu0 }
 0x6d8   :  { %v8388_v14 = vadd.f32 %v1591_v13, %v1520_v10 }
 0x6de   :  { %v1734_v57 = vpop.f32.mrb[20].mxu0 }
 0x6df   :  { %v1736_v15 = vpop.f32.mrb[21].mxu0  ;;  %v8395_v22 = vadd.f32 %v1734_v57, %v1516_v9  ;;  %v1741_v9 = vld [vmem:[%s9467_s13 + $0x10] sm:$0xff] }
 0x6e0   :  { %v8390_v16 = vadd.f32 %v1736_v15, %v1520_v10  ;;  %v1742_v10 = vld [vmem:[%s9467_s13 + $0x18] sm:$0xff] }
 0x6e1   :  { %v7452_v11 = vpack.c.bf16 %v1742_v10, %v1741_v9 }
 0x706   :  { %v1507_v19 = vpop.f32.mrb[14].mxu1 }
 0x707   :  { %v1508_v20 = vadd.f32 %v6177_v18, %v1507_v19  ;;  %v6886_v21 = vpop.f32.mrb[15].mxu1 }
 0x709   :  { %v1511_v23 = vmul.f32 0.35355338, %v1508_v20 }
 0x70b   :  { %v1818_v24 = vmul.f32 %v8395_v22, %v1511_v23  ;;  %v1744_v39 = vmul.f32 %v8386_v12, %v1511_v23 }
 0x70d   :  { %6918 = vmatmul.mubr.msk.f32.vlgmr.msra.gmra.mrb[22].mxu0 %vm302_vm4, %v1818_v24 }
 0x70e   :  { %6938 = vmatprep.mubr.msk.f32.mxu0 %vm7911_vm0, %v7910_v7 }
 0x761   :  { %v1405_v25 = vpop.xlane.xlu0 %1404 }
 0x762   :  { %v1406_v26 = vmul.f32 0.03125, %v1405_v25  ;;  %v6188_v25 = vld [vmem:[%s9468_s14] ss:$0 sm:$0xff] }
 0x764   :  { %v1407_v27 = vsub.f32 %v1402_v6, %v1406_v26  ;;  %v1740_v6 = vld [vmem:[%s9467_s13 + $0x8] sm:$0xff] }
 0x765   :  { %v7449_v8 = vpack.c.bf16 %v1740_v6, %v1739_v5  ;;  %v2559_v5 = vld [vmem:[%s9475_s21 + $0x8] sm:$0xff] }
 0x766   :  { %v1408_v28 = vmul.f32 %v1407_v27, %v1407_v27 }
 0x767   :  { %7450 = vmatpush3.bf16.msra.mxu0 %v7449_v8 }
 0x768   :  { %v1409_v29 = vsel %vm302_vm4, %v1408_v28, 0.0  ;;  %7451 = vmatprep.subr.bf16.mxu0 %v7909_v3 }
 0x769   :  { %1410 = vadd.xlane.f32.xlu1 %v1409_v29 }
 0x76b   :  { %7453 = vmatpush3.bf16.msra.mxu0 %v7452_v11 }
 0x76c   :  { %7460 = vmatprep.subr.bf16.mxu0 %v7909_v3 }
 0x7e0   :  { %v1888_v30 = vpop.f32.mrb[22].mxu0 }
 0x7e1   :  { %v6919_v31 = vpop.f32.mrb[23].mxu0 }
 0x7f6   :  { %v1411_v32 = vpop.xlane.xlu1 %1410 }
 0x7f7   :  { %v1412_v33 = vmul.f32 0.03125, %v1411_v32 }
 0x7f9   :  { %v1413_v34 = vadd.f32 1e-05, %v1412_v33 }
 0x7fb   :  { %7823 = vrsqrt.f32 %v1413_v34 }
 0x805   :  { %v7824_v35 = vpop.eup %7823 }
 0x806   :  { %v1415_v36 = vmul.f32 %v7824_v35, %v1407_v27 }
 0x808   :  { %v1416_v37 = vmul.f32 %v6175_v60, %v1415_v36 }
 0x80a   :  { %v8402_v38 = vadd.f32 %v6176_v62, %v1416_v37 }
 0x80c   :  { %6896 = vmatmul.mubr.msk.f32.vlgmr.msra.gmra.mrb[16].mxu1 %vm302_vm4, %v8402_v38 }
 0x80d   :  { %7438 = vmatpush3.bf16.msra.mxu1 %v8179_v51  ;;  %6906 = vmatprep.mubr.msk.f32.mxu1 %vm7911_vm0, %v7910_v7 }
 0x80e   :  { %7439 = vmatprep.subr.bf16.mxu1 %v7909_v3 }
 0x811   :  { %7441 = vmatpush3.bf16.msra.mxu1 %v8191_v54 }
 0x812   :  { %6920 = vmatprep.subr.mxu1 %v7910_v7 }
 0x814   :  { %6907 = vmatmul.mubr.msk.f32.vlgmr.msra.gmra.mrb[18].mxu1 %vm302_vm4, %v1744_v39 }
 0x815   :  { %6921 = vmatpush3.msk.msra.mxu1 %vm760_vm5, %v8237_v17  ;;  %6922 = vmatprep.mubr.msk.f32.mxu1 %vm7911_vm0, %v7910_v7 }
 0x816   :  { %6925 = vmatprep.subr.mxu1 %v7910_v7 }
 0x8df   :  { %v1663_v40 = vpop.f32.mrb[16].mxu1 }
 0x8e0   :  { %v6897_v42 = vpop.f32.mrb[17].mxu1  ;;  %v1664_v1 = vadd.f32 %v6177_v18, %v1663_v40 }
 0x8e2   :  { %v1667_v2 = vmul.f32 0.35355338, %v1664_v1 }
 0x8e4   :  { %v2131_v4 = vmul.f32 %v1667_v2, %v8386_v12  ;;  %v2205_v24 = vmul.f32 %v8395_v22, %v1667_v2 }
 0x8e7   :  { %v1814_v44 = vpop.f32.mrb[18].mxu1 }
 0x8e8   :  { %v1892_v45 = vmax.f32 %v1814_v44, %v1888_v30  ;;  %v6908_v49 = vpop.f32.mrb[19].mxu1 }
 0x8ea   :  { %v1893_v50 = vsub.f32 %v1814_v44, %v1892_v45  ;;  %v1896_v52 = vsub.f32 %v1888_v30, %v1892_v45 }
 0x8ec   :  { %v1894_v46 = vmul.f32 1.442695, %v1893_v50  ;;  %v1897_v47 = vmul.f32 1.442695, %v1896_v52 }
 0x8ee   :  { %7825 = vpow2.f32 %v1894_v46 }
 0x8ef   :  { %7827 = vpow2.f32 %v1897_v47 }
 0x8f8   :  { %v7826_v53 = vpop.eup %7825 }
 0x8f9   :  { %v7828_v59 = vpop.eup %7827 }
 0x8fa   :  { %v1899_v60 = vadd.f32 %v7828_v59, %v7826_v53 }
 0x8fc   :  { %7829 = vrcp.f32 %v1899_v60 }
 0x906   :  { %v7830_v61 = vpop.eup %7829 }
 0x907   :  { %v1901_v62 = vmul.f32 %v7830_v61, %v7826_v53  ;;  %v1976_v63 = vmul.f32 %v7830_v61, %v7828_v59 }
 0x909   :  { %6923 = vmatmul.mubr.msk.f32.vlgmr.msra.gmra.mrb[20].mxu1 %vm756_vm6, %v1901_v62 }
 0x90a   :  { %6926 = vmatpush3.msk.msra.mxu1 %vm760_vm5, %v8237_v17  ;;  %6927 = vmatprep.mubr.msk.f32.mxu1 %vm7911_vm0, %v7910_v7 }
 0x90b   :  { %7454 = vmatprep.subr.bf16.mxu1 %v7909_v3 }
 0x90d   :  { %6928 = vmatmul.mubr.msk.f32.vlgmr.msra.gmra.mrb[22].mxu1 %vm756_vm6, %v1976_v63 }
 0x90e   :  { %7456 = vmatpush3.bf16.msra.mxu1 %v8179_v51  ;;  %6949 = vmatprep.mubr.msk.f32.mxu1 %vm7911_vm0, %v7910_v7 }
 0x90f   :  { %7457 = vmatprep.subr.bf16.mxu1 %v7909_v3 }
 0x912   :  { %7459 = vmatpush3.bf16.msra.mxu1 %v8191_v54 }
 0x913   :  { %6963 = vmatprep.subr.mxu1 %v7910_v7 }
 0x915   :  { %6950 = vmatmul.mubr.msk.f32.vlgmr.msra.gmra.mrb[24].mxu1 %vm302_vm4, %v2131_v4  ;;  %v2558_v4 = vld [vmem:[%s9475_s21] sm:$0xff] }
 0x916   :  { %6964 = vmatpush3.msk.msra.mxu1 %vm760_vm5, %v8237_v17  ;;  %6965 = vmatprep.mubr.msk.f32.mxu1 %vm7911_vm0, %v7910_v7  ;;  %v7473_v6 = vpack.c.bf16 %v2559_v5, %v2558_v4 }
 0x917   :  { %6968 = vmatprep.subr.mxu1 %v7910_v7 }
 0x9dc   :  { %v1971_v12 = vpop.f32.mrb[20].mxu1 }
 0x9dd   :  { %v6924_v13 = vpop.f32.mrb[21].mxu1  ;;  %v1975_v15 = vmul.f32 %v1971_v12, %v8388_v14 }
 0x9e0   :  { %v2046_v57 = vpop.f32.mrb[22].mxu1 }
 0x9e1   :  { %v2050_v18 = vmul.f32 %v2046_v57, %v8390_v16  ;;  %v6929_v19 = vpop.f32.mrb[23].mxu1 }
 0x9e3   :  { %v2051_v20 = vadd.f32 %v2050_v18, %v1975_v15 }
 0x9e5   :  { %6939 = vmatmul.mubr.msk.f32.vlgmr.msra.gmra.mrb[24].mxu0 %vm302_vm4, %v2051_v20 }
 0x9e6   :  { %7462 = vmatpush3.bf16.msra.mxu0 %v8179_v51  ;;  %6960 = vmatprep.mubr.msk.f32.mxu0 %vm7911_vm0, %v7910_v7 }
 0x9e7   :  { %7463 = vmatprep.subr.bf16.mxu0 %v7909_v3 }
 0x9e8   :  { %v2201_v21 = vpop.f32.mrb[24].mxu1 }
 0x9e9   :  { %v6951_v23 = vpop.f32.mrb[25].mxu1 }
 0x9ea   :  { %7465 = vmatpush3.bf16.msra.mxu0 %v8191_v54 }
 0x9eb   :  { %7466 = vmatprep.subr.bf16.mxu0 %v7909_v3 }
 0x9ed   :  { %6961 = vmatmul.mubr.msk.f32.vlgmr.msra.gmra.mrb[26].mxu0 %vm302_vm4, %v2205_v24  ;;  %v6198_v24 = vld [vmem:[%s9472_s18] ss:$0 sm:$0xff] }
 0x9ee   :  { %7468 = vmatpush3.bf16.msra.mxu0 %v7449_v8  ;;  %6981 = vmatprep.mubr.msk.f32.mxu0 %vm7911_vm0, %v7910_v7  ;;  %v2561_v8 = vld [vmem:[%s9475_s21 + $0x18] sm:$0xff] }
 0x9ef   :  { %7469 = vmatprep.subr.bf16.mxu0 %v7909_v3 }
 0x9f2   :  { %7471 = vmatpush3.bf16.msra.mxu0 %v7452_v11 }
 0x9f3   :  { %7478 = vmatprep.subr.bf16.mxu0 %v7909_v3 }
 0xab8   :  { %v2127_v26 = vpop.f32.mrb[24].mxu0 }
 0xab9   :  { %v2128_v27 = vadd.f32 %v6188_v25, %v2127_v26  ;;  %v6940_v22 = vpop.f32.mrb[25].mxu0 }
 0xaba   :  { %v2564_v22 = vld [vmem:[%s9477_s23 + $0x8] sm:$0xff] }
 0xabb   :  { %v2514_v28 = vadd.f32 %v2128_v27, %v8370_v0  ;;  %v2563_v27 = vld [vmem:[%s9477_s23] sm:$0xff] }
 0xabd   :  { %v2515_v29 = vsel %vm302_vm4, %v2514_v28, 0.0 }
 0xabe   :  { %2516 = vadd.xlane.f32.xlu1 %v2515_v29  ;;  %v7479_v29 = vpack.c.bf16 %v2564_v22, %v2563_v27  ;;  %v6216_v27 = vld [vmem:[%s9515_s10 + $0xa8] sm:$0xff] }
 0xac0   :  { %v2275_v30 = vpop.f32.mrb[26].mxu0 }
 0xac1   :  { %v2279_v31 = vmax.f32 %v2201_v21, %v2275_v30  ;;  %v6962_v32 = vpop.f32.mrb[27].mxu0 }
 0xac2   :  { %v2568_v32 = vld [vmem:[%s9477_s23 + $0x28] sm:$0xff] }
 0xac3   :  { %v2280_v33 = vsub.f32 %v2201_v21, %v2279_v31  ;;  %v2283_v34 = vsub.f32 %v2275_v30, %v2279_v31  ;;  %v6197_v21 = vld [vmem:[%s9471_s17] ss:$0 sm:$0xff] }
 0xac4   :  { %v2567_v31 = vld [vmem:[%s9477_s23 + $0x20] sm:$0xff] }
 0xac5   :  { %v2281_v35 = vmul.f32 1.442695, %v2280_v33  ;;  %v2284_v36 = vmul.f32 1.442695, %v2283_v34  ;;  %v7485_v33 = vpack.c.bf16 %v2568_v32, %v2567_v31  ;;  %v2569_v34 = vld [vmem:[%s9477_s23 + $0x30] sm:$0xff] }
 0xac7   :  { %7831 = vpow2.f32 %v2281_v35  ;;  %v2570_v35 = vld [vmem:[%s9477_s23 + $0x38] sm:$0xff] }
 0xac8   :  { %7833 = vpow2.f32 %v2284_v36  ;;  %v7488_v36 = vpack.c.bf16 %v2570_v35, %v2569_v34 }
 0xad1   :  { %v7832_v37 = vpop.eup %7831 }
 0xad2   :  { %v7834_v39 = vpop.eup %7833 }
 0xad3   :  { %v2286_v40 = vadd.f32 %v7834_v39, %v7832_v37 }
 0xad5   :  { %7835 = vrcp.f32 %v2286_v40 }
 0xadf   :  { %v7836_v42 = vpop.eup %7835 }
 0xae0   :  { %v2288_v44 = vmul.f32 %v7836_v42, %v7832_v37  ;;  %v2363_v45 = vmul.f32 %v7836_v42, %v7834_v39 }
 0xae2   :  { %6966 = vmatmul.mubr.msk.f32.vlgmr.msra.gmra.mrb[26].mxu1 %vm756_vm6, %v2288_v44 }
 0xae3   :  { %6969 = vmatpush3.msk.msra.mxu1 %vm760_vm5, %v8237_v17  ;;  %6970 = vmatprep.mubr.msk.f32.mxu1 %vm7911_vm0, %v7910_v7 }
 0xae4   :  { %7472 = vmatprep.subr.bf16.mxu1 %v7909_v3 }
 0xae6   :  { %6971 = vmatmul.mubr.msk.f32.vlgmr.msra.gmra.mrb[28].mxu1 %vm756_vm6, %v2363_v45 }
 0xae7   :  { %6992 = vmatprep.mubr.msk.f32.mxu1 %vm7911_vm0, %v7910_v7  ;;  %7474 = vmatpush3.bf16.msra.mxu1 %v7473_v6 }
 0xae8   :  { %7475 = vmatprep.subr.bf16.mxu1 %v7909_v3 }
 0xb4b   :  { %v2517_v17 = vpop.xlane.xlu1 %2516 }
 0xb4c   :  { %v2518_v59 = vmul.f32 0.03125, %v2517_v17 }
 0xb4e   :  { %v2519_v61 = vsub.f32 %v2514_v28, %v2518_v59  ;;  %v2565_v28 = vld [vmem:[%s9477_s23 + $0x10] sm:$0xff] }
 0xbb5   :  { %v2358_v0 = vpop.f32.mrb[26].mxu1 }
 0xbb6   :  { %v6967_v49 = vpop.f32.mrb[27].mxu1  ;;  %v2362_v52 = vmul.f32 %v2358_v0, %v8388_v14  ;;  %v2520_v14 = vmul.f32 %v2519_v61, %v2519_v61 }
 0xbb7   :  { %v8544_v49 = vld [vmem:[#allocation2] sm:$0xff] }
 0xbb9   :  { %v2433_v50 = vpop.f32.mrb[28].mxu1 }
 0xbba   :  { %v2437_v46 = vmul.f32 %v2433_v50, %v8390_v16  ;;  %v6972_v47 = vpop.f32.mrb[29].mxu1  ;;  %v2521_v16 = vsel %vm302_vm4, %v2520_v14, 0.0  ;;  %v6199_v50 = vld [vmem:[%s9476_s22] ss:$0 sm:$0xff] }
 0xbbc   :  { %v2438_v53 = vadd.f32 %v2437_v46, %v2362_v52 }
 0xbbe   :  { %6982 = vmatmul.mubr.msk.f32.vlgmr.msra.gmra.mrb[28].mxu0 %vm302_vm4, %v2438_v53 }
 0xbbf   :  { %7011 = vmatprep.mubr.msk.f32.mxu0 %vm7911_vm0, %v7910_v7  ;;  %7480 = vmatpush3.bf16.msra.mxu0 %v7479_v29 }
 0xbc0   :  { %7481 = vmatprep.subr.bf16.mxu0 %v7909_v3 }
 0xc91   :  { %v2508_v60 = vpop.f32.mrb[28].mxu0 }
 0xc92   :  { %v2509_v62 = vadd.f32 %v6188_v25, %v2508_v60  ;;  %v6983_v63 = vpop.f32.mrb[29].mxu0 }
 0xc94   :  { %v2542_v1 = vadd.f32 %v2509_v62, %v8402_v38  ;;  %v2560_v38 = vld [vmem:[%s9475_s21 + $0x10] sm:$0xff]  ;;  %v6201_v62 = vld [vmem:[%s9478_s24] ss:$0 sm:$0xff] }
 0xc95   :  { %v7476_v9 = vpack.c.bf16 %v2561_v8, %v2560_v38 }
 0xc96   :  { %v2543_v2 = vsel %vm302_vm4, %v2542_v1, 0.0 }
 0xc97   :  { %2544 = vadd.xlane.f32.xlu1 %v2543_v2  ;;  %7477 = vmatpush3.bf16.msra.mxu1 %v7476_v9 }
 0xc98   :  { %7490 = vmatprep.subr.bf16.mxu1 %v7909_v3 }
 0xc9b   :  { %2522 = vadd.xlane.f32.xlu1 %v2521_v16 }
 0xd24   :  { %v2545_v10 = vpop.xlane.xlu1 %2544 }
 0xd25   :  { %v2546_v11 = vmul.f32 0.03125, %v2545_v10 }
 0xd27   :  { %v2547_v12 = vsub.f32 %v2542_v1, %v2546_v11 }
 0xd28   :  { %v2523_v13 = vpop.xlane.xlu1 %2522 }
 0xd29   :  { %v2524_v57 = vmul.f32 0.03125, %v2523_v13  ;;  %v2548_v15 = vmul.f32 %v2547_v12, %v2547_v12 }
 0xd2b   :  { %v2525_v18 = vadd.f32 1e-05, %v2524_v57  ;;  %v2549_v19 = vsel %vm302_vm4, %v2548_v15, 0.0  ;;  %v6208_v57 = vld [vmem:[%s9515_s10 + $0x68] sm:$0xff]  ;;  %v6211_v15 = vld [vmem:[%s9515_s10 + $0x80] sm:$0xff] }
 0xd2c   :  { %2550 = vadd.xlane.f32.xlu1 %v2549_v19  ;;  %v6207_v19 = vld [vmem:[%s9515_s10 + $0x60] sm:$0xff] }
 0xd2d   :  { %7837 = vrsqrt.f32 %v2525_v18  ;;  %v7508_v18 = vpack.c.bf16 %v6211_v15, %v6208_v57 }
 0xd37   :  { %v7838_v20 = vpop.eup %7837 }
 0xd38   :  { %v2527_v23 = vmul.f32 %v7838_v20, %v2519_v61  ;;  %v6210_v20 = vld [vmem:[%s9515_s10 + $0x78] sm:$0xff] }
 0xd3a   :  { %v2534_v25 = vmul.f32 %v6197_v21, %v2527_v23  ;;  %v6214_v23 = vld [vmem:[%s9515_s10 + $0x98] sm:$0xff] }
 0xd3c   :  { %v2541_v26 = vadd.f32 %v6198_v24, %v2534_v25 }
 0xd3e   :  { %6993 = vmatmul.mubr.msk.f32.vlgmr.msra.gmra.mrb[30].mxu1 %vm302_vm4, %v2541_v26 }
 0xd3f   :  { %7492 = vmatpush3.bf16.msra.mxu1 %v7473_v6  ;;  %7022 = vmatprep.mubr.msk.f32.mxu1 %vm7911_vm0, %v7910_v7  ;;  %v2566_v7 = vld [vmem:[%s9477_s23 + $0x18] sm:$0xff] }
 0xd40   :  { %7493 = vmatprep.subr.bf16.mxu1 %v7909_v3  ;;  %v7482_v30 = vpack.c.bf16 %v2566_v7, %v2565_v28 }
 0xd42   :  { %7483 = vmatpush3.bf16.msra.mxu0 %v7482_v30 }
 0xd43   :  { %7495 = vmatpush3.bf16.msra.mxu1 %v7476_v9  ;;  %7484 = vmatprep.subr.bf16.mxu0 %v7909_v3 }
 0xd44   :  { %7496 = vmatprep.subr.bf16.mxu1 %v7909_v3 }
 0xd46   :  { %7486 = vmatpush3.bf16.msra.mxu0 %v7485_v33 }
 0xd47   :  { %7487 = vmatprep.subr.bf16.mxu0 %v7909_v3 }
 0xd4a   :  { %7489 = vmatpush3.bf16.msra.mxu0 %v7488_v36 }
 0xd4b   :  { %7509 = vmatprep.subr.bf16.mxu0 %v7508_v18 }
 0xdb9   :  { %v2551_v37 = vpop.xlane.xlu1 %2550 }
 0xdba   :  { %v2552_v39 = vmul.f32 0.03125, %v2551_v37 }
 0xdbc   :  { %v2553_v40 = vadd.f32 1e-05, %v2552_v39  ;;  %v6209_v39 = vld [vmem:[%s9515_s10 + $0x70] sm:$0xff] }
 0xdbe   :  { %7839 = vrsqrt.f32 %v2553_v40  ;;  %v6212_v40 = vld [vmem:[%s9515_s10 + $0x88] sm:$0xff] }
 0xdc8   :  { %v7840_v42 = vpop.eup %7839 }
 0xdc9   :  { %v2555_v44 = vmul.f32 %v7840_v42, %v2547_v12  ;;  %v6206_v42 = vld [vmem:[%s9525_s29] ss:$0 sm:$0xff] }
 0xdcb   :  { %v2556_v45 = vmul.f32 %v6197_v21, %v2555_v44  ;;  %v7510_v21 = vpack.c.bf16 %v6210_v20, %v6207_v19 }
 0xdcd   :  { %v2557_v0 = vadd.f32 %v6198_v24, %v2556_v45  ;;  %v6217_v24 = vld [vmem:[%s9515_s10 + $0xb0] sm:$0xff]  ;;  %v7517_v45 = vpack.c.bf16 %v6212_v40, %v6209_v39  ;;  %v6225_v39 = vld [vmem:[%s9520_s0 + $0x28] sm:$0xff] }
 0xdce   :  { %v7512_v25 = vpack.c.bf16 %v6217_v24, %v6214_v23 }
 0xdcf   :  { %7023 = vmatmul.mubr.msk.f32.vlgmr.msra.gmra.mrb[32].mxu1 %vm302_vm4, %v2557_v0 }
 0xdd0   :  { %7498 = vmatpush3.bf16.msra.mxu1 %v7479_v29  ;;  %7041 = vmatprep.mubr.msk.f32.mxu1 %vm7911_vm0, %v8544_v49 }
 0xdd1   :  { %7499 = vmatprep.subr.bf16.mxu1 %v7909_v3 }
 0xdd4   :  { %7501 = vmatpush3.bf16.msra.mxu1 %v7482_v30 }
 0xdd5   :  { %7502 = vmatprep.subr.bf16.mxu1 %v7909_v3 }
 0xdd8   :  { %7504 = vmatpush3.bf16.msra.mxu1 %v7485_v33 }
 0xdd9   :  { %7505 = vmatprep.subr.bf16.mxu1 %v7909_v3 }
 0xddc   :  { %7507 = vmatpush3.bf16.msra.mxu1 %v7488_v36  ;;  %v6205_v36 = vld [vmem:[%s9473_s19] ss:$0 sm:$0xff] }
 0xddd   :  { %7523 = vmatprep.subr.bf16.mxu1 %v7508_v18 }
 0xe11   :  { %v2647_v52 = vpop.f32.mrb[30].mxu1 }
 0xe12   :  { %v2648_v46 = vadd.f32 %v6199_v50, %v2647_v52  ;;  %v6994_v47 = vpop.f32.mrb[31].mxu1  ;;  %v6218_v52 = vld [vmem:[%s9515_s10 + $0xb8] sm:$0xff] }
 0xe14   :  { %v2651_v53 = vmax.f32 %v2648_v46, 0.0 }
 0xe16   :  { %7012 = vmatmul.mubr.msk.f32.vlgmr.msra.gmra.mrb[30].mxu0 %vm114_vm1, %v2651_v53 }
 0xe17   :  { %3022 = vmatprep.mubr.f32.mxu0 %v8544_v49  ;;  %7511 = vmatpush1.bf16.msra.mxu0 %v7510_v21 }
 0xe18   :  { %7513 = vmatprep.subr.bf16.mxu0 %v7512_v25 }
 0xea2   :  { %v2800_v17 = vpop.f32.mrb[32].mxu1 }
 0xea3   :  { %v2801_v59 = vadd.f32 %v6199_v50, %v2800_v17  ;;  %v7024_v60 = vpop.f32.mrb[33].mxu1  ;;  %v6215_v50 = vld [vmem:[%s9515_s10 + $0xa0] sm:$0xff] }
 0xea4   :  { %v7520_v46 = vpack.c.bf16 %v6218_v52, %v6215_v50 }
 0xea5   :  { %v2804_v61 = vmax.f32 %v2801_v59, 0.0 }
 0xea7   :  { %7042 = vmatmul.mubr.msk.f32.vlgmr.msra.gmra.mrb[34].mxu1 %vm114_vm1, %v2804_v61 }
 0xea8   :  { %3167 = vmatprep.mubr.f32.mxu1 %v8544_v49  ;;  %7525 = vmatpush1.bf16.msra.mxu1 %v7510_v21 }
 0xea9   :  { %7527 = vmatprep.subr.bf16.mxu1 %v7512_v25 }
 0xee9   :  { %v2727_v63 = vpop.f32.mrb[30].mxu0 }
 0xeea   :  { %v2728_v1 = vadd.f32 %v6201_v62, %v2727_v63  ;;  %v7013_v2 = vpop.f32.mrb[31].mxu0  ;;  %v8644_v63 = vld [vmem:[%s9518_s4 + $0x3] sm:$0x7] }
 0xeeb   :  { %v2947_v2 = vrot.slane %v8644_v63, %v8209_v58  ;;  %v2951_v50 = vrot.slane %v8644_v63, %v297_v41 }
 0xeec   :  { %v2880_v14 = vadd.f32 %v2728_v1, %v2541_v26  ;;  %v6213_v26 = vld [vmem:[%s9515_s10 + $0x90] sm:$0xff]  ;;  %v2943_v1 = vrot.slane %v8644_v63, %v8201_v56 }
 0xeed   :  { %v7514_v22 = vpack.c.bf16 %v6216_v27, %v6213_v26 }
 0xeee   :  { %v2881_v16 = vsel %vm302_vm4, %v2880_v14, 0.0 }
 0xeef   :  { %2882 = vadd.xlane.f32.xlu1 %v2881_v16  ;;  %7515 = vmatpush1.bf16.msra.mxu0 %v7514_v22 }
 0xef0   :  { %7529 = vmatpush1.bf16.msra.mxu1 %v7514_v22  ;;  %7516 = vmatprep.subr.bf16.mxu0 %v7909_v3 }
 0xef1   :  { %7536 = vmatprep.subr.bf16.mxu1 %v7909_v3 }
 0xf7a   :  { %v2874_v4 = vpop.f32.mrb[34].mxu1 }
 0xf7b   :  { %v2875_v5 = vadd.f32 %v6201_v62, %v2874_v4  ;;  %v7043_v6 = vpop.f32.mrb[35].mxu1 }
 0xf7c   :  { %v2883_v38 = vpop.xlane.xlu1 %2882 }
 0xf7d   :  { %v2884_v8 = vmul.f32 0.03125, %v2883_v38  ;;  %v2908_v9 = vadd.f32 %v2875_v5, %v2557_v0 }
 0xf7f   :  { %v2885_v10 = vsub.f32 %v2880_v14, %v2884_v8  ;;  %v2909_v11 = vsel %vm302_vm4, %v2908_v9, 0.0 }
 0xf80   :  { %2910 = vadd.xlane.f32.xlu1 %v2909_v11 }
 0xf81   :  { %v2886_v12 = vmul.f32 %v2885_v10, %v2885_v10 }
 0xf83   :  { %v2887_v13 = vsel %vm302_vm4, %v2886_v12, 0.0 }
 0xf84   :  { %2888 = vadd.xlane.f32.xlu1 %v2887_v13 }
0x100d   :  { %v2911_v28 = vpop.xlane.xlu1 %2910 }
0x100e   :  { %v2912_v29 = vmul.f32 0.03125, %v2911_v28 }
0x1010   :  { %v2913_v7 = vsub.f32 %v2908_v9, %v2912_v29  ;;  %v8656_v9 = vld [vmem:[%s9519_s9] sm:$0xf] }
0x1011   :  { %v2889_v30 = vpop.xlane.xlu1 %2888 }
0x1012   :  { %v2890_v31 = vmul.f32 0.03125, %v2889_v30  ;;  %v2914_v32 = vmul.f32 %v2913_v7, %v2913_v7 }
0x1014   :  { %v2891_v33 = vadd.f32 1e-05, %v2890_v31  ;;  %v2915_v34 = vsel %vm302_vm4, %v2914_v32, 0.0 }
0x1015   :  { %2916 = vadd.xlane.f32.xlu0 %v2915_v34 }
0x1016   :  { %7841 = vrsqrt.f32 %v2891_v33 }
0x1020   :  { %v7842_v35 = vpop.eup %7841 }
0x1021   :  { %v2893_v37 = vmul.f32 %v7842_v35, %v2885_v10 }
0x1023   :  { %v2900_v44 = vmul.f32 %v6205_v36, %v2893_v37  ;;  %v6224_v37 = vld [vmem:[%s9520_s0 + $0x20] sm:$0xff] }
0x1024   :  { %v7549_v40 = vpack.c.bf16 %v6225_v39, %v6224_v37  ;;  %v6253_v37 = vld [vmem:[%s9522_s28 + $0x40] sm:$0xff]  ;;  %v6255_v39 = vld [vmem:[%s9522_s28 + $0x50] sm:$0xff] }
0x1025   :  { %v8603_v0 = vadd.f32 %v6206_v42, %v2900_v44  ;;  %v6227_v44 = vld [vmem:[%s9520_s0 + $0x38] sm:$0xff] }
0x1027   :  { %6220 = vmatmul.mubr.msk.f32.vlgmr.msra.gmra.mrb[32].mxu0 %vm302_vm4, %v8603_v0 }
0x1028   :  { %7518 = vmatpush3.bf16.msra.mxu0 %v7517_v45  ;;  %7052 = vmatprep.mubr.msk.f32.mxu0 %vm7911_vm0, %v8544_v49 }
0x1029   :  { %7519 = vmatprep.subr.bf16.mxu0 %v7909_v3 }
0x102c   :  { %7521 = vmatpush3.bf16.msra.mxu0 %v7520_v46 }
0x102d   :  { %7530 = vmatprep.subr.bf16.mxu0 %v7909_v3 }
0x102f   :  { %7053 = vmatmul.mubr.msk.f32.vlgmr.msra.gmra.mrb[34].mxu0 %vm302_vm4, %v8603_v0 }
0x1030   :  { %7532 = vmatpush3.bf16.msra.mxu0 %v7517_v45  ;;  %7063 = vmatprep.mubr.msk.f32.mxu0 %vm7911_vm0, %v8544_v49 }
0x1031   :  { %7533 = vmatprep.subr.bf16.mxu0 %v7909_v3 }
0x1034   :  { %7535 = vmatpush3.bf16.msra.mxu0 %v7520_v46 }
0x1035   :  { %7542 = vmatprep.subr.bf16.mxu0 %v7909_v3 }
0x10a2   :  { %v2917_v47 = vpop.xlane.xlu0 %2916 }
0x10a3   :  { %v2918_v53 = vmul.f32 0.03125, %v2917_v47 }
0x10a5   :  { %v2919_v17 = vadd.f32 1e-05, %v2918_v53 }
0x10a7   :  { %7843 = vrsqrt.f32 %v2919_v17 }
0x10b1   :  { %v7844_v59 = vpop.eup %7843 }
0x10b2   :  { %v2921_v60 = vmul.f32 %v7844_v59, %v2913_v7 }
0x10b4   :  { %v2922_v61 = vmul.f32 %v6205_v36, %v2921_v60 }
0x10b6   :  { %v8623_v62 = vadd.f32 %v6206_v42, %v2922_v61  ;;  %v6226_v42 = vld [vmem:[%s9520_s0 + $0x30] sm:$0xff] }
0x10b7   :  { %v7552_v45 = vpack.c.bf16 %v6227_v44, %v6226_v42  ;;  %v6258_v42 = vld [vmem:[%s9522_s28 + $0x68] sm:$0xff]  ;;  %v6260_v44 = vld [vmem:[%s9522_s28 + $0x78] sm:$0xff] }
0x10b8   :  { %6222 = vmatmul.mubr.msk.f32.vlgmr.msra.gmra.mrb[36].mxu1 %vm302_vm4, %v8623_v62  ;;  %7064 = vmatmul.mubr.msk.f32.vlgmr.msra.gmra.mrb[36].mxu0 %vm302_vm4, %v8623_v62 }
0x10b9   :  { %7538 = vmatpush3.bf16.msra.mxu1 %v8179_v51  ;;  %7074 = vmatprep.mubr.msk.f32.mxu1 %vm7911_vm0, %v8544_v49 }
0x10ba   :  { %7539 = vmatprep.subr.bf16.mxu1 %v7909_v3  ;;  %7544 = vmatpush3.bf16.msra.mxu0 %v8179_v51 }
0x10bb   :  { %7545 = vmatprep.subr.bf16.mxu0 %v7909_v3  ;;  %7085 = vmatprep.mubr.msk.f32.mxu0 %vm7911_vm0, %v8544_v49 }
0x10bd   :  { %7541 = vmatpush3.bf16.msra.mxu1 %v8191_v54 }
0x10be   :  { %7547 = vmatpush3.bf16.msra.mxu0 %v8191_v54  ;;  %7088 = vmatprep.subr.mxu1 %v8544_v49 }
0x10bf   :  { %7548 = vmatprep.subr.bf16.mxu0 %v7909_v3 }
0x10fa   :  { %v3024_v14 = vpop.f32.mrb[32].mxu0 }
0x10fb   :  { %v3025_v16 = vadd.f32 %v3024_v14, %v2943_v1  ;;  %v3026_v4 = vpop.f32.mrb[33].mxu0 }
0x10fc   :  { %v3027_v5 = vadd.f32 %v3026_v4, %v2947_v2 }
0x10fd   :  { %v3099_v6 = vmul.f32 0.35355338, %v3025_v16 }
0x10ff   :  { %v3252_v38 = vmul.f32 %v3099_v6, %v3027_v5 }
0x1101   :  { %7075 = vmatmul.mubr.msk.f32.vlgmr.msra.gmra.mrb[38].mxu1 %vm302_vm4, %v3252_v38 }
0x1102   :  { %v8651_v8 = vpop.f32.mrb[34].mxu0  ;;  %7089 = vmatpush3.msk.msra.mxu1 %vm760_vm5, %v8656_v9  ;;  %7090 = vmatprep.mubr.msk.f32.mxu1 %vm7911_vm0, %v8544_v49 }
0x1103   :  { %v7054_v10 = vpop.f32.mrb[35].mxu0  ;;  %7093 = vmatprep.subr.mxu1 %v8544_v49  ;;  %v8705_v47 = vadd.f32 %v8651_v8, %v2951_v50 }
0x118b   :  { %v3169_v11 = vpop.f32.mrb[36].mxu1  ;;  %v3240_v12 = vpop.f32.mrb[36].mxu0 }
0x118c   :  { %v3170_v13 = vadd.f32 %v3169_v11, %v2943_v1  ;;  %v3171_v57 = vpop.f32.mrb[37].mxu1  ;;  %v7065_v15 = vpop.f32.mrb[37].mxu0  ;;  %v8707_v53 = vadd.f32 %v3240_v12, %v2951_v50 }
0x118d   :  { %v3172_v18 = vadd.f32 %v3171_v57, %v2947_v2  ;;  %v8726_v2 = vld [vmem:[%s9521_s8 + $0x1] ss:$0 sm:$0xff] }
0x118e   :  { %v3244_v19 = vmul.f32 0.35355338, %v3170_v13 }
0x118f   :  { %v3326_v20 = vmul.f32 %v3172_v18, %v3099_v6 }
0x1190   :  { %v8663_v21 = vmul.f32 %v3244_v19, %v3172_v18  ;;  %v3639_v36 = vmul.f32 %v3244_v19, %v3027_v5 }
0x1191   :  { %7086 = vmatmul.mubr.msk.f32.vlgmr.msra.gmra.mrb[38].mxu0 %vm302_vm4, %v3326_v20 }
0x1192   :  { %7106 = vmatprep.mubr.msk.f32.mxu0 %vm7911_vm0, %v8544_v49  ;;  %7550 = vmatpush3.bf16.msra.mxu0 %v7549_v40 }
0x1193   :  { %7551 = vmatprep.subr.bf16.mxu0 %v7909_v3 }
0x1196   :  { %7553 = vmatpush3.bf16.msra.mxu0 %v7552_v45 }
0x1197   :  { %7560 = vmatprep.subr.bf16.mxu0 %v7909_v3 }
0x11d4   :  { %v3322_v23 = vpop.f32.mrb[38].mxu1 }
0x11d5   :  { %v7076_v24 = vpop.f32.mrb[39].mxu1 }
0x11d6   :  { %v6256_v24 = vld [vmem:[%s9522_s28 + $0x58] sm:$0xff] }
0x1264   :  { %v3396_v25 = vpop.f32.mrb[38].mxu0 }
0x1265   :  { %v3400_v26 = vmax.f32 %v3322_v23, %v3396_v25  ;;  %v7087_v27 = vpop.f32.mrb[39].mxu0 }
0x1267   :  { %v3401_v22 = vsub.f32 %v3322_v23, %v3400_v26  ;;  %v3404_v28 = vsub.f32 %v3396_v25, %v3400_v26 }
0x1269   :  { %v3402_v29 = vmul.f32 1.442695, %v3401_v22  ;;  %v3405_v7 = vmul.f32 1.442695, %v3404_v28 }
0x126b   :  { %7845 = vpow2.f32 %v3402_v29 }
0x126c   :  { %7847 = vpow2.f32 %v3405_v7  ;;  %v6248_v7 = vld [vmem:[%s9523_s11 + $0x20] sm:$0xff] }
0x1275   :  { %v7846_v30 = vpop.eup %7845 }
0x1276   :  { %v7848_v31 = vpop.eup %7847 }
0x1277   :  { %v3407_v32 = vadd.f32 %v7848_v31, %v7846_v30 }
0x1279   :  { %7849 = vrcp.f32 %v3407_v32  ;;  %v6250_v32 = vld [vmem:[%s9523_s11 + $0x30] sm:$0xff] }
0x1283   :  { %v7850_v33 = vpop.eup %7849 }
0x1284   :  { %v3409_v34 = vmul.f32 %v7850_v33, %v7846_v30  ;;  %v3484_v35 = vmul.f32 %v7850_v33, %v7848_v31  ;;  %v6249_v30 = vld [vmem:[%s9523_s11 + $0x28] sm:$0xff]  ;;  %v6251_v33 = vld [vmem:[%s9523_s11 + $0x38] sm:$0xff] }
0x1285   :  { %v7573_v31 = vpack.c.bf16 %v6249_v30, %v6248_v7 }
0x1286   :  { %7091 = vmatmul.mubr.msk.f32.vlgmr.msra.gmra.mrb[40].mxu1 %vm756_vm6, %v3409_v34  ;;  %v7576_v34 = vpack.c.bf16 %v6251_v33, %v6250_v32 }
0x1287   :  { %7094 = vmatpush3.msk.msra.mxu1 %vm760_vm5, %v8656_v9  ;;  %7095 = vmatprep.mubr.msk.f32.mxu1 %vm7911_vm0, %v8544_v49 }
0x1288   :  { %7554 = vmatprep.subr.bf16.mxu1 %v7909_v3 }
0x128a   :  { %7096 = vmatmul.mubr.msk.f32.vlgmr.msra.gmra.mrb[42].mxu1 %vm756_vm6, %v3484_v35 }
0x128b   :  { %7556 = vmatpush3.bf16.msra.mxu1 %v8179_v51  ;;  %7117 = vmatprep.mubr.msk.f32.mxu1 %vm7911_vm0, %v8544_v49 }
0x128c   :  { %7557 = vmatprep.subr.bf16.mxu1 %v7909_v3 }
0x128f   :  { %7559 = vmatpush3.bf16.msra.mxu1 %v8191_v54 }
0x1290   :  { %7131 = vmatprep.subr.mxu1 %v8544_v49 }
0x1292   :  { %7118 = vmatmul.mubr.msk.f32.vlgmr.msra.gmra.mrb[44].mxu1 %vm302_vm4, %v3639_v36 }
0x1293   :  { %7132 = vmatpush3.msk.msra.mxu1 %vm760_vm5, %v8656_v9  ;;  %7133 = vmatprep.mubr.msk.f32.mxu1 %vm7911_vm0, %v8544_v49 }
0x1294   :  { %7136 = vmatprep.subr.mxu1 %v8544_v49 }
0x1359   :  { %v3479_v52 = vpop.f32.mrb[40].mxu1 }
0x135a   :  { %v7092_v46 = vpop.f32.mrb[41].mxu1  ;;  %v3483_v59 = vmul.f32 %v3479_v52, %v8705_v47 }
0x135b   :  { %v7580_v46 = vpack.c.bf16 %v6255_v39, %v6253_v37 }
0x135d   :  { %v3554_v17 = vpop.f32.mrb[42].mxu1 }
0x135e   :  { %v3558_v60 = vmul.f32 %v3554_v17, %v8707_v53  ;;  %v7097_v61 = vpop.f32.mrb[43].mxu1 }
0x135f   :  { %v6259_v61 = vld [vmem:[%s9522_s28 + $0x70] sm:$0xff] }
0x1360   :  { %v3559_v1 = vadd.f32 %v3558_v60, %v3483_v59  ;;  %v7582_v59 = vpack.c.bf16 %v6260_v44, %v6258_v42  ;;  %v6257_v60 = vld [vmem:[%s9522_s28 + $0x60] sm:$0xff] }
0x1362   :  { %7107 = vmatmul.mubr.msk.f32.vlgmr.msra.gmra.mrb[40].mxu0 %vm302_vm4, %v3559_v1  ;;  %v7584_v1 = vpack.c.bf16 %v6259_v61, %v6257_v60 }
0x1363   :  { %7562 = vmatpush3.bf16.msra.mxu0 %v8179_v51  ;;  %7128 = vmatprep.mubr.msk.f32.mxu0 %vm7911_vm0, %v8544_v49 }
0x1364   :  { %7563 = vmatprep.subr.bf16.mxu0 %v7909_v3 }
0x1365   :  { %v3709_v41 = vpop.f32.mrb[44].mxu1 }
0x1366   :  { %v7119_v63 = vpop.f32.mrb[45].mxu1 }
0x1367   :  { %7565 = vmatpush3.bf16.msra.mxu0 %v8191_v54 }
0x1368   :  { %7566 = vmatprep.subr.bf16.mxu0 %v7909_v3 }
0x136a   :  { %7129 = vmatmul.mubr.msk.f32.vlgmr.msra.gmra.mrb[42].mxu0 %vm302_vm4, %v8663_v21 }
0x136b   :  { %7568 = vmatpush3.bf16.msra.mxu0 %v7549_v40  ;;  %7149 = vmatprep.mubr.msk.f32.mxu0 %vm7911_vm0, %v8544_v49 }
0x136c   :  { %7569 = vmatprep.subr.bf16.mxu0 %v7909_v3 }
0x136f   :  { %7571 = vmatpush3.bf16.msra.mxu0 %v7552_v45 }
0x1435   :  { %v3635_v14 = vpop.f32.mrb[40].mxu0 }
0x1436   :  { %v3636_v16 = vadd.f32 %v8726_v2, %v3635_v14  ;;  %v7108_v4 = vpop.f32.mrb[41].mxu0  ;;  %v6247_v14 = vld [vmem:[%s9470_s16 + $0x1] ss:$0 sm:$0xff] }
0x1438   :  { %v4024_v5 = vadd.f32 %v3636_v16, %v8603_v0  ;;  %v6254_v0 = vld [vmem:[%s9522_s28 + $0x48] sm:$0xff] }
0x1439   :  { %v7578_v25 = vpack.c.bf16 %v6256_v24, %v6254_v0 }
0x143a   :  { %v4025_v6 = vsel %vm302_vm4, %v4024_v5, 0.0 }
0x143b   :  { %4026 = vadd.xlane.f32.xlu1 %v4025_v6  ;;  %7579 = vmatprep.subr.bf16.mxu0 %v7578_v25 }
0x143d   :  { %v3783_v38 = vpop.f32.mrb[42].mxu0 }
0x143e   :  { %v3787_v8 = vmax.f32 %v3709_v41, %v3783_v38  ;;  %v7130_v10 = vpop.f32.mrb[43].mxu0 }
0x1440   :  { %v3788_v11 = vsub.f32 %v3709_v41, %v3787_v8  ;;  %v3791_v12 = vsub.f32 %v3783_v38, %v3787_v8  ;;  %v6261_v8 = vld [vmem:[%s9466_s12 + $0x2] sm:$0x3] }
0x1442   :  { %v3789_v13 = vmul.f32 1.442695, %v3788_v11  ;;  %v3792_v57 = vmul.f32 1.442695, %v3791_v12  ;;  %v4170_v12 = vrot.slane %v6261_v8, %v8201_v56 }
0x1444   :  { %7851 = vpow2.f32 %v3789_v13  ;;  %v4174_v13 = vrot.slane %v6261_v8, %v8209_v58 }
0x1445   :  { %7853 = vpow2.f32 %v3792_v57 }
0x144e   :  { %v7852_v15 = vpop.eup %7851 }
0x144f   :  { %v7854_v18 = vpop.eup %7853 }
0x1450   :  { %v3794_v19 = vadd.f32 %v7854_v18, %v7852_v15 }
0x1452   :  { %7855 = vrcp.f32 %v3794_v19 }
0x145c   :  { %v7856_v20 = vpop.eup %7855 }
0x145d   :  { %v3796_v21 = vmul.f32 %v7856_v20, %v7852_v15  ;;  %v3871_v23 = vmul.f32 %v7856_v20, %v7854_v18 }
0x145f   :  { %7134 = vmatmul.mubr.msk.f32.vlgmr.msra.gmra.mrb[46].mxu1 %vm756_vm6, %v3796_v21 }
0x1460   :  { %7137 = vmatpush3.msk.msra.mxu1 %vm760_vm5, %v8656_v9  ;;  %7138 = vmatprep.mubr.msk.f32.mxu1 %vm7911_vm0, %v8544_v49 }
0x1461   :  { %7572 = vmatprep.subr.bf16.mxu1 %v7909_v3 }
0x1463   :  { %7139 = vmatmul.mubr.msk.f32.vlgmr.msra.gmra.mrb[48].mxu1 %vm756_vm6, %v3871_v23 }
0x1464   :  { %7160 = vmatprep.mubr.msk.f32.mxu1 %vm7911_vm0, %v8544_v49  ;;  %7574 = vmatpush3.bf16.msra.mxu1 %v7573_v31 }
0x1465   :  { %7575 = vmatprep.subr.bf16.mxu1 %v7909_v3 }
0x1468   :  { %7577 = vmatpush3.bf16.msra.mxu1 %v7576_v34 }
0x1469   :  { %7586 = vmatprep.subr.bf16.mxu1 %v7909_v3 }
0x14c8   :  { %v4027_v26 = vpop.xlane.xlu1 %4026 }
0x14c9   :  { %v4028_v27 = vmul.f32 0.03125, %v4027_v26 }
0x14cb   :  { %v4029_v22 = vsub.f32 %v4024_v5, %v4028_v27 }
0x14cd   :  { %v4030_v28 = vmul.f32 %v4029_v22, %v4029_v22 }
0x14cf   :  { %v4031_v29 = vsel %vm302_vm4, %v4030_v28, 0.0 }
0x14d0   :  { %4032 = vadd.xlane.f32.xlu0 %v4031_v29 }
0x1532   :  { %v3866_v35 = vpop.f32.mrb[46].mxu1 }
0x1533   :  { %v7135_v36 = vpop.f32.mrb[47].mxu1  ;;  %v3870_v45 = vmul.f32 %v3866_v35, %v8705_v47 }
0x1536   :  { %v3941_v40 = vpop.f32.mrb[48].mxu1 }
0x1537   :  { %v3945_v50 = vmul.f32 %v3941_v40, %v8707_v53  ;;  %v7140_v52 = vpop.f32.mrb[49].mxu1 }
0x1539   :  { %v3946_v17 = vadd.f32 %v3945_v50, %v3870_v45 }
0x153b   :  { %7150 = vmatmul.mubr.msk.f32.vlgmr.msra.gmra.mrb[44].mxu0 %vm302_vm4, %v3946_v17 }
0x153c   :  { %7581 = vmatpush1.bf16.msra.mxu0 %v7580_v46  ;;  %4241 = vmatprep.mubr.f32.mxu0 %v8544_v49 }
0x153d   :  { %7583 = vmatprep.subr.bf16.mxu0 %v7582_v59 }
0x1540   :  { %7585 = vmatpush1.bf16.msra.mxu0 %v7584_v1 }
0x1541   :  { %7593 = vmatprep.subr.bf16.mxu0 %v7578_v25 }
0x1543   :  { %6264 = vmatmul.mubr.msk.f32.vlgmr.msra.gmra.mrb[46].mxu0 %vm302_vm4, %v8148_v43 }
0x1544   :  { %7595 = vmatpush1.bf16.msra.mxu0 %v7580_v46  ;;  %4386 = vmatprep.mubr.f32.mxu0 %v8544_v49 }
0x1545   :  { %7597 = vmatprep.subr.bf16.mxu0 %v7582_v59 }
0x1548   :  { %7599 = vmatpush1.bf16.msra.mxu0 %v7584_v1 }
0x1549   :  { %7606 = vmatprep.subr.bf16.mxu0 %v7909_v3 }
0x154b   :  { %6266 = vmatmul.mubr.msk.f32.vlgmr.msra.gmra.mrb[48].mxu0 %vm302_vm4, %v8161_v48  ;;  %v6246_v48 = vld [vmem:[%s9469_s15 + $0x1] ss:$0 sm:$0xff] }
0x154c   :  { %7608 = vmatpush3.bf16.msra.mxu0 %v8179_v51  ;;  %7193 = vmatprep.mubr.msk.f32.mxu0 %vm7911_vm0, %v8544_v49 }
0x154d   :  { %7609 = vmatprep.subr.bf16.mxu0 %v7909_v3 }
0x1550   :  { %7611 = vmatpush3.bf16.msra.mxu0 %v8191_v54 }
0x1551   :  { %7612 = vmatprep.subr.bf16.mxu0 %v7909_v3 }
0x155d   :  { %v4033_v43 = vpop.xlane.xlu0 %4032 }
0x155e   :  { %v4034_v47 = vmul.f32 0.03125, %v4033_v43 }
0x1560   :  { %v4035_v53 = vadd.f32 1e-05, %v4034_v47 }
0x1562   :  { %7857 = vrsqrt.f32 %v4035_v53 }
0x156c   :  { %v7858_v41 = vpop.eup %7857 }
0x156d   :  { %v4037_v63 = vmul.f32 %v7858_v41, %v4029_v22 }
0x156f   :  { %v4044_v16 = vmul.f32 %v6246_v48, %v4037_v63 }
0x1571   :  { %v8801_v4 = vadd.f32 %v6247_v14, %v4044_v16  ;;  %v6268_v16 = vld [vmem:[%s9467_s13 + $0x28] sm:$0xff] }
0x1573   :  { %7161 = vmatmul.mubr.msk.f32.vlgmr.msra.gmra.mrb[50].mxu1 %vm302_vm4, %v8801_v4 }
0x1574   :  { %7588 = vmatpush3.bf16.msra.mxu1 %v7573_v31  ;;  %7171 = vmatprep.mubr.msk.f32.mxu1 %vm7911_vm0, %v8544_v49 }
0x1575   :  { %7589 = vmatprep.subr.bf16.mxu1 %v7909_v3 }
0x1578   :  { %7591 = vmatpush3.bf16.msra.mxu1 %v7576_v34 }
0x1579   :  { %7600 = vmatprep.subr.bf16.mxu1 %v7909_v3 }
0x160e   :  { %v4016_v5 = vpop.f32.mrb[44].mxu0 }
0x160f   :  { %v4017_v6 = vadd.f32 %v8726_v2, %v4016_v5  ;;  %v7151_v38 = vpop.f32.mrb[45].mxu0 }
0x1610   :  { %v6270_v38 = vld [vmem:[%s9467_s13 + $0x38] sm:$0xff] }
0x1611   :  { %v4052_v10 = vadd.f32 %v4017_v6, %v8623_v62  ;;  %v6262_v62 = vld [vmem:[%s9524_s6 + $0x1] ss:$0 sm:$0xff]  ;;  %v6269_v6 = vld [vmem:[%s9467_s13 + $0x30] sm:$0xff] }
0x1612   :  { %v7616_v8 = vpack.c.bf16 %v6270_v38, %v6269_v6  ;;  %v6297_v6 = vld [vmem:[%s9477_s23 + $0x48] sm:$0xff]  ;;  %v6298_v38 = vld [vmem:[%s9477_s23 + $0x50] sm:$0xff] }
0x1613   :  { %v4053_v11 = vsel %vm302_vm4, %v4052_v10, 0.0 }
0x1614   :  { %4054 = vadd.xlane.f32.xlu1 %v4053_v11 }
0x1616   :  { %v4243_v57 = vpop.f32.mrb[46].mxu0 }
0x1617   :  { %v8817_v15 = vadd.f32 %v4243_v57, %v4170_v12  ;;  %v4245_v18 = vpop.f32.mrb[47].mxu0 }
0x1618   :  { %v8819_v19 = vadd.f32 %v4245_v18, %v4174_v13 }
0x161e   :  { %v4388_v2 = vpop.f32.mrb[48].mxu0 }
0x161f   :  { %v4390_v20 = vpop.f32.mrb[49].mxu0  ;;  %v8826_v24 = vadd.f32 %v4388_v2, %v4170_v12 }
0x1620   :  { %v8821_v21 = vadd.f32 %v4390_v20, %v4174_v13 }
0x1646   :  { %v4161_v23 = vpop.f32.mrb[50].mxu1 }
0x1647   :  { %v4162_v0 = vadd.f32 %v6262_v62, %v4161_v23  ;;  %v7162_v56 = vpop.f32.mrb[51].mxu1 }
0x1649   :  { %v4165_v58 = vmul.f32 0.35355338, %v4162_v0 }
0x164b   :  { %v4474_v25 = vmul.f32 %v8826_v24, %v4165_v58  ;;  %v4400_v39 = vmul.f32 %v8817_v15, %v4165_v58 }
0x164d   :  { %7194 = vmatmul.mubr.msk.f32.vlgmr.msra.gmra.mrb[50].mxu0 %vm302_vm4, %v4474_v25 }
0x164e   :  { %7214 = vmatprep.mubr.msk.f32.mxu0 %vm7911_vm0, %v8544_v49 }
0x16a1   :  { %v4055_v26 = vpop.xlane.xlu1 %4054 }
0x16a2   :  { %v4056_v27 = vmul.f32 0.03125, %v4055_v26 }
0x16a4   :  { %v4057_v22 = vsub.f32 %v4052_v10, %v4056_v27 }
0x16a6   :  { %v4058_v28 = vmul.f32 %v4057_v22, %v4057_v22 }
0x16a8   :  { %v4059_v29 = vsel %vm302_vm4, %v4058_v28, 0.0 }
0x16a9   :  { %4060 = vadd.xlane.f32.xlu0 %v4059_v29 }
0x1720   :  { %v4544_v7 = vpop.f32.mrb[50].mxu0 }
0x1721   :  { %v7195_v30 = vpop.f32.mrb[51].mxu0 }
0x1736   :  { %v4061_v31 = vpop.xlane.xlu0 %4060 }
0x1737   :  { %v4062_v32 = vmul.f32 0.03125, %v4061_v31 }
0x1739   :  { %v4063_v33 = vadd.f32 1e-05, %v4062_v32 }
0x173b   :  { %7859 = vrsqrt.f32 %v4063_v33 }
0x1745   :  { %v7860_v34 = vpop.eup %7859 }
0x1746   :  { %v4065_v35 = vmul.f32 %v7860_v34, %v4057_v22 }
0x1748   :  { %v4066_v36 = vmul.f32 %v6246_v48, %v4065_v35 }
0x174a   :  { %v8833_v37 = vadd.f32 %v6247_v14, %v4066_v36  ;;  %v6267_v14 = vld [vmem:[%s9467_s13 + $0x20] sm:$0xff]  ;;  %s9527_s13 = sld [smem:[#allocation20_spill]] }
0x174b   :  { %v7613_v5 = vpack.c.bf16 %v6268_v16, %v6267_v14 }
0x174c   :  { %7172 = vmatmul.mubr.msk.f32.vlgmr.msra.gmra.mrb[52].mxu1 %vm302_vm4, %v8833_v37 }
0x174d   :  { %7602 = vmatpush3.bf16.msra.mxu1 %v8179_v51  ;;  %7182 = vmatprep.mubr.msk.f32.mxu1 %vm7911_vm0, %v8544_v49 }
0x174e   :  { %7603 = vmatprep.subr.bf16.mxu1 %v7909_v3  ;;  %7614 = vmatpush3.bf16.msra.mxu0 %v7613_v5 }
0x174f   :  { %7615 = vmatprep.subr.bf16.mxu0 %v7909_v3 }
0x1751   :  { %7605 = vmatpush3.bf16.msra.mxu1 %v8191_v54 }
0x1752   :  { %7196 = vmatprep.subr.mxu1 %v8544_v49  ;;  %7617 = vmatpush3.bf16.msra.mxu0 %v7616_v8 }
0x1753   :  { %7624 = vmatprep.subr.bf16.mxu0 %v7909_v3 }
0x1754   :  { %7183 = vmatmul.mubr.msk.f32.vlgmr.msra.gmra.mrb[54].mxu1 %vm302_vm4, %v4400_v39 }
0x1755   :  { %7197 = vmatpush3.msk.msra.mxu1 %vm760_vm5, %v8656_v9  ;;  %7198 = vmatprep.mubr.msk.f32.mxu1 %vm7911_vm0, %v8544_v49 }
0x1756   :  { %7201 = vmatprep.subr.mxu1 %v8544_v49 }
0x181f   :  { %v4317_v40 = vpop.f32.mrb[52].mxu1 }
0x1820   :  { %v7173_v42 = vpop.f32.mrb[53].mxu1  ;;  %v4318_v41 = vadd.f32 %v6262_v62, %v4317_v40 }
0x1821   :  { %v6292_v42 = vld [vmem:[%s9475_s21 + $0x28] sm:$0xff] }
0x1822   :  { %v4321_v48 = vmul.f32 0.35355338, %v4318_v41 }
0x1824   :  { %v4787_v63 = vmul.f32 %v4321_v48, %v8817_v15  ;;  %v4861_v62 = vmul.f32 %v8826_v24, %v4321_v48 }
0x1827   :  { %v4470_v44 = vpop.f32.mrb[54].mxu1 }
0x1828   :  { %v4548_v45 = vmax.f32 %v4470_v44, %v4544_v7  ;;  %v7184_v50 = vpop.f32.mrb[55].mxu1 }
0x1829   :  { %v6294_v50 = vld [vmem:[%s9475_s21 + $0x38] sm:$0xff] }
0x182a   :  { %v4549_v52 = vsub.f32 %v4470_v44, %v4548_v45  ;;  %v4552_v46 = vsub.f32 %v4544_v7, %v4548_v45  ;;  %v6293_v45 = vld [vmem:[%s9475_s21 + $0x30] sm:$0xff] }
0x182c   :  { %v4550_v17 = vmul.f32 1.442695, %v4549_v52  ;;  %v4553_v59 = vmul.f32 1.442695, %v4552_v46  ;;  %v7640_v52 = vpack.c.bf16 %v6294_v50, %v6293_v45 }
0x182e   :  { %7861 = vpow2.f32 %v4550_v17 }
0x182f   :  { %7863 = vpow2.f32 %v4553_v59 }
0x1838   :  { %v7862_v60 = vpop.eup %7861 }
0x1839   :  { %v7864_v61 = vpop.eup %7863 }
0x183a   :  { %v4555_v1 = vadd.f32 %v7864_v61, %v7862_v60 }
0x183c   :  { %7865 = vrcp.f32 %v4555_v1 }
0x1846   :  { %v7866_v43 = vpop.eup %7865 }
0x1847   :  { %v4557_v47 = vmul.f32 %v7866_v43, %v7862_v60  ;;  %v4632_v53 = vmul.f32 %v7866_v43, %v7864_v61 }
0x1849   :  { %7199 = vmatmul.mubr.msk.f32.vlgmr.msra.gmra.mrb[56].mxu1 %vm756_vm6, %v4557_v47 }
0x184a   :  { %7202 = vmatpush3.msk.msra.mxu1 %vm760_vm5, %v8656_v9  ;;  %7203 = vmatprep.mubr.msk.f32.mxu1 %vm7911_vm0, %v8544_v49 }
0x184b   :  { %7618 = vmatprep.subr.bf16.mxu1 %v7909_v3 }
0x184d   :  { %7204 = vmatmul.mubr.msk.f32.vlgmr.msra.gmra.mrb[58].mxu1 %vm756_vm6, %v4632_v53 }
0x184e   :  { %7620 = vmatpush3.bf16.msra.mxu1 %v8179_v51  ;;  %7225 = vmatprep.mubr.msk.f32.mxu1 %vm7911_vm0, %v8544_v49 }
0x184f   :  { %7621 = vmatprep.subr.bf16.mxu1 %v7909_v3 }
0x1852   :  { %7623 = vmatpush3.bf16.msra.mxu1 %v8191_v54 }
0x1853   :  { %7239 = vmatprep.subr.mxu1 %v8544_v49 }
0x1855   :  { %7226 = vmatmul.mubr.msk.f32.vlgmr.msra.gmra.mrb[60].mxu1 %vm302_vm4, %v4787_v63  ;;  %v6289_v63 = vld [vmem:[%s9471_s17 + $0x1] ss:$0 sm:$0xff] }
0x1856   :  { %7240 = vmatpush3.msk.msra.mxu1 %vm760_vm5, %v8656_v9  ;;  %7241 = vmatprep.mubr.msk.f32.mxu1 %vm7911_vm0, %v8544_v49 }
0x1857   :  { %7244 = vmatprep.subr.mxu1 %v8544_v49 }
0x191c   :  { %v4627_v10 = vpop.f32.mrb[56].mxu1 }
0x191d   :  { %v7200_v11 = vpop.f32.mrb[57].mxu1  ;;  %v4631_v13 = vmul.f32 %v4627_v10, %v8819_v19 }
0x191e   :  { %v6300_v11 = vld [vmem:[%s9477_s23 + $0x60] sm:$0xff] }
0x1920   :  { %v4702_v12 = vpop.f32.mrb[58].mxu1 }
0x1921   :  { %v4706_v57 = vmul.f32 %v4702_v12, %v8821_v21  ;;  %v7205_v15 = vpop.f32.mrb[59].mxu1  ;;  %v6301_v12 = vld [vmem:[%s9477_s23 + $0x68] sm:$0xff] }
0x1922   :  { %v6303_v15 = vld [vmem:[%s9477_s23 + $0x78] sm:$0xff] }
0x1923   :  { %v4707_v18 = vadd.f32 %v4706_v57, %v4631_v13  ;;  %v7649_v13 = vpack.c.bf16 %v6301_v12, %v6300_v11  ;;  %v6302_v57 = vld [vmem:[%s9477_s23 + $0x70] sm:$0xff] }
0x1925   :  { %7215 = vmatmul.mubr.msk.f32.vlgmr.msra.gmra.mrb[52].mxu0 %vm302_vm4, %v4707_v18  ;;  %v7652_v18 = vpack.c.bf16 %v6303_v15, %v6302_v57 }
0x1926   :  { %7626 = vmatpush3.bf16.msra.mxu0 %v8179_v51  ;;  %7236 = vmatprep.mubr.msk.f32.mxu0 %vm7911_vm0, %v8544_v49  ;;  %v8902_v51 = vld [vmem:[%s9468_s14 + $0x1] ss:$0 sm:$0xff] }
0x1927   :  { %7627 = vmatprep.subr.bf16.mxu0 %v7909_v3 }
0x1928   :  { %v4857_v2 = vpop.f32.mrb[60].mxu1 }
0x1929   :  { %v7227_v20 = vpop.f32.mrb[61].mxu1 }
0x192a   :  { %7629 = vmatpush3.bf16.msra.mxu0 %v8191_v54 }
0x192b   :  { %7630 = vmatprep.subr.bf16.mxu0 %v7909_v3 }
0x192d   :  { %7237 = vmatmul.mubr.msk.f32.vlgmr.msra.gmra.mrb[54].mxu0 %vm302_vm4, %v4861_v62 }
0x192e   :  { %7632 = vmatpush3.bf16.msra.mxu0 %v7613_v5  ;;  %7257 = vmatprep.mubr.msk.f32.mxu0 %vm7911_vm0, %v8544_v49  ;;  %v6296_v5 = vld [vmem:[%s9477_s23 + $0x40] sm:$0xff] }
0x192f   :  { %7633 = vmatprep.subr.bf16.mxu0 %v7909_v3 }
0x1932   :  { %7635 = vmatpush3.bf16.msra.mxu0 %v7616_v8  ;;  %v7643_v8 = vpack.c.bf16 %v6297_v6, %v6296_v5 }
0x1933   :  { %7642 = vmatprep.subr.bf16.mxu0 %v7909_v3 }
0x19f8   :  { %v4783_v54 = vpop.f32.mrb[52].mxu0 }
0x19f9   :  { %v4784_v23 = vadd.f32 %v8902_v51, %v4783_v54  ;;  %v7216_v0 = vpop.f32.mrb[53].mxu0 }
0x19fa   :  { %v6305_v0 = vld [vmem:[%s9476_s22 + $0x1] ss:$0 sm:$0xff] }
0x19fb   :  { %v5172_v56 = vadd.f32 %v4784_v23, %v8801_v4 }
0x19fd   :  { %v5173_v24 = vsel %vm302_vm4, %v5172_v56, 0.0 }
0x19fe   :  { %5174 = vadd.xlane.f32.xlu1 %v5173_v24 }
0x1a00   :  { %v4931_v58 = vpop.f32.mrb[54].mxu0 }
0x1a01   :  { %v4935_v25 = vmax.f32 %v4857_v2, %v4931_v58  ;;  %v7238_v26 = vpop.f32.mrb[55].mxu0 }
0x1a03   :  { %v4936_v27 = vsub.f32 %v4857_v2, %v4935_v25  ;;  %v4939_v22 = vsub.f32 %v4931_v58, %v4935_v25 }
0x1a05   :  { %v4937_v28 = vmul.f32 1.442695, %v4936_v27  ;;  %v4940_v29 = vmul.f32 1.442695, %v4939_v22 }
0x1a07   :  { %7867 = vpow2.f32 %v4937_v28 }
0x1a08   :  { %7869 = vpow2.f32 %v4940_v29 }
0x1a11   :  { %v7868_v7 = vpop.eup %7867 }
0x1a12   :  { %v7870_v30 = vpop.eup %7869 }
0x1a13   :  { %v4942_v31 = vadd.f32 %v7870_v30, %v7868_v7 }
0x1a15   :  { %7871 = vrcp.f32 %v4942_v31 }
0x1a1f   :  { %v7872_v32 = vpop.eup %7871 }
0x1a20   :  { %v4944_v33 = vmul.f32 %v7872_v32, %v7868_v7  ;;  %v5019_v34 = vmul.f32 %v7872_v32, %v7870_v30 }
0x1a22   :  { %7242 = vmatmul.mubr.msk.f32.vlgmr.msra.gmra.mrb[62].mxu1 %vm756_vm6, %v4944_v33 }
0x1a23   :  { %7245 = vmatpush3.msk.msra.mxu1 %vm760_vm5, %v8656_v9  ;;  %7246 = vmatprep.mubr.msk.f32.mxu1 %vm7911_vm0, %v8544_v49  ;;  %v6291_v9 = vld [vmem:[%s9475_s21 + $0x20] sm:$0xff] }
0x1a24   :  { %7636 = vmatprep.subr.bf16.mxu1 %v7909_v3  ;;  %v7637_v44 = vpack.c.bf16 %v6292_v42, %v6291_v9  ;;  %v7883_v9 = vld [vmem:[#allocation2] sm:$0xff] }
0x1a26   :  { %7247 = vmatmul.mubr.msk.f32.vlgmr.msra.gmra.mrb[64].mxu1 %vm756_vm6, %v5019_v34 }
0x1a27   :  { %7268 = vmatprep.mubr.msk.f32.mxu1 %vm7911_vm0, %v8544_v49  ;;  %7638 = vmatpush3.bf16.msra.mxu1 %v7637_v44 }
0x1a28   :  { %7639 = vmatprep.subr.bf16.mxu1 %v7909_v3 }
0x1a2b   :  { %7641 = vmatpush3.bf16.msra.mxu1 %v7640_v52 }
0x1a2c   :  { %7654 = vmatprep.subr.bf16.mxu1 %v7909_v3 }
0x1a8b   :  { %v5175_v4 = vpop.xlane.xlu1 %5174 }
0x1a8c   :  { %v5176_v35 = vmul.f32 0.03125, %v5175_v4 }
0x1a8e   :  { %v5177_v36 = vsub.f32 %v5172_v56, %v5176_v35 }
0x1a90   :  { %v5178_v39 = vmul.f32 %v5177_v36, %v5177_v36 }
0x1a92   :  { %v5179_v40 = vsel %vm302_vm4, %v5178_v39, 0.0 }
0x1a93   :  { %5180 = vadd.xlane.f32.xlu1 %v5179_v40 }
0x1af5   :  { %v5014_v46 = vpop.f32.mrb[62].mxu1 }
0x1af6   :  { %v7243_v17 = vpop.f32.mrb[63].mxu1  ;;  %v5018_v60 = vmul.f32 %v5014_v46, %v8819_v19  ;;  %v6290_v19 = vld [vmem:[%s9472_s18 + $0x1] ss:$0 sm:$0xff] }
0x1af9   :  { %v5089_v59 = vpop.f32.mrb[64].mxu1 }
0x1afa   :  { %v5093_v61 = vmul.f32 %v5089_v59, %v8821_v21  ;;  %v7248_v1 = vpop.f32.mrb[65].mxu1 }
0x1afc   :  { %v5094_v43 = vadd.f32 %v5093_v61, %v5018_v60 }
0x1afe   :  { %7258 = vmatmul.mubr.msk.f32.vlgmr.msra.gmra.mrb[56].mxu0 %vm302_vm4, %v5094_v43 }
0x1aff   :  { %7287 = vmatprep.mubr.msk.f32.mxu0 %vm7911_vm0, %v8544_v49  ;;  %7644 = vmatpush3.bf16.msra.mxu0 %v7643_v8 }
0x1b00   :  { %7645 = vmatprep.subr.bf16.mxu0 %v7909_v3 }
0x1b20   :  { %v5181_v47 = vpop.xlane.xlu1 %5180 }
0x1b21   :  { %v5182_v53 = vmul.f32 0.03125, %v5181_v47  ;;  %v7912_v47 = vmov 1983009808  }
0x1b23   :  { %v5183_v41 = vadd.f32 1e-05, %v5182_v53 }
0x1b25   :  { %7873 = vrsqrt.f32 %v5183_v41 }
0x1b2f   :  { %v7874_v48 = vpop.eup %7873 }
0x1b30   :  { %v5185_v14 = vmul.f32 %v7874_v48, %v5177_v36  ;;  %v8999_v48 = vld [vmem:[%s9473_s19 + $0x1] ss:$0 sm:$0xff] }
0x1b32   :  { %v5192_v21 = vmul.f32 %v6289_v63, %v5185_v14  ;;  %v9004_v14 = vld [vmem:[%s9525_s29 + $0x1] ss:$0 sm:$0xff] }
0x1b34   :  { %v5199_v16 = vadd.f32 %v6290_v19, %v5192_v21 }
0x1b36   :  { %7269 = vmatmul.mubr.msk.f32.vlgmr.msra.gmra.mrb[66].mxu1 %vm302_vm4, %v5199_v16 }
0x1b37   :  { %7656 = vmatpush3.bf16.msra.mxu1 %v7637_v44  ;;  %7298 = vmatprep.mubr.msk.f32.mxu1 %vm7911_vm0, %v8544_v49  ;;  %v6299_v49 = vld [vmem:[%s9477_s23 + $0x58] sm:$0xff] }
0x1b38   :  { %7657 = vmatprep.subr.bf16.mxu1 %v7909_v3  ;;  %v7646_v10 = vpack.c.bf16 %v6299_v49, %v6298_v38 }
0x1b3a   :  { %7647 = vmatpush3.bf16.msra.mxu0 %v7646_v10 }
0x1b3b   :  { %7659 = vmatpush3.bf16.msra.mxu1 %v7640_v52  ;;  %7648 = vmatprep.subr.bf16.mxu0 %v7909_v3 }
0x1b3c   :  { %7660 = vmatprep.subr.bf16.mxu1 %v7909_v3 }
0x1b3e   :  { %7650 = vmatpush3.bf16.msra.mxu0 %v7649_v13 }
0x1b3f   :  { %7651 = vmatprep.subr.bf16.mxu0 %v7909_v3 }
0x1b42   :  { %7653 = vmatpush3.bf16.msra.mxu0 %v7652_v18 }
0x1bd1   :  { %v5164_v2 = vpop.f32.mrb[56].mxu0 }
0x1bd2   :  { %v5165_v20 = vadd.f32 %v8902_v51, %v5164_v2  ;;  %v7259_v62 = vpop.f32.mrb[57].mxu0 }
0x1bd4   :  { %v5200_v54 = vadd.f32 %v5165_v20, %v8833_v37  ;;  %v8985_v37 = vld [vmem:[%s9478_s24 + $0x1] ss:$0 sm:$0xff] }
0x1bd6   :  { %v5201_v23 = vsel %vm302_vm4, %v5200_v54, 0.0 }
0x1bd7   :  { %5202 = vadd.xlane.f32.xlu0 %v5201_v23 }
0x1c09   :  { %v5309_v56 = vpop.f32.mrb[66].mxu1 }
0x1c0a   :  { %v5310_v24 = vadd.f32 %v6305_v0, %v5309_v56  ;;  %v7270_v58 = vpop.f32.mrb[67].mxu1  ;;  %v5691_v56 = vld [vmem:[%s9526_s30 + $0x80] sm:$0xff] }
0x1c0c   :  { %v5313_v25 = vmax.f32 %v5310_v24, 0.0  ;;  %v5692_v24 = vld [vmem:[%s9526_s30 + $0x88] sm:$0xff] }
0x1c0d   :  { %v7672_v58 = vpack.c.bf16 %v5692_v24, %v5691_v56  ;;  %v5701_v56 = vld [vmem:[%s9526_s30 + $0xd0] sm:$0xff]  ;;  %v5702_v24 = vld [vmem:[%s9526_s30 + $0xd8] sm:$0xff] }
0x1c0e   :  { %7288 = vmatmul.mubr.msk.f32.vlgmr.msra.gmra.mrb[58].mxu0 %vm114_vm1, %v5313_v25  ;;  %v5675_v25 = vld [vmem:[%s9526_s30] sm:$0xff] }
0x1c0f   :  { %7673 = vmatprep.subr.bf16.mxu0 %v7672_v58  ;;  %v7692_v58 = vpack.c.bf16 %v5702_v24, %v5701_v56  ;;  %v5771_v56 = vld [vmem:[%s9526_s30 + $0x300] sm:$0xff]  ;;  %v5772_v24 = vld [vmem:[%s9526_s30 + $0x308] sm:$0xff] }
0x1c64   :  { %v5203_v26 = vpop.xlane.xlu0 %5202 }
0x1c65   :  { %v5204_v27 = vmul.f32 0.03125, %v5203_v26  ;;  %v5676_v26 = vld [vmem:[%s9526_s30 + $0x8] sm:$0xff] }
0x1c67   :  { %v5205_v22 = vsub.f32 %v5200_v54, %v5204_v27  ;;  %v7674_v27 = vpack.c.bf16 %v5676_v26, %v5675_v25  ;;  %v5685_v25 = vld [vmem:[%s9526_s30 + $0x50] sm:$0xff]  ;;  %v5686_v26 = vld [vmem:[%s9526_s30 + $0x58] sm:$0xff] }
0x1c69   :  { %v5206_v51 = vmul.f32 %v5205_v22, %v5205_v22  ;;  %7675 = vmatpush3.bf16.msra.mxu0 %v7674_v27  ;;  %v7694_v27 = vpack.c.bf16 %v5686_v26, %v5685_v25  ;;  %v5757_v26 = vld [vmem:[%s9526_s30 + $0x290] sm:$0xff] }
0x1c6b   :  { %v5207_v28 = vsel %vm302_vm4, %v5206_v51, 0.0  ;;  %v5724_v51 = vld [vmem:[%s9526_s30 + $0x188] sm:$0xff] }
0x1c6c   :  { %5208 = vadd.xlane.f32.xlu0 %v5207_v28 }
0x1ce1   :  { %v5389_v29 = vpop.f32.mrb[58].mxu0 }
0x1ce2   :  { %v5390_v7 = vadd.f32 %v8985_v37, %v5389_v29  ;;  %v7289_v30 = vpop.f32.mrb[59].mxu0  ;;  %v5708_v29 = vld [vmem:[%s9526_s30 + $0x108] sm:$0xff] }
0x1ce3   :  { %v5693_v30 = vld [vmem:[%s9526_s30 + $0x90] sm:$0xff] }
0x1ce4   :  { %v5544_v31 = vadd.f32 %v5390_v7, %v5199_v16 }
0x1ce6   :  { %v5545_v32 = vsel %vm302_vm4, %v5544_v31, 0.0 }
0x1ce7   :  { %5546 = vadd.xlane.f32.xlu1 %v5545_v32 }
0x1cf9   :  { %v5209_v33 = vpop.xlane.xlu0 %5208 }
0x1cfa   :  { %v5210_v34 = vmul.f32 0.03125, %v5209_v33  ;;  %v5677_v33 = vld [vmem:[%s9526_s30 + $0x10] sm:$0xff] }
0x1cfc   :  { %v5211_v4 = vadd.f32 1e-05, %v5210_v34  ;;  %v5678_v34 = vld [vmem:[%s9526_s30 + $0x18] sm:$0xff] }
0x1cfe   :  { %7875 = vrsqrt.f32 %v5211_v4  ;;  %v7678_v4 = vpack.c.bf16 %v5678_v34, %v5677_v33  ;;  %v5687_v33 = vld [vmem:[%s9526_s30 + $0x60] sm:$0xff]  ;;  %v5688_v34 = vld [vmem:[%s9526_s30 + $0x68] sm:$0xff] }
0x1d08   :  { %v7876_v35 = vpop.eup %7875 }
0x1d09   :  { %v5213_v36 = vmul.f32 %v7876_v35, %v5205_v22  ;;  %v5723_v22 = vld [vmem:[%s9526_s30 + $0x180] sm:$0xff]  ;;  %v5725_v35 = vld [vmem:[%s9526_s30 + $0x190] sm:$0xff] }
0x1d0a   :  { %v7704_v28 = vpack.c.bf16 %v5724_v51, %v5723_v22  ;;  %v5733_v22 = vld [vmem:[%s9526_s30 + $0x1d0] sm:$0xff]  ;;  %v5734_v51 = vld [vmem:[%s9526_s30 + $0x1d8] sm:$0xff] }
0x1d0b   :  { %v5214_v39 = vmul.f32 %v6289_v63, %v5213_v36  ;;  %v5726_v36 = vld [vmem:[%s9526_s30 + $0x198] sm:$0xff] }
0x1d0d   :  { %v5215_v40 = vadd.f32 %v6290_v19, %v5214_v39  ;;  %v7708_v39 = vpack.c.bf16 %v5726_v36, %v5725_v35  ;;  %v7698_v35 = vpack.c.bf16 %v5688_v34, %v5687_v33  ;;  %v5736_v36 = vld [vmem:[%s9526_s30 + $0x1e8] sm:$0xff] }
0x1d0f   :  { %7299 = vmatmul.mubr.msk.f32.vlgmr.msra.gmra.mrb[68].mxu1 %vm302_vm4, %v5215_v40 }
0x1d10   :  { %7662 = vmatpush3.bf16.msra.mxu1 %v7643_v8  ;;  %7317 = vmatprep.mubr.msk.f32.mxu1 %vm7911_vm0, %v7883_v9  ;;  %v5710_v9 = vld [vmem:[%s9526_s30 + $0x118] sm:$0xff] }
0x1d11   :  { %7663 = vmatprep.subr.bf16.mxu1 %v7909_v3 }
0x1d14   :  { %7665 = vmatpush3.bf16.msra.mxu1 %v7646_v10 }
0x1d15   :  { %7666 = vmatprep.subr.bf16.mxu1 %v7909_v3 }
0x1d18   :  { %7668 = vmatpush3.bf16.msra.mxu1 %v7649_v13 }
0x1d19   :  { %7669 = vmatprep.subr.bf16.mxu1 %v7909_v3  ;;  %v5594_v3 = vunpack.c.l.s4 %v7912_v47 }
0x1d1b   :  { %v5595_v53 = vunpack.c.0.s8 %v5594_v3  ;;  %v5697_v3 = vld [vmem:[%s9526_s30 + $0xb0] sm:$0xff] }
0x1d1c   :  { %7671 = vmatpush3.bf16.msra.mxu1 %v7652_v18 }
0x1d1d   :  { %v9007_v19 = vsub.s32 %v5595_v53, %v8198_v55  ;;  %7705 = vmatprep.subr.bf16.mxu1 %v7704_v28  ;;  %v5698_v53 = vld [vmem:[%s9526_s30 + $0xb8] sm:$0xff]  ;;  %v7724_v28 = vpack.c.bf16 %v5734_v51, %v5733_v22 }
0x1d74   :  { %v5547_v42 = vpop.xlane.xlu1 %5546 }
0x1d75   :  { %v5548_v44 = vmul.f32 0.03125, %v5547_v42 }
0x1d77   :  { %v5549_v45 = vsub.f32 %v5544_v31, %v5548_v44  ;;  %v5694_v31 = vld [vmem:[%s9526_s30 + $0x98] sm:$0xff]  ;;  %v5695_v44 = vld [vmem:[%s9526_s30 + $0xa0] sm:$0xff] }
0x1d78   :  { %v7676_v32 = vpack.c.bf16 %v5694_v31, %v5693_v30  ;;  %v5703_v30 = vld [vmem:[%s9526_s30 + $0xe0] sm:$0xff]  ;;  %v5704_v31 = vld [vmem:[%s9526_s30 + $0xe8] sm:$0xff] }
0x1d79   :  { %v5550_v50 = vmul.f32 %v5549_v45, %v5549_v45 }
0x1d7a   :  { %7677 = vmatprep.subr.bf16.mxu0 %v7676_v32  ;;  %v7696_v32 = vpack.c.bf16 %v5704_v31, %v5703_v30  ;;  %v7770_v30 = vpack.c.bf16 %v5772_v24, %v5771_v56  ;;  %v5741_v31 = vld [vmem:[%s9526_s30 + $0x210] sm:$0xff] }
0x1d7b   :  { %v5551_v52 = vsel %vm302_vm4, %v5550_v50, 0.0  ;;  %7679 = vmatpush3.bf16.msra.mxu0 %v7678_v4  ;;  %v5735_v4 = vld [vmem:[%s9526_s30 + $0x1e0] sm:$0xff]  ;;  %v5749_v24 = vld [vmem:[%s9526_s30 + $0x250] sm:$0xff] }
0x1d7c   :  { %5552 = vadd.xlane.f32.xlu1 %v5551_v52  ;;  %v5679_v52 = vld [vmem:[%s9526_s30 + $0x20] sm:$0xff] }
0x1de2   :  { %v5462_v46 = vpop.f32.mrb[68].mxu1 }
0x1de3   :  { %v5463_v17 = vadd.f32 %v6305_v0, %v5462_v46  ;;  %v7300_v59 = vpop.f32.mrb[69].mxu1  ;;  %v5680_v46 = vld [vmem:[%s9526_s30 + $0x28] sm:$0xff] }
0x1de4   :  { %v5727_v59 = vld [vmem:[%s9526_s30 + $0x1a0] sm:$0xff] }
0x1de5   :  { %v5466_v60 = vmax.f32 %v5463_v17, 0.0  ;;  %v7682_v17 = vpack.c.bf16 %v5680_v46, %v5679_v52  ;;  %v5690_v46 = vld [vmem:[%s9526_s30 + $0x78] sm:$0xff] }
0x1de7   :  { %7318 = vmatmul.mubr.msk.f32.vlgmr.msra.gmra.mrb[70].mxu1 %vm114_vm1, %v5466_v60  ;;  %v5728_v60 = vld [vmem:[%s9526_s30 + $0x1a8] sm:$0xff] }
0x1e09   :  { %v5553_v61 = vpop.xlane.xlu1 %5552 }
0x1e0a   :  { %v5554_v1 = vmul.f32 0.03125, %v5553_v61  ;;  %v7712_v61 = vpack.c.bf16 %v5728_v60, %v5727_v59  ;;  %v5738_v59 = vld [vmem:[%s9526_s30 + $0x1f8] sm:$0xff] }
0x1e0c   :  { %v5555_v43 = vadd.f32 1e-05, %v5554_v1  ;;  %v5711_v1 = vld [vmem:[%s9526_s30 + $0x120] sm:$0xff] }
0x1e0e   :  { %7877 = vrsqrt.f32 %v5555_v43  ;;  %v5712_v43 = vld [vmem:[%s9526_s30 + $0x128] sm:$0xff] }
0x1e0f   :  { %v7714_v47 = vpack.c.bf16 %v5712_v43, %v5711_v1  ;;  %v5721_v1 = vld [vmem:[%s9526_s30 + $0x170] sm:$0xff]  ;;  %v5722_v43 = vld [vmem:[%s9526_s30 + $0x178] sm:$0xff] }
0x1e18   :  { %v7878_v41 = vpop.eup %7877 }
0x1e19   :  { %v5557_v63 = vmul.f32 %v7878_v41, %v5549_v45  ;;  %v5696_v45 = vld [vmem:[%s9526_s30 + $0xa8] sm:$0xff]  ;;  %v7684_v41 = vpack.c.bf16 %v5698_v53, %v5697_v3  ;;  %v5755_v3 = vld [vmem:[%s9526_s30 + $0x280] sm:$0xff] }
0x1e1a   :  { %v7680_v50 = vpack.c.bf16 %v5696_v45, %v5695_v44  ;;  %v5705_v44 = vld [vmem:[%s9526_s30 + $0xf0] sm:$0xff]  ;;  %v5706_v45 = vld [vmem:[%s9526_s30 + $0xf8] sm:$0xff]  ;;  %v5756_v53 = vld [vmem:[%s9526_s30 + $0x288] sm:$0xff] }
0x1e1b   :  { %v5564_v21 = vmul.f32 %v8999_v48, %v5557_v63  ;;  %v5681_v63 = vld [vmem:[%s9526_s30 + $0x30] sm:$0xff]  ;;  %v7700_v52 = vpack.c.bf16 %v5706_v45, %v5705_v44  ;;  %v5791_v45 = vld [vmem:[%s9526_s30 + $0x3a0] sm:$0xff] }
0x1e1c   :  { %7681 = vmatprep.subr.bf16.mxu0 %v7680_v50  ;;  %v5689_v50 = vld [vmem:[%s9526_s30 + $0x70] sm:$0xff] }
0x1e1d   :  { %v5571_v16 = vadd.f32 %v9004_v14, %v5564_v21  ;;  %7683 = vmatpush3.bf16.msra.mxu0 %v7682_v17  ;;  %v5682_v21 = vld [vmem:[%s9526_s30 + $0x38] sm:$0xff]  ;;  %v5737_v17 = vld [vmem:[%s9526_s30 + $0x1f0] sm:$0xff]  ;;  %v7702_v60 = vpack.c.bf16 %v5690_v46, %v5689_v50  ;;  %v5792_v50 = vld [vmem:[%s9526_s30 + $0x3a8] sm:$0xff] }
0x1e1e   :  { %7685 = vmatprep.subr.bf16.mxu0 %v7684_v41  ;;  %v7736_v41 = vpack.c.bf16 %v5756_v53, %v5755_v3  ;;  %v5743_v46 = vld [vmem:[%s9526_s30 + $0x220] sm:$0xff]  ;;  %v5793_v53 = vld [vmem:[%s9526_s30 + $0x3b0] sm:$0xff] }
0x1e1f   :  { %5591 = vst.msk [vmem:[#allocation2] sm:$0x1] %vm5590_vm7, %v5571_v16  ;;  %v5599_v5 = vrot.slane %v5571_v16, %v9007_v19  ;;  %v5611_v6 = vcombine.high %v5571_v16, %v5571_v16  ;;  %v7686_v16 = vpack.c.bf16 %v5682_v21, %v5681_v63  ;;  %v5787_v63 = vld [vmem:[%s9526_s30 + $0x380] sm:$0xff]  ;;  %v5788_v21 = vld [vmem:[%s9526_s30 + $0x388] sm:$0xff] }
0x1e21   :  { %v6315_v38 = vrot.slane %v5599_v5, 9  ;;  %v5604_v8 = vcombine.high %v5599_v5, %v5599_v5  ;;  %v5618_v49 = vrot.slane %v5611_v6, %v9007_v19  ;;  %v5729_v5 = vld [vmem:[%s9526_s30 + $0x1b0] sm:$0xff]  ;;  %v5730_v6 = vld [vmem:[%s9526_s30 + $0x1b8] sm:$0xff]  ;;  %7687 = vmatpush3.bf16.msra.mxu0 %v7686_v16  ;;  %v7768_v16 = vpack.c.bf16 %v5788_v21, %v5787_v63 }
0x1e22   :  { %v5745_v21 = vld [vmem:[%s9526_s30 + $0x230] sm:$0xff] }
0x1e23   :  { %5603 = vst.msk [vmem:[#allocation2 + $0x2] sm:$0x1] %vm5590_vm7, %v6315_v38  ;;  %5606 = vst.msk [vmem:[#allocation2 + $0x4] sm:$0x1] %vm5590_vm7, %v5604_v8  ;;  %v6316_v55 = vrot.slane %v5604_v8, 9  ;;  %v6317_v10 = vrot.slane %v5618_v49, 9  ;;  %v5625_v11 = vcombine.high %v5618_v49, %v5618_v49  ;;  %v7716_v38 = vpack.c.bf16 %v5730_v6, %v5729_v5 }
0x1e24   :  { %5620 = vst.msk [vmem:[#allocation2 + $0x8] sm:$0x1] %vm5590_vm7, %v5618_v49  ;;  %v5713_v8 = vld [vmem:[%s9526_s30 + $0x130] sm:$0xff]  ;;  %v5714_v49 = vld [vmem:[%s9526_s30 + $0x138] sm:$0xff] }
0x1e25   :  { %5610 = vst.msk [vmem:[#allocation2 + $0x6] sm:$0x1] %vm5590_vm7, %v6316_v55  ;;  %5624 = vst.msk [vmem:[#allocation2 + $0xa] sm:$0x1] %vm5590_vm7, %v6317_v10  ;;  %v6318_v12 = vrot.slane %v5625_v11, 9  ;;  %v7718_v55 = vpack.c.bf16 %v5714_v49, %v5713_v8  ;;  %v5699_v10 = vld [vmem:[%s9526_s30 + $0xc0] sm:$0xff] }
0x1e26   :  { %5627 = vst.msk [vmem:[#allocation2 + $0xc] sm:$0x1] %vm5590_vm7, %v5625_v11  ;;  %v5700_v11 = vld [vmem:[%s9526_s30 + $0xc8] sm:$0xff] }
0x1e27   :  { %5631 = vst.msk [vmem:[#allocation2 + $0xe] sm:$0x1] %vm5590_vm7, %v6318_v12  ;;  %v7688_v12 = vpack.c.bf16 %v5700_v11, %v5699_v10 }
0x1e29   :  { %7689 = vmatprep.subr.bf16.mxu0 %v7688_v12 }
0x1eba   :  { %v5536_v13 = vpop.f32.mrb[70].mxu1 }
0x1ebb   :  { %v5537_v57 = vadd.f32 %v8985_v37, %v5536_v13  ;;  %v7319_v15 = vpop.f32.mrb[71].mxu1  ;;  %v5707_v37 = vld [vmem:[%s9526_s30 + $0x100] sm:$0xff] }
0x1ebc   :  { %v7706_v7 = vpack.c.bf16 %v5708_v29, %v5707_v37  ;;  %v5683_v13 = vld [vmem:[%s9526_s30 + $0x40] sm:$0xff]  ;;  %v5717_v37 = vld [vmem:[%s9526_s30 + $0x150] sm:$0xff]  ;;  %v5718_v29 = vld [vmem:[%s9526_s30 + $0x158] sm:$0xff] }
0x1ebd   :  { %v5572_v18 = vadd.f32 %v5537_v57, %v5215_v40  ;;  %v5709_v40 = vld [vmem:[%s9526_s30 + $0x110] sm:$0xff]  ;;  %v5684_v57 = vld [vmem:[%s9526_s30 + $0x48] sm:$0xff] }
0x1ebe   :  { %7707 = vmatpush3.bf16.msra.mxu1 %v7706_v7  ;;  %v7710_v42 = vpack.c.bf16 %v5710_v9, %v5709_v40  ;;  %v7690_v15 = vpack.c.bf16 %v5684_v57, %v5683_v13  ;;  %v7726_v7 = vpack.c.bf16 %v5718_v29, %v5717_v37  ;;  %v5720_v40 = vld [vmem:[%s9526_s30 + $0x168] sm:$0xff]  ;;  %v7728_v9 = vpack.c.bf16 %v5736_v36, %v5735_v4  ;;  %v5789_v29 = vld [vmem:[%s9526_s30 + $0x390] sm:$0xff]  ;;  %v5759_v36 = vld [vmem:[%s9526_s30 + $0x2a0] sm:$0xff] }
0x1ebf   :  { %v5573_v2 = vsel %vm302_vm4, %v5572_v18, 0.0  ;;  %7709 = vmatprep.subr.bf16.mxu1 %v7708_v39  ;;  %v5719_v39 = vld [vmem:[%s9526_s30 + $0x160] sm:$0xff] }
0x1ec0   :  { %5574 = vadd.xlane.f32.xlu0 %v5573_v2  ;;  %v5732_v2 = vld [vmem:[%s9526_s30 + $0x1c8] sm:$0xff]  ;;  %7691 = vmatpush3.bf16.msra.mxu0 %v7690_v15 }
0x1ec1   :  { %7693 = vmatprep.subr.bf16.mxu0 %v7692_v58 }
0x1ec2   :  { %7711 = vmatpush3.bf16.msra.mxu1 %v7710_v42  ;;  %v7730_v42 = vpack.c.bf16 %v5720_v40, %v5719_v39  ;;  %v5760_v39 = vld [vmem:[%s9526_s30 + $0x2a8] sm:$0xff] }
0x1ec3   :  { %7713 = vmatprep.subr.bf16.mxu1 %v7712_v61  ;;  %v7732_v61 = vpack.c.bf16 %v5738_v59, %v5737_v17  ;;  %v5744_v17 = vld [vmem:[%s9526_s30 + $0x228] sm:$0xff] }
0x1ec4   :  { %7695 = vmatpush3.bf16.msra.mxu0 %v7694_v27  ;;  %v5758_v27 = vld [vmem:[%s9526_s30 + $0x298] sm:$0xff]  ;;  %v7746_v3 = vpack.c.bf16 %v5744_v17, %v5743_v46 }
0x1ec5   :  { %7697 = vmatprep.subr.bf16.mxu0 %v7696_v32  ;;  %v5742_v32 = vld [vmem:[%s9526_s30 + $0x218] sm:$0xff]  ;;  %v7740_v4 = vpack.c.bf16 %v5758_v27, %v5757_v26  ;;  %v5767_v26 = vld [vmem:[%s9526_s30 + $0x2e0] sm:$0xff]  ;;  %v5768_v27 = vld [vmem:[%s9526_s30 + $0x2e8] sm:$0xff] }
0x1ec6   :  { %7715 = vmatpush3.bf16.msra.mxu1 %v7714_v47  ;;  %v7734_v47 = vpack.c.bf16 %v5722_v43, %v5721_v1  ;;  %v7742_v44 = vpack.c.bf16 %v5742_v32, %v5741_v31  ;;  %v7776_v1 = vpack.c.bf16 %v5792_v50, %v5791_v45  ;;  %v5775_v43 = vld [vmem:[%s9526_s30 + $0x320] sm:$0xff]  ;;  %v7760_v31 = vpack.c.bf16 %v5768_v27, %v5767_v26  ;;  %v5753_v50 = vld [vmem:[%s9526_s30 + $0x270] sm:$0xff] }
0x1ec7   :  { %7717 = vmatprep.subr.bf16.mxu1 %v7716_v38  ;;  %v5751_v32 = vld [vmem:[%s9526_s30 + $0x260] sm:$0xff] }
0x1ec8   :  { %7699 = vmatpush3.bf16.msra.mxu0 %v7698_v35 }
0x1ec9   :  { %7701 = vmatprep.subr.bf16.mxu0 %v7700_v52  ;;  %v7744_v52 = vpack.c.bf16 %v5760_v39, %v5759_v36  ;;  %v5770_v36 = vld [vmem:[%s9526_s30 + $0x2f8] sm:$0xff] }
0x1eca   :  { %7719 = vmatpush3.bf16.msra.mxu1 %v7718_v55 }
0x1ecc   :  { %7703 = vmatpush3.bf16.msra.mxu0 %v7702_v60  ;;  %v5761_v60 = vld [vmem:[%s9526_s30 + $0x2b0] sm:$0xff] }
0x1ecd   :  { %7737 = vmatprep.subr.bf16.mxu0 %v7736_v41  ;;  %v5794_v41 = vld [vmem:[%s9526_s30 + $0x3b8] sm:$0xff] }
0x1f4d   :  { %v5575_v20 = vpop.xlane.xlu0 %5574 }
0x1f4e   :  { %v5576_v62 = vmul.f32 0.03125, %v5575_v20 }
0x1f50   :  { %v9023_v54 = vsub.f32 %v5572_v18, %v5576_v62  ;;  %v5731_v18 = vld [vmem:[%s9526_s30 + $0x1c0] sm:$0xff] }
0x1f51   :  { %v7720_v20 = vpack.c.bf16 %v5732_v2, %v5731_v18  ;;  %v5715_v62 = vld [vmem:[%s9526_s30 + $0x140] sm:$0xff] }
0x1f52   :  { %v5578_v23 = vmul.f32 %v9023_v54, %v9023_v54  ;;  %v5739_v2 = vld [vmem:[%s9526_s30 + $0x200] sm:$0xff] }
0x1f53   :  { %7721 = vmatprep.subr.bf16.mxu1 %v7720_v20  ;;  %v5740_v20 = vld [vmem:[%s9526_s30 + $0x208] sm:$0xff] }
0x1f54   :  { %v5579_v0 = vsel %vm302_vm4, %v5578_v23, 0.0  ;;  %v5716_v23 = vld [vmem:[%s9526_s30 + $0x148] sm:$0xff]  ;;  %v7738_v58 = vpack.c.bf16 %v5740_v20, %v5739_v2  ;;  %v5779_v2 = vld [vmem:[%s9526_s30 + $0x340] sm:$0xff] }
0x1f55   :  { %5580 = vadd.xlane.f32.xlu0 %v5579_v0  ;;  %v7722_v0 = vpack.c.bf16 %v5716_v23, %v5715_v62  ;;  %v5780_v20 = vld [vmem:[%s9526_s30 + $0x348] sm:$0xff] }
0x1f57   :  { %7723 = vmatpush3.bf16.msra.mxu1 %v7722_v0 }
0x1f58   :  { %7725 = vmatprep.subr.bf16.mxu1 %v7724_v28 }
0x1f5b   :  { %7727 = vmatpush3.bf16.msra.mxu1 %v7726_v7  ;;  %v5790_v7 = vld [vmem:[%s9526_s30 + $0x398] sm:$0xff] }
0x1f5c   :  { %7729 = vmatprep.subr.bf16.mxu1 %v7728_v9  ;;  %v7772_v40 = vpack.c.bf16 %v5790_v7, %v5789_v29  ;;  %v5773_v9 = vld [vmem:[%s9526_s30 + $0x310] sm:$0xff]  ;;  %v5799_v7 = vld [vmem:[%s9526_s30 + $0x3e0] sm:$0xff] }
0x1f5f   :  { %7731 = vmatpush3.bf16.msra.mxu1 %v7730_v42  ;;  %v5774_v42 = vld [vmem:[%s9526_s30 + $0x318] sm:$0xff] }
0x1f60   :  { %7733 = vmatprep.subr.bf16.mxu1 %v7732_v61  ;;  %v7774_v59 = vpack.c.bf16 %v5774_v42, %v5773_v9  ;;  %v5762_v61 = vld [vmem:[%s9526_s30 + $0x2b8] sm:$0xff]  ;;  %v5784_v9 = vld [vmem:[%s9526_s30 + $0x368] sm:$0xff] }
0x1f61   :  { %v7748_v63 = vpack.c.bf16 %v5762_v61, %v5761_v60  ;;  %v5786_v60 = vld [vmem:[%s9526_s30 + $0x378] sm:$0xff] }
0x1f63   :  { %7735 = vmatpush3.bf16.msra.mxu1 %v7734_v47  ;;  %v5776_v47 = vld [vmem:[%s9526_s30 + $0x328] sm:$0xff] }
0x1f64   :  { %7769 = vmatprep.subr.bf16.mxu1 %v7768_v16  ;;  %v5746_v16 = vld [vmem:[%s9526_s30 + $0x238] sm:$0xff] }
0x1fe2   :  { %v5581_v5 = vpop.xlane.xlu0 %5580 }
0x1fe3   :  { %v5582_v6 = vmul.f32 0.03125, %v5581_v5  ;;  %v7778_v5 = vpack.c.bf16 %v5776_v47, %v5775_v43  ;;  %v6323_v47 = vld [vmem:[%s9527_s13] ss:$0 sm:$0xff] }
0x1fe5   :  { %v5583_v38 = vadd.f32 1e-05, %v5582_v6  ;;  %v5763_v6 = vld [vmem:[%s9526_s30 + $0x2c0] sm:$0xff] }
0x1fe7   :  { %7879 = vrsqrt.f32 %v5583_v38  ;;  %v5764_v38 = vld [vmem:[%s9526_s30 + $0x2c8] sm:$0xff] }
0x1ff1   :  { %v7880_v8 = vpop.eup %7879 }
0x1ff2   :  { %v5585_v49 = vmul.f32 %v7880_v8, %v9023_v54  ;;  %v7780_v8 = vpack.c.bf16 %v5794_v41, %v5793_v53 }
0x1ff4   :  { %v5586_v55 = vmul.f32 %v8999_v48, %v5585_v49  ;;  %v5777_v49 = vld [vmem:[%s9526_s30 + $0x330] sm:$0xff] }
0x1ff6   :  { %v5587_v10 = vadd.f32 %v9004_v14, %v5586_v55  ;;  %v5778_v55 = vld [vmem:[%s9526_s30 + $0x338] sm:$0xff] }
0x1ff8   :  { %5632 = vst.msk [vmem:[#allocation2 + $0x1] sm:$0x1] %vm5590_vm7, %v5587_v10  ;;  %v5640_v11 = vrot.slane %v5587_v10, %v9007_v19  ;;  %v5652_v12 = vcombine.high %v5587_v10, %v5587_v10  ;;  %v7750_v10 = vpack.c.bf16 %v5746_v16, %v5745_v21 }
0x1ffa   :  { %v6319_v13 = vrot.slane %v5640_v11, 9  ;;  %v5645_v57 = vcombine.high %v5640_v11, %v5640_v11  ;;  %v5659_v15 = vrot.slane %v5652_v12, %v9007_v19  ;;  %v5795_v11 = vld [vmem:[%s9526_s30 + $0x3c0] sm:$0xff]  ;;  %v5796_v12 = vld [vmem:[%s9526_s30 + $0x3c8] sm:$0xff] }
0x1ffc   :  { %5644 = vst.msk [vmem:[#allocation2 + $0x3] sm:$0x1] %vm5590_vm7, %v6319_v13  ;;  %5647 = vst.msk [vmem:[#allocation2 + $0x5] sm:$0x1] %vm5590_vm7, %v5645_v57  ;;  %v6320_v18 = vrot.slane %v5645_v57, 9  ;;  %v6321_v54 = vrot.slane %v5659_v15, 9  ;;  %v5666_v48 = vcombine.high %v5659_v15, %v5659_v15  ;;  %v7752_v13 = vpack.c.bf16 %v5764_v38, %v5763_v6 }
0x1ffd   :  { %5661 = vst.msk [vmem:[#allocation2 + $0x9] sm:$0x1] %vm5590_vm7, %v5659_v15  ;;  %v5747_v57 = vld [vmem:[%s9526_s30 + $0x240] sm:$0xff]  ;;  %v5748_v15 = vld [vmem:[%s9526_s30 + $0x248] sm:$0xff] }
0x1ffe   :  { %5651 = vst.msk [vmem:[#allocation2 + $0x7] sm:$0x1] %vm5590_vm7, %v6320_v18  ;;  %5665 = vst.msk [vmem:[#allocation2 + $0xb] sm:$0x1] %vm5590_vm7, %v6321_v54  ;;  %v6322_v14 = vrot.slane %v5666_v48, 9  ;;  %v7782_v18 = vpack.c.bf16 %v5778_v55, %v5777_v49  ;;  %v5765_v54 = vld [vmem:[%s9526_s30 + $0x2d0] sm:$0xff] }
0x1fff   :  { %5668 = vst.msk [vmem:[#allocation2 + $0xd] sm:$0x1] %vm5590_vm7, %v5666_v48  ;;  %v5766_v48 = vld [vmem:[%s9526_s30 + $0x2d8] sm:$0xff] }
0x2000   :  { %5672 = vst.msk [vmem:[#allocation2 + $0xf] sm:$0x1] %vm5590_vm7, %v6322_v14  ;;  %v7784_v14 = vpack.c.bf16 %v5796_v12, %v5795_v11  ;;  %v7756_v56 = vpack.c.bf16 %v5766_v48, %v5765_v54 }
0x2005   :  { %v5673_v62 = vld [vmem:[#allocation2] sm:$0xff] }
0x2006   :  { %v5819_v23 = vrot.slane %v5673_v62, %v9007_v19  ;;  %v5812_v0 = vcombine.high %v5673_v62, %v5673_v62  ;;  %v7754_v62 = vpack.c.bf16 %v5748_v15, %v5747_v57 }
0x2007   :  { %v5674_v25 = vld [vmem:[#allocation2 + $0x8] sm:$0xff] }
0x2008   :  { %v5827_v22 = vcombine.high %v5819_v23, %v5819_v23  ;;  %v5826_v51 = vrot.slane %v5812_v0, %v9007_v19  ;;  %v9266_v28 = vrot.slane %v5674_v25, %v9007_v19  ;;  %v5829_v37 = vcombine.high %v5674_v25, %v5674_v25  ;;  %v5798_v0 = vld [vmem:[%s9526_s30 + $0x3d8] sm:$0xff] }
0x2009   :  { %v7786_v25 = vpack.c.bf16 %v5780_v20, %v5779_v2 }
0x200a   :  { %5918 = vmatprep.mubr.f32.mxu0 %v5827_v22  ;;  %v5828_v33 = vcombine.high %v5826_v51, %v5826_v51  ;;  %v5844_v34 = vcombine.high %v9266_v28, %v9266_v28  ;;  %v9283_v35 = vrot.slane %v5829_v37, %v9007_v19  ;;  %v5782_v37 = vld [vmem:[%s9526_s30 + $0x358] sm:$0xff] }
0x200b   :  { %5919 = vmatmul.mubr.f32.vlgmr.msra.gmra.mrb[60].mxu0 %v5819_v23  ;;  %v5797_v23 = vld [vmem:[%s9526_s30 + $0x3d0] sm:$0xff] }
0x200c   :  { %7739 = vmatpush3.bf16.msra.mxu0 %v7738_v58  ;;  %5988 = vmatprep.mubr.f32.mxu1 %v5828_v33  ;;  %v5845_v19 = vcombine.high %v9283_v35, %v9283_v35  ;;  %v5750_v58 = vld [vmem:[%s9526_s30 + $0x258] sm:$0xff]  ;;  %v7788_v22 = vpack.c.bf16 %v5798_v0, %v5797_v23  ;;  %v5752_v33 = vld [vmem:[%s9526_s30 + $0x268] sm:$0xff] }
0x200d   :  { %6058 = vmatprep.mubr.f32.mxu0 %v5844_v34  ;;  %5989 = vmatmul.mubr.f32.vlgmr.msra.gmra.mrb[72].mxu1 %v5826_v51  ;;  %v5781_v51 = vld [vmem:[%s9526_s30 + $0x350] sm:$0xff]  ;;  %v7758_v29 = vpack.c.bf16 %v5750_v58, %v5749_v24  ;;  %v7762_v42 = vpack.c.bf16 %v5752_v33, %v5751_v32 }
0x200e   :  { %7771 = vmatpush3.bf16.msra.mxu1 %v7770_v30  ;;  %7741 = vmatprep.subr.bf16.mxu0 %v7740_v4  ;;  %v5800_v30 = vld [vmem:[%s9526_s30 + $0x3e8] sm:$0xff]  ;;  %v7790_v34 = vpack.c.bf16 %v5782_v37, %v5781_v51  ;;  %v5769_v4 = vld [vmem:[%s9526_s30 + $0x2f0] sm:$0xff] }
0x200f   :  { %6128 = vmatprep.mubr.f32.mxu1 %v5845_v19  ;;  %7773 = vmatprep.subr.bf16.mxu1 %v7772_v40  ;;  %v7792_v39 = vpack.c.bf16 %v5800_v30, %v5799_v7  ;;  %v5783_v40 = vld [vmem:[%s9526_s30 + $0x360] sm:$0xff]  ;;  %v5801_v19 = vld [vmem:[%s9526_s30 + $0x3f0] sm:$0xff]  ;;  %v7764_v45 = vpack.c.bf16 %v5770_v36, %v5769_v4 }
0x2010   :  { %7743 = vmatpush3.bf16.msra.mxu0 %v7742_v44  ;;  %v5802_v44 = vld [vmem:[%s9526_s30 + $0x3f8] sm:$0xff]  ;;  %v7794_v46 = vpack.c.bf16 %v5784_v9, %v5783_v40 }
0x2011   :  { %7745 = vmatprep.subr.bf16.mxu0 %v7744_v52  ;;  %v5754_v52 = vld [vmem:[%s9526_s30 + $0x278] sm:$0xff]  ;;  %v7796_v17 = vpack.c.bf16 %v5802_v44, %v5801_v19 }
0x2012   :  { %7775 = vmatpush3.bf16.msra.mxu1 %v7774_v59  ;;  %v5785_v59 = vld [vmem:[%s9526_s30 + $0x370] sm:$0xff]  ;;  %v7766_v61 = vpack.c.bf16 %v5754_v52, %v5753_v50  ;;  %s7913_s30 = smov [#allocation3]  }
0x2013   :  { %7777 = vmatprep.subr.bf16.mxu1 %v7776_v1  ;;  %v7798_v1 = vpack.c.bf16 %v5786_v60, %v5785_v59  ;;  %s6142_s10 = sshll.u32 %s7913_s30, 4  ;;  %s6143_s10 = int_to_ptr.vmem [resolvable:$true] %s6142_s10 }
0x2014   :  { %7747 = vmatpush3.bf16.msra.mxu0 %v7746_v3  ;;  %s7884_s14 = scalar_lea.vmem %s6143_s10, 32  ;;  %p7889_p1 = scmp.lt.s32.totalorder %s6143_s10, %s6143_s10 }
0x2015   :  { %7749 = vmatprep.subr.bf16.mxu0 %v7748_v63  ;;  %p7885_p0 = scmp.ne.s32.totalorder %s6143_s10, %s7884_s14  ;;  %p7890_p2 = scmp.lt.s32.totalorder %s7884_s14, %s7884_s14 }
0x2016   :  { %7779 = vmatpush3.bf16.msra.mxu1 %v7778_v5 }
0x2017   :  { %7781 = vmatprep.subr.bf16.mxu1 %v7780_v8  ;;  %p7891_p3 = por %p7890_p2, %p7889_p1 }
0x2018   :  { %7751 = vmatpush3.bf16.msra.mxu0 %v7750_v10 }
0x2019   :  { %7753 = vmatprep.subr.bf16.mxu0 %v7752_v13  ;;  %p7892_p4 = pnand %p7891_p3, %p7885_p0 }
0x201a   :  { %7783 = vmatpush3.bf16.msra.mxu1 %v7782_v18 }
0x201b   :  { %7785 = vmatprep.subr.bf16.mxu1 %v7784_v14 }
0x201c   :  { %7755 = vmatpush3.bf16.msra.mxu0 %v7754_v62 }
0x201d   :  { %7757 = vmatprep.subr.bf16.mxu0 %v7756_v56 }
0x201e   :  { %7787 = vmatpush3.bf16.msra.mxu1 %v7786_v25 }
0x201f   :  { %7789 = vmatprep.subr.bf16.mxu1 %v7788_v22 }
0x2020   :  { %7759 = vmatpush3.bf16.msra.mxu0 %v7758_v29 }
0x2021   :  { %7761 = vmatprep.subr.bf16.mxu0 %v7760_v31 }
0x2022   :  { %7791 = vmatpush3.bf16.msra.mxu1 %v7790_v34 }
0x2023   :  { %7793 = vmatprep.subr.bf16.mxu1 %v7792_v39 }
0x2024   :  { %7763 = vmatpush3.bf16.msra.mxu0 %v7762_v42 }
0x2025   :  { %7765 = vmatprep.subr.bf16.mxu0 %v7764_v45 }
0x2026   :  { %7795 = vmatpush3.bf16.msra.mxu1 %v7794_v46 }
0x2027   :  { %7797 = vmatprep.subr.bf16.mxu1 %v7796_v17 }
0x2028   :  { %7767 = vmatpush3.bf16.msra.mxu0 %v7766_v61 }
0x202a   :  { %7799 = vmatpush3.bf16.msra.mxu1 %v7798_v1 }
0x202b   :  { %6059 = vmatmul.mubr.f32.vlgmr.msra.gmra.mrb[62].mxu0 %v9266_v28 }
0x202d   :  { %6129 = vmatmul.mubr.f32.vlgmr.msra.gmra.mrb[74].mxu1 %v9283_v35 }
0x20de   :  { %v6622_v43 = vpop.f32.mrb[60].mxu0 }
0x20df   :  { %v6623_v3 = vpop.f32.mrb[61].mxu0 }
0x20e0   :  { %v6624_v53 = vadd.f32 %v6623_v3, %v6622_v43  ;;  %v6657_v41 = vpop.f32.mrb[72].mxu1 }
0x20e1   :  { %v6658_v63 = vpop.f32.mrb[73].mxu1 }
0x20e2   :  { %v5921_v21 = vadd.f32 %v6624_v53, %v6323_v47  ;;  %v6659_v16 = vadd.f32 %v6658_v63, %v6657_v41 }
0x20e4   :  { %v5991_v5 = vadd.f32 %v6659_v16, %v5921_v21 }
0x20fe   :  { %v6692_v6 = vpop.f32.mrb[62].mxu0 }
0x20ff   :  { %v6693_v38 = vpop.f32.mrb[63].mxu0 }
0x2100   :  { %v6694_v8 = vadd.f32 %v6693_v38, %v6692_v6  ;;  %v6727_v49 = vpop.f32.mrb[74].mxu1 }
0x2101   :  { %v6728_v55 = vpop.f32.mrb[75].mxu1 }
0x2102   :  { %v6061_v28 = vadd.f32 %v6694_v8, %v5991_v5  ;;  %v6729_v35 = vadd.f32 %v6728_v55, %v6727_v49 }
0x2104   :  { %v6131_v10 = vadd.f32 %v6729_v35, %v6061_v28 }
0x2106   :  { %6135 = vst.msk [vmem:[#allocation3] sm:$0x3] %vm6134_vm8, %v6131_v10 }
0x2107   :  { %7895 = shalt.err (!%p7892_p4)
}
0x2108   :  { %s9528_s9 = sld [smem:[#allocation21_spill]] }
0x210e   :  { %s7896_s23 = scalar_lea.hbm %s9528_s9, 32 }
0x210f   :  { %p7897_p5 = scmp.ne.s32.totalorder %s9528_s9, %s7896_s23  ;;  %p7900_p6 = scmp.lt.u32.totalorder %s7896_s23, %s9528_s9 }
0x2111   :  { %p7902_p7 = pnand %p7900_p6, %p7897_p5 }
0x2113   :  { %7905 = shalt.err (!%p7902_p7)
}
0x2114   :  { %6145 = dma.vmem_to_hbm [thread:$0]  %s6143_s10, 32, %s9528_s9, [#allocation4]  }
0x2115   :  { %7906 = dma.done.wait [#allocation4], 32  }
0x2116   :  { %7907 = vsyncadd [#allocation4], 4294967264 }
0x2117   :  { %6149 = vsyncpa [#allocation4], 1 }

</bundles_post_ra>
